<compile_context>
chip_gen: v6e
topology: v6e:2x2x1
jax: 0.10.0
libtpu: 0.0.40
codegen_flags: <defaults>
</compile_context>

<pallas_src>
from functools import partial

import jax
import jax.numpy as jnp
from jax import lax
from jax.experimental import pallas as pl
from jax.experimental.pallas import tpu as pltpu


def _silu_kernel(x):
    # x * sigmoid(x); exp and approx-reciprocal both use the EUP slot.
    return x * pl.reciprocal(1.0 + jnp.exp(-x), approx=True)


def sppf_kernel(x_ref, wr_ref, br_ref, wp_ref, bp_ref, o_ref, *scratch,
                use_concat):
    # x_ref : (1, H, W, Cin) bf16  -- one batch element per grid step
    # wr_ref: (Cin, Ch)  bf16      br_ref: (1, Ch)   f32
    # wp_ref: (4*Ch, Cout) bf16    bp_ref: (1, Cout) f32
    # scratch: padw (H, W+16, Ch) f32, padh (H+4, W, Ch) f32,
    #          [+ cat (H*W, 4*Ch) f32 when use_concat]
    if use_concat:
        padw_ref, padh_ref, cat_ref = scratch
    else:
        padw_ref, padh_ref = scratch

    H, W, Cin = x_ref.shape[1], x_ref.shape[2], x_ref.shape[3]
    Ch = wr_ref.shape[1]

    # ---- -inf borders: written once per grid step (they never change) ----
    padw_ref[:, 0:8, :] = jnp.full((H, 8, Ch), -jnp.inf, jnp.float32)
    padw_ref[:, 8 + W:16 + W, :] = jnp.full((H, 8, Ch), -jnp.inf, jnp.float32)
    padh_ref[0:2, :, :] = jnp.full((2, W, Ch), -jnp.inf, jnp.float32)
    padh_ref[2 + H:4 + H, :, :] = jnp.full((2, W, Ch), -jnp.inf, jnp.float32)

    # ---- reduction 1x1 conv (BN folded) + SiLU ----
    x = x_ref[0].astype(jnp.float32).reshape(H * W, Cin)
    y = jnp.dot(x.astype(jnp.bfloat16), wr_ref[...],
                preferred_element_type=jnp.float32) + br_ref[...]
    b1 = _silu_kernel(y).reshape(H, W, Ch)

    # ---- MaxPool2d(kernel=5, stride=1, padding=2), separable ----
    def maxpool5(a):
        # horizontal (W) pass: interior at sublane-aligned offset 8
        padw_ref[:, 8:8 + W, :] = a
        m = padw_ref[:, 6:6 + W, :]
        for d in range(1, 5):
            m = jnp.maximum(m, padw_ref[:, 6 + d:6 + d + W, :])
        # vertical (H) pass: H is a leading (non-tiled) dim, offsets are free
        padh_ref[2:2 + H, :, :] = m
        out = padh_ref[0:H, :, :]
        for d in range(1, 5):
            out = jnp.maximum(out, padh_ref[d:d + H, :, :])
        return out

    b2 = maxpool5(b1)
    b3 = maxpool5(b2)
    b4 = maxpool5(b3)

    # ---- projection 1x1 conv on concat([b1..b4]) (BN folded) + SiLU ----
    if use_concat:
        # Ch < 128: build the lane-concatenated activations and do one
        # long-K matmul (better MXU occupancy than 4 tiny-K dots).
        for i, b in enumerate((b1, b2, b3, b4)):
            cat_ref[:, i * Ch:(i + 1) * Ch] = b.reshape(H * W, Ch)
        z = jnp.dot(cat_ref[...].astype(jnp.bfloat16), wp_ref[...],
                    preferred_element_type=jnp.float32) + bp_ref[...]
    else:
        # Ch >= 128: sum of per-branch dots == concat-then-matmul (exact).
        z = bp_ref[...]
        for i, b in enumerate((b1, b2, b3, b4)):
            z = z + jnp.dot(b.reshape(H * W, Ch).astype(jnp.bfloat16),
                            wp_ref[i * Ch:(i + 1) * Ch, :],
                            preferred_element_type=jnp.float32)

    o_ref[0] = _silu_kernel(z).reshape(H, W, -1).astype(o_ref.dtype)


def sppf_pallas(x_nhwc, wr, br, wp, bp):
    """x_nhwc: f32 (N,H,W,Cin); wr (Cin,Ch); br (1,Ch); wp (4Ch,Cout); bp (1,Cout)."""
    N, H, W, Cin = x_nhwc.shape
    Ch = wr.shape[1]
    Cout = bp.shape[1]
    use_concat = Ch < 128

    # bf16 operands for the MXU (f32 accumulation in-kernel); halves HBM DMA.
    x_bf = x_nhwc.astype(jnp.bfloat16)
    wr_bf = wr.astype(jnp.bfloat16)
    wp_bf = wp.astype(jnp.bfloat16)
    br32 = br.astype(jnp.float32)
    bp32 = bp.astype(jnp.float32)

    scratch = [pltpu.VMEM((H, W + 16, Ch), jnp.float32),   # W-pass pad buffer
               pltpu.VMEM((H + 4, W, Ch), jnp.float32)]    # H-pass pad buffer
    if use_concat:
        scratch.append(pltpu.VMEM((H * W, 4 * Ch), jnp.float32))

    # Rough per-step VMEM need (lane-padded), x2 headroom, capped under
    # v7x's 64 MiB physical VMEM.
    def _rup(c):
        return max(c, 128)
    needed = (2 * H * W * _rup(Cin) * 2                       # x block, 2 bufs
              + 2 * H * W * _rup(Cout) * 4                    # out block, 2 bufs
              + 2 * (Cin * _rup(Ch) + 4 * Ch * _rup(Cout)) * 2
              + (H * (W + 16) + (H + 4) * W) * _rup(Ch) * 4
              + (H * W * _rup(4 * Ch) * 4 if use_concat else 0))
    vmem_limit = int(min(max(2 * needed, 16 * 2**20), 56 * 2**20))

    in_specs = [
        pl.BlockSpec((1, H, W, Cin), lambda n: (n, 0, 0, 0)),
        pl.BlockSpec((Cin, Ch), lambda n: (0, 0)),
        pl.BlockSpec((1, Ch), lambda n: (0, 0)),
        pl.BlockSpec((4 * Ch, Cout), lambda n: (0, 0)),
        pl.BlockSpec((1, Cout), lambda n: (0, 0)),
    ]
    out_spec = pl.BlockSpec((1, H, W, Cout), lambda n: (n, 0, 0, 0))

    # TODO(synk): for production-sized feature maps, add an H-tile grid axis
    # with a 6-row halo (3 sequential 5x5 pools) so per-step VMEM stays small
    # on v7x (64 MiB) and the DMA pipeline gets more steps.
    return pl.pallas_call(
        partial(sppf_kernel, use_concat=use_concat),
        out_shape=jax.ShapeDtypeStruct((N, H, W, Cout), x_nhwc.dtype),
        grid=(N,),
        in_specs=in_specs,
        out_specs=out_spec,
        scratch_shapes=scratch,
        compiler_params=pltpu.CompilerParams(
            dimension_semantics=("parallel",),   # batch is fully independent
            vmem_limit_bytes=vmem_limit),
    )(x_bf, wr_bf, br32, wp_bf, bp32)


def fold_bn(w, gamma, beta, mean, var, eps=1e-5):
    # w: (Cout, Cin) 1x1 conv weight (PyTorch (Cout, Cin, 1, 1) squeezed)
    scale = gamma / jnp.sqrt(var + eps)
    w_f = (w * scale[:, None]).T          # (Cin, Cout) for x @ w_f
    b_f = (beta - mean * scale)[None, :]  # (1, Cout)
    return w_f, b_f


def sppf_reference(x_nhwc, wr, br, wp, bp):
    # pure-JAX reference (for correctness check)
    b1 = jax.nn.silu(jnp.einsum("nhwc,cd->nhwd", x_nhwc, wr) + br[None])

    def mp(a):
        return lax.reduce_window(a, -jnp.inf, lax.max,
                                 (1, 5, 5, 1), (1, 1, 1, 1), "SAME")

    b2 = mp(b1)
    b3 = mp(b2)
    b4 = mp(b3)
    cat = jnp.concatenate([b1, b2, b3, b4], axis=-1)
    return jax.nn.silu(jnp.einsum("nhwc,cd->nhwd", cat, wp) + bp[None])


if __name__ == "__main__":
    N, Cin, H, W = 2, 8, 16, 16
    Cout = 8
    Ch = int(Cin * 0.5)                   # hidden channels (reduction_ratio=0.5)

    key = jax.random.PRNGKey(0)
    ks = jax.random.split(key, 11)

    # Input in PyTorch NCHW convention.
    x_nchw = jax.random.normal(ks[0], (N, Cin, H, W), dtype=jnp.float32)
    x_nhwc = jnp.transpose(x_nchw, (0, 2, 3, 1))

    # Deterministic synthetic parameters (Conv weight + BatchNorm stats).
    w_red = jax.random.normal(ks[1], (Ch, Cin), dtype=jnp.float32) * 0.2
    g_r = jax.random.uniform(ks[2], (Ch,), minval=0.5, maxval=1.5)
    b_r = jax.random.normal(ks[3], (Ch,)) * 0.1
    m_r = jax.random.normal(ks[4], (Ch,)) * 0.1
    v_r = jax.random.uniform(ks[5], (Ch,), minval=0.5, maxval=1.5)

    w_prj = jax.random.normal(ks[6], (Cout, 4 * Ch), dtype=jnp.float32) * 0.2
    g_p = jax.random.uniform(ks[7], (Cout,), minval=0.5, maxval=1.5)
    b_p = jax.random.normal(ks[8], (Cout,)) * 0.1
    m_p = jax.random.normal(ks[9], (Cout,)) * 0.1
    v_p = jax.random.uniform(ks[10], (Cout,), minval=0.5, maxval=1.5)

    wr, br = fold_bn(w_red, g_r, b_r, m_r, v_r)          # (Cin, Ch), (1, Ch)
    wp, bp = fold_bn(w_prj, g_p, b_p, m_p, v_p)          # (4*Ch, Cout), (1, Cout)

    out_nhwc = sppf_pallas(x_nhwc, wr, br, wp, bp)
    out_nhwc = jax.block_until_ready(out_nhwc)
    out_nchw = jnp.transpose(out_nhwc, (0, 3, 1, 2))     # back to PyTorch NCHW

    # Reference computed on the same bf16-rounded operands the kernel consumes
    # (kernel uses bf16 MXU dots with f32 accumulation + approx reciprocal).
    x_r = x_nhwc.astype(jnp.bfloat16).astype(jnp.float32)
    wr_r = wr.astype(jnp.bfloat16).astype(jnp.float32)
    wp_r = wp.astype(jnp.bfloat16).astype(jnp.float32)
    ref_nhwc = sppf_reference(x_r, wr_r, br, wp_r, bp)

    assert out_nchw.shape == (N, Cout, H, W)
    assert jnp.allclose(out_nhwc, ref_nhwc, rtol=3e-2, atol=3e-2), "mismatch vs reference"

    print("KERNEL_OK")
</pallas_src>

<mosaic_0001>
module attributes {stable_mosaic.version = 11 : i64} {
  func.func @sppf_kernel(%arg0: i32, %arg1: memref<1x16x16x8xbf16, #tpu.memory_space<vmem>>, %arg2: memref<8x4xbf16, #tpu.memory_space<vmem>>, %arg3: memref<1x4xf32, #tpu.memory_space<vmem>>, %arg4: memref<16x8xbf16, #tpu.memory_space<vmem>>, %arg5: memref<1x8xf32, #tpu.memory_space<vmem>>, %arg6: memref<1x16x16x8xf32, #tpu.memory_space<vmem>>, %arg7: memref<16x32x4xf32, #tpu.memory_space<vmem>>, %arg8: memref<20x16x4xf32, #tpu.memory_space<vmem>>, %arg9: memref<256x16xf32, #tpu.memory_space<vmem>>) attributes {dimension_semantics = [#tpu.dimension_semantics<parallel>], iteration_bounds = array<i64: 2>, scalar_prefetch = 0 : i64, scratch_operands = 3 : i64, tpu.core_type = #tpu.core_type<tc>, window_params = [{transform_indices = @transform_0, window_bounds = array<i64: 1, 16, 16, 8>}, {pipeline_mode = #tpu.pipeline_mode<synchronous>, transform_indices = @transform_1, window_bounds = array<i64: 8, 4>}, {pipeline_mode = #tpu.pipeline_mode<synchronous>, transform_indices = @transform_2, window_bounds = array<i64: 1, 4>}, {pipeline_mode = #tpu.pipeline_mode<synchronous>, transform_indices = @transform_3, window_bounds = array<i64: 16, 8>}, {pipeline_mode = #tpu.pipeline_mode<synchronous>, transform_indices = @transform_4, window_bounds = array<i64: 1, 8>}, {transform_indices = @transform_5, window_bounds = array<i64: 1, 16, 16, 8>}]} {
    %cst = arith.constant 0xFF800000 : f32
    %0 = vector.broadcast %cst : f32 to vector<16x8x4xf32>
    %c0 = arith.constant 0 : index
    %c0_0 = arith.constant 0 : index
    %c0_1 = arith.constant 0 : index
    %1 = vector.load %arg7[%c0, %c0_0, %c0_1] : memref<16x32x4xf32, #tpu.memory_space<vmem>>, vector<16x8x4xf32>
    tpu.vector_store %arg7[%c0, %c0_0, %c0_1], %0 {strides = array<i32>} : memref<16x32x4xf32, #tpu.memory_space<vmem>>, vector<16x8x4xf32>,
    %cst_2 = arith.constant 0xFF800000 : f32
    %2 = vector.broadcast %cst_2 : f32 to vector<16x8x4xf32>
    %c0_3 = arith.constant 0 : index
    %c24 = arith.constant 24 : index
    %c0_4 = arith.constant 0 : index
    %3 = vector.load %arg7[%c0_3, %c24, %c0_4] : memref<16x32x4xf32, #tpu.memory_space<vmem>>, vector<16x8x4xf32>
    tpu.vector_store %arg7[%c0_3, %c24, %c0_4], %2 {strides = array<i32>} : memref<16x32x4xf32, #tpu.memory_space<vmem>>, vector<16x8x4xf32>,
    %cst_5 = arith.constant 0xFF800000 : f32
    %4 = vector.broadcast %cst_5 : f32 to vector<2x16x4xf32>
    %c0_6 = arith.constant 0 : index
    %c0_7 = arith.constant 0 : index
    %c0_8 = arith.constant 0 : index
    %5 = vector.load %arg8[%c0_6, %c0_7, %c0_8] : memref<20x16x4xf32, #tpu.memory_space<vmem>>, vector<2x16x4xf32>
    tpu.vector_store %arg8[%c0_6, %c0_7, %c0_8], %4 {strides = array<i32>} : memref<20x16x4xf32, #tpu.memory_space<vmem>>, vector<2x16x4xf32>,
    %cst_9 = arith.constant 0xFF800000 : f32
    %6 = vector.broadcast %cst_9 : f32 to vector<2x16x4xf32>
    %c18 = arith.constant 18 : index
    %c0_10 = arith.constant 0 : index
    %c0_11 = arith.constant 0 : index
    %7 = vector.load %arg8[%c18, %c0_10, %c0_11] : memref<20x16x4xf32, #tpu.memory_space<vmem>>, vector<2x16x4xf32>
    tpu.vector_store %arg8[%c18, %c0_10, %c0_11], %6 {strides = array<i32>} : memref<20x16x4xf32, #tpu.memory_space<vmem>>, vector<2x16x4xf32>,
    %c0_12 = arith.constant 0 : index
    %c0_13 = arith.constant 0 : index
    %c0_14 = arith.constant 0 : index
    %c0_15 = arith.constant 0 : index
    %8 = vector.load %arg1[%c0_12, %c0_13, %c0_14, %c0_15] : memref<1x16x16x8xbf16, #tpu.memory_space<vmem>>, vector<1x16x16x8xbf16>
    %9 = vector.shape_cast %8 : vector<1x16x16x8xbf16> to vector<16x16x8xbf16>
    %10 = arith.extf %9 : vector<16x16x8xbf16> to vector<16x16x8xf32>
    %11 = vector.shape_cast %10 : vector<16x16x8xf32> to vector<256x8xf32>
    %12 = arith.truncf %11 : vector<256x8xf32> to vector<256x8xbf16>
    %c0_16 = arith.constant 0 : index
    %c0_17 = arith.constant 0 : index
    %13 = vector.load %arg2[%c0_16, %c0_17] : memref<8x4xbf16, #tpu.memory_space<vmem>>, vector<8x4xbf16>
    %cst_18 = arith.constant dense<0.000000e+00> : vector<256x4xf32>
    %14 = tpu.matmul %12, %13, %cst_18 {dimension_numbers = #tpu.dot_dimension_numbers<[1], [0], [0], [1], [0, 0, 1, 1], [], []>} : vector<256x8xbf16>, vector<8x4xbf16>, vector<256x4xf32> -> vector<256x4xf32>
    %c0_19 = arith.constant 0 : index
    %c0_20 = arith.constant 0 : index
    %15 = vector.load %arg3[%c0_19, %c0_20] : memref<1x4xf32, #tpu.memory_space<vmem>>, vector<1x4xf32>
    %16 = vector.broadcast %15 : vector<1x4xf32> to vector<256x4xf32>
    %17 = arith.addf %14, %16 : vector<256x4xf32>
    %cst_21 = arith.constant 0.000000e+00 : f32
    %18 = vector.broadcast %cst_21 : f32 to vector<256x4xf32>
    %19 = arith.subf %18, %17 : vector<256x4xf32>
    %20 = math.exp %19 : vector<256x4xf32>
    %cst_22 = arith.constant 1.000000e+00 : f32
    %21 = vector.broadcast %cst_22 : f32 to vector<256x4xf32>
    %22 = arith.addf %21, %20 : vector<256x4xf32>
    %23 = tpu.reciprocal %22 {approx = true} : vector<256x4xf32> -> vector<256x4xf32>
    %24 = arith.mulf %17, %23 : vector<256x4xf32>
    %25 = vector.shape_cast %24 : vector<256x4xf32> to vector<16x16x4xf32>
    %c0_23 = arith.constant 0 : index
    %c8 = arith.constant 8 : index
    %c0_24 = arith.constant 0 : index
    %26 = vector.load %arg7[%c0_23, %c8, %c0_24] : memref<16x32x4xf32, #tpu.memory_space<vmem>>, vector<16x16x4xf32>
    tpu.vector_store %arg7[%c0_23, %c8, %c0_24], %25 {strides = array<i32>} : memref<16x32x4xf32, #tpu.memory_space<vmem>>, vector<16x16x4xf32>,
    %c0_25 = arith.constant 0 : index
    %c6 = arith.constant 6 : index
    %c0_26 = arith.constant 0 : index
    %27 = vector.load %arg7[%c0_25, %c6, %c0_26] : memref<16x32x4xf32, #tpu.memory_space<vmem>>, vector<16x16x4xf32>
    %c0_27 = arith.constant 0 : index
    %c7 = arith.constant 7 : index
    %c0_28 = arith.constant 0 : index
    %28 = vector.load %arg7[%c0_27, %c7, %c0_28] : memref<16x32x4xf32, #tpu.memory_space<vmem>>, vector<16x16x4xf32>
    %29 = arith.maximumf %27, %28 : vector<16x16x4xf32>
    %c0_29 = arith.constant 0 : index
    %c8_30 = arith.constant 8 : index
    %c0_31 = arith.constant 0 : index
    %30 = vector.load %arg7[%c0_29, %c8_30, %c0_31] : memref<16x32x4xf32, #tpu.memory_space<vmem>>, vector<16x16x4xf32>
    %31 = arith.maximumf %29, %30 : vector<16x16x4xf32>
    %c0_32 = arith.constant 0 : index
    %c9 = arith.constant 9 : index
    %c0_33 = arith.constant 0 : index
    %32 = vector.load %arg7[%c0_32, %c9, %c0_33] : memref<16x32x4xf32, #tpu.memory_space<vmem>>, vector<16x16x4xf32>
    %33 = arith.maximumf %31, %32 : vector<16x16x4xf32>
    %c0_34 = arith.constant 0 : index
    %c10 = arith.constant 10 : index
    %c0_35 = arith.constant 0 : index
    %34 = vector.load %arg7[%c0_34, %c10, %c0_35] : memref<16x32x4xf32, #tpu.memory_space<vmem>>, vector<16x16x4xf32>
    %35 = arith.maximumf %33, %34 : vector<16x16x4xf32>
    %c2 = arith.constant 2 : index
    %c0_36 = arith.constant 0 : index
    %c0_37 = arith.constant 0 : index
    %36 = vector.load %arg8[%c2, %c0_36, %c0_37] : memref<20x16x4xf32, #tpu.memory_space<vmem>>, vector<16x16x4xf32>
    tpu.vector_store %arg8[%c2, %c0_36, %c0_37], %35 {strides = array<i32>} : memref<20x16x4xf32, #tpu.memory_space<vmem>>, vector<16x16x4xf32>,
    %c0_38 = arith.constant 0 : index
    %c0_39 = arith.constant 0 : index
    %c0_40 = arith.constant 0 : index
    %37 = vector.load %arg8[%c0_38, %c0_39, %c0_40] : memref<20x16x4xf32, #tpu.memory_space<vmem>>, vector<16x16x4xf32>
    %c1 = arith.constant 1 : index
    %c0_41 = arith.constant 0 : index
    %c0_42 = arith.constant 0 : index
    %38 = vector.load %arg8[%c1, %c0_41, %c0_42] : memref<20x16x4xf32, #tpu.memory_space<vmem>>, vector<16x16x4xf32>
    %39 = arith.maximumf %37, %38 : vector<16x16x4xf32>
    %c2_43 = arith.constant 2 : index
    %c0_44 = arith.constant 0 : index
    %c0_45 = arith.constant 0 : index
    %40 = vector.load %arg8[%c2_43, %c0_44, %c0_45] : memref<20x16x4xf32, #tpu.memory_space<vmem>>, vector<16x16x4xf32>
    %41 = arith.maximumf %39, %40 : vector<16x16x4xf32>
    %c3 = arith.constant 3 : index
    %c0_46 = arith.constant 0 : index
    %c0_47 = arith.constant 0 : index
    %42 = vector.load %arg8[%c3, %c0_46, %c0_47] : memref<20x16x4xf32, #tpu.memory_space<vmem>>, vector<16x16x4xf32>
    %43 = arith.maximumf %41, %42 : vector<16x16x4xf32>
    %c4 = arith.constant 4 : index
    %c0_48 = arith.constant 0 : index
    %c0_49 = arith.constant 0 : index
    %44 = vector.load %arg8[%c4, %c0_48, %c0_49] : memref<20x16x4xf32, #tpu.memory_space<vmem>>, vector<16x16x4xf32>
    %45 = arith.maximumf %43, %44 : vector<16x16x4xf32>
    %c0_50 = arith.constant 0 : index
    %c8_51 = arith.constant 8 : index
    %c0_52 = arith.constant 0 : index
    %46 = vector.load %arg7[%c0_50, %c8_51, %c0_52] : memref<16x32x4xf32, #tpu.memory_space<vmem>>, vector<16x16x4xf32>
    tpu.vector_store %arg7[%c0_50, %c8_51, %c0_52], %45 {strides = array<i32>} : memref<16x32x4xf32, #tpu.memory_space<vmem>>, vector<16x16x4xf32>,
    %c0_53 = arith.constant 0 : index
    %c6_54 = arith.constant 6 : index
    %c0_55 = arith.constant 0 : index
    %47 = vector.load %arg7[%c0_53, %c6_54, %c0_55] : memref<16x32x4xf32, #tpu.memory_space<vmem>>, vector<16x16x4xf32>
    %c0_56 = arith.constant 0 : index
    %c7_57 = arith.constant 7 : index
    %c0_58 = arith.constant 0 : index
    %48 = vector.load %arg7[%c0_56, %c7_57, %c0_58] : memref<16x32x4xf32, #tpu.memory_space<vmem>>, vector<16x16x4xf32>
    %49 = arith.maximumf %47, %48 : vector<16x16x4xf32>
    %c0_59 = arith.constant 0 : index
    %c8_60 = arith.constant 8 : index
    %c0_61 = arith.constant 0 : index
    %50 = vector.load %arg7[%c0_59, %c8_60, %c0_61] : memref<16x32x4xf32, #tpu.memory_space<vmem>>, vector<16x16x4xf32>
    %51 = arith.maximumf %49, %50 : vector<16x16x4xf32>
    %c0_62 = arith.constant 0 : index
    %c9_63 = arith.constant 9 : index
    %c0_64 = arith.constant 0 : index
    %52 = vector.load %arg7[%c0_62, %c9_63, %c0_64] : memref<16x32x4xf32, #tpu.memory_space<vmem>>, vector<16x16x4xf32>
    %53 = arith.maximumf %51, %52 : vector<16x16x4xf32>
    %c0_65 = arith.constant 0 : index
    %c10_66 = arith.constant 10 : index
    %c0_67 = arith.constant 0 : index
    %54 = vector.load %arg7[%c0_65, %c10_66, %c0_67] : memref<16x32x4xf32, #tpu.memory_space<vmem>>, vector<16x16x4xf32>
    %55 = arith.maximumf %53, %54 : vector<16x16x4xf32>
    %c2_68 = arith.constant 2 : index
    %c0_69 = arith.constant 0 : index
    %c0_70 = arith.constant 0 : index
    %56 = vector.load %arg8[%c2_68, %c0_69, %c0_70] : memref<20x16x4xf32, #tpu.memory_space<vmem>>, vector<16x16x4xf32>
    tpu.vector_store %arg8[%c2_68, %c0_69, %c0_70], %55 {strides = array<i32>} : memref<20x16x4xf32, #tpu.memory_space<vmem>>, vector<16x16x4xf32>,
    %c0_71 = arith.constant 0 : index
    %c0_72 = arith.constant 0 : index
    %c0_73 = arith.constant 0 : index
    %57 = vector.load %arg8[%c0_71, %c0_72, %c0_73] : memref<20x16x4xf32, #tpu.memory_space<vmem>>, vector<16x16x4xf32>
    %c1_74 = arith.constant 1 : index
    %c0_75 = arith.constant 0 : index
    %c0_76 = arith.constant 0 : index
    %58 = vector.load %arg8[%c1_74, %c0_75, %c0_76] : memref<20x16x4xf32, #tpu.memory_space<vmem>>, vector<16x16x4xf32>
    %59 = arith.maximumf %57, %58 : vector<16x16x4xf32>
    %c2_77 = arith.constant 2 : index
    %c0_78 = arith.constant 0 : index
    %c0_79 = arith.constant 0 : index
    %60 = vector.load %arg8[%c2_77, %c0_78, %c0_79] : memref<20x16x4xf32, #tpu.memory_space<vmem>>, vector<16x16x4xf32>
    %61 = arith.maximumf %59, %60 : vector<16x16x4xf32>
    %c3_80 = arith.constant 3 : index
    %c0_81 = arith.constant 0 : index
    %c0_82 = arith.constant 0 : index
    %62 = vector.load %arg8[%c3_80, %c0_81, %c0_82] : memref<20x16x4xf32, #tpu.memory_space<vmem>>, vector<16x16x4xf32>
    %63 = arith.maximumf %61, %62 : vector<16x16x4xf32>
    %c4_83 = arith.constant 4 : index
    %c0_84 = arith.constant 0 : index
    %c0_85 = arith.constant 0 : index
    %64 = vector.load %arg8[%c4_83, %c0_84, %c0_85] : memref<20x16x4xf32, #tpu.memory_space<vmem>>, vector<16x16x4xf32>
    %65 = arith.maximumf %63, %64 : vector<16x16x4xf32>
    %c0_86 = arith.constant 0 : index
    %c8_87 = arith.constant 8 : index
    %c0_88 = arith.constant 0 : index
    %66 = vector.load %arg7[%c0_86, %c8_87, %c0_88] : memref<16x32x4xf32, #tpu.memory_space<vmem>>, vector<16x16x4xf32>
    tpu.vector_store %arg7[%c0_86, %c8_87, %c0_88], %65 {strides = array<i32>} : memref<16x32x4xf32, #tpu.memory_space<vmem>>, vector<16x16x4xf32>,
    %c0_89 = arith.constant 0 : index
    %c6_90 = arith.constant 6 : index
    %c0_91 = arith.constant 0 : index
    %67 = vector.load %arg7[%c0_89, %c6_90, %c0_91] : memref<16x32x4xf32, #tpu.memory_space<vmem>>, vector<16x16x4xf32>
    %c0_92 = arith.constant 0 : index
    %c7_93 = arith.constant 7 : index
    %c0_94 = arith.constant 0 : index
    %68 = vector.load %arg7[%c0_92, %c7_93, %c0_94] : memref<16x32x4xf32, #tpu.memory_space<vmem>>, vector<16x16x4xf32>
    %69 = arith.maximumf %67, %68 : vector<16x16x4xf32>
    %c0_95 = arith.constant 0 : index
    %c8_96 = arith.constant 8 : index
    %c0_97 = arith.constant 0 : index
    %70 = vector.load %arg7[%c0_95, %c8_96, %c0_97] : memref<16x32x4xf32, #tpu.memory_space<vmem>>, vector<16x16x4xf32>
    %71 = arith.maximumf %69, %70 : vector<16x16x4xf32>
    %c0_98 = arith.constant 0 : index
    %c9_99 = arith.constant 9 : index
    %c0_100 = arith.constant 0 : index
    %72 = vector.load %arg7[%c0_98, %c9_99, %c0_100] : memref<16x32x4xf32, #tpu.memory_space<vmem>>, vector<16x16x4xf32>
    %73 = arith.maximumf %71, %72 : vector<16x16x4xf32>
    %c0_101 = arith.constant 0 : index
    %c10_102 = arith.constant 10 : index
    %c0_103 = arith.constant 0 : index
    %74 = vector.load %arg7[%c0_101, %c10_102, %c0_103] : memref<16x32x4xf32, #tpu.memory_space<vmem>>, vector<16x16x4xf32>
    %75 = arith.maximumf %73, %74 : vector<16x16x4xf32>
    %c2_104 = arith.constant 2 : index
    %c0_105 = arith.constant 0 : index
    %c0_106 = arith.constant 0 : index
    %76 = vector.load %arg8[%c2_104, %c0_105, %c0_106] : memref<20x16x4xf32, #tpu.memory_space<vmem>>, vector<16x16x4xf32>
    tpu.vector_store %arg8[%c2_104, %c0_105, %c0_106], %75 {strides = array<i32>} : memref<20x16x4xf32, #tpu.memory_space<vmem>>, vector<16x16x4xf32>,
    %c0_107 = arith.constant 0 : index
    %c0_108 = arith.constant 0 : index
    %c0_109 = arith.constant 0 : index
    %77 = vector.load %arg8[%c0_107, %c0_108, %c0_109] : memref<20x16x4xf32, #tpu.memory_space<vmem>>, vector<16x16x4xf32>
    %c1_110 = arith.constant 1 : index
    %c0_111 = arith.constant 0 : index
    %c0_112 = arith.constant 0 : index
    %78 = vector.load %arg8[%c1_110, %c0_111, %c0_112] : memref<20x16x4xf32, #tpu.memory_space<vmem>>, vector<16x16x4xf32>
    %79 = arith.maximumf %77, %78 : vector<16x16x4xf32>
    %c2_113 = arith.constant 2 : index
    %c0_114 = arith.constant 0 : index
    %c0_115 = arith.constant 0 : index
    %80 = vector.load %arg8[%c2_113, %c0_114, %c0_115] : memref<20x16x4xf32, #tpu.memory_space<vmem>>, vector<16x16x4xf32>
    %81 = arith.maximumf %79, %80 : vector<16x16x4xf32>
    %c3_116 = arith.constant 3 : index
    %c0_117 = arith.constant 0 : index
    %c0_118 = arith.constant 0 : index
    %82 = vector.load %arg8[%c3_116, %c0_117, %c0_118] : memref<20x16x4xf32, #tpu.memory_space<vmem>>, vector<16x16x4xf32>
    %83 = arith.maximumf %81, %82 : vector<16x16x4xf32>
    %c4_119 = arith.constant 4 : index
    %c0_120 = arith.constant 0 : index
    %c0_121 = arith.constant 0 : index
    %84 = vector.load %arg8[%c4_119, %c0_120, %c0_121] : memref<20x16x4xf32, #tpu.memory_space<vmem>>, vector<16x16x4xf32>
    %85 = arith.maximumf %83, %84 : vector<16x16x4xf32>
    %86 = vector.shape_cast %25 : vector<16x16x4xf32> to vector<256x4xf32>
    %c0_122 = arith.constant 0 : index
    %c0_123 = arith.constant 0 : index
    %87 = vector.load %arg9[%c0_122, %c0_123] : memref<256x16xf32, #tpu.memory_space<vmem>>, vector<256x4xf32>
    tpu.vector_store %arg9[%c0_122, %c0_123], %86 {strides = array<i32>} : memref<256x16xf32, #tpu.memory_space<vmem>>, vector<256x4xf32>,
    %88 = vector.shape_cast %45 : vector<16x16x4xf32> to vector<256x4xf32>
    %c0_124 = arith.constant 0 : index
    %c4_125 = arith.constant 4 : index
    %89 = vector.load %arg9[%c0_124, %c4_125] : memref<256x16xf32, #tpu.memory_space<vmem>>, vector<256x4xf32>
    tpu.vector_store %arg9[%c0_124, %c4_125], %88 {strides = array<i32>} : memref<256x16xf32, #tpu.memory_space<vmem>>, vector<256x4xf32>,
    %90 = vector.shape_cast %65 : vector<16x16x4xf32> to vector<256x4xf32>
    %c0_126 = arith.constant 0 : index
    %c8_127 = arith.constant 8 : index
    %91 = vector.load %arg9[%c0_126, %c8_127] : memref<256x16xf32, #tpu.memory_space<vmem>>, vector<256x4xf32>
    tpu.vector_store %arg9[%c0_126, %c8_127], %90 {strides = array<i32>} : memref<256x16xf32, #tpu.memory_space<vmem>>, vector<256x4xf32>,
    %92 = vector.shape_cast %85 : vector<16x16x4xf32> to vector<256x4xf32>
    %c0_128 = arith.constant 0 : index
    %c12 = arith.constant 12 : index
    %93 = vector.load %arg9[%c0_128, %c12] : memref<256x16xf32, #tpu.memory_space<vmem>>, vector<256x4xf32>
    tpu.vector_store %arg9[%c0_128, %c12], %92 {strides = array<i32>} : memref<256x16xf32, #tpu.memory_space<vmem>>, vector<256x4xf32>,
    %c0_129 = arith.constant 0 : index
    %c0_130 = arith.constant 0 : index
    %94 = vector.load %arg9[%c0_129, %c0_130] : memref<256x16xf32, #tpu.memory_space<vmem>>, vector<256x16xf32>
    %95 = arith.truncf %94 : vector<256x16xf32> to vector<256x16xbf16>
    %c0_131 = arith.constant 0 : index
    %c0_132 = arith.constant 0 : index
    %96 = vector.load %arg4[%c0_131, %c0_132] : memref<16x8xbf16, #tpu.memory_space<vmem>>, vector<16x8xbf16>
    %cst_133 = arith.constant dense<0.000000e+00> : vector<256x8xf32>
    %97 = tpu.matmul %95, %96, %cst_133 {dimension_numbers = #tpu.dot_dimension_numbers<[1], [0], [0], [1], [0, 0, 1, 1], [], []>} : vector<256x16xbf16>, vector<16x8xbf16>, vector<256x8xf32> -> vector<256x8xf32>
    %c0_134 = arith.constant 0 : index
    %c0_135 = arith.constant 0 : index
    %98 = vector.load %arg5[%c0_134, %c0_135] : memref<1x8xf32, #tpu.memory_space<vmem>>, vector<1x8xf32>
    %99 = vector.broadcast %98 : vector<1x8xf32> to vector<256x8xf32>
    %100 = arith.addf %97, %99 : vector<256x8xf32>
    %cst_136 = arith.constant 0.000000e+00 : f32
    %101 = vector.broadcast %cst_136 : f32 to vector<256x8xf32>
    %102 = arith.subf %101, %100 : vector<256x8xf32>
    %103 = math.exp %102 : vector<256x8xf32>
    %cst_137 = arith.constant 1.000000e+00 : f32
    %104 = vector.broadcast %cst_137 : f32 to vector<256x8xf32>
    %105 = arith.addf %104, %103 : vector<256x8xf32>
    %106 = tpu.reciprocal %105 {approx = true} : vector<256x8xf32> -> vector<256x8xf32>
    %107 = arith.mulf %100, %106 : vector<256x8xf32>
    %108 = vector.shape_cast %107 : vector<256x8xf32> to vector<16x16x8xf32>
    %c0_138 = arith.constant 0 : index
    %c0_139 = arith.constant 0 : index
    %c0_140 = arith.constant 0 : index
    %c0_141 = arith.constant 0 : index
    %109 = vector.load %arg6[%c0_138, %c0_139, %c0_140, %c0_141] : memref<1x16x16x8xf32, #tpu.memory_space<vmem>>, vector<1x16x16x8xf32>
    %110 = vector.shape_cast %109 : vector<1x16x16x8xf32> to vector<16x16x8xf32>
    %111 = vector.shape_cast %108 : vector<16x16x8xf32> to vector<1x16x16x8xf32>
    tpu.vector_store %arg6[%c0_138, %c0_139, %c0_140, %c0_141], %111 {strides = array<i32>} : memref<1x16x16x8xf32, #tpu.memory_space<vmem>>, vector<1x16x16x8xf32>,
    return
  }
  func.func @transform_0(%arg0: i32) -> (i32, i32, i32, i32) {
    %c0_i32 = arith.constant 0 : i32
    %c0_i32_0 = arith.constant 0 : i32
    %c0_i32_1 = arith.constant 0 : i32
    %c0_i32_2 = arith.constant 0 : i32
    return %arg0, %c0_i32, %c0_i32_0, %c0_i32_1 : i32, i32, i32, i32
  }
  func.func @transform_1(%arg0: i32) -> (i32, i32) {
    %c0_i32 = arith.constant 0 : i32
    %c0_i32_0 = arith.constant 0 : i32
    %c0_i32_1 = arith.constant 0 : i32
    return %c0_i32, %c0_i32_0 : i32, i32
  }
  func.func @transform_2(%arg0: i32) -> (i32, i32) {
    %c0_i32 = arith.constant 0 : i32
    %c0_i32_0 = arith.constant 0 : i32
    %c0_i32_1 = arith.constant 0 : i32
    return %c0_i32, %c0_i32_0 : i32, i32
  }
  func.func @transform_3(%arg0: i32) -> (i32, i32) {
    %c0_i32 = arith.constant 0 : i32
    %c0_i32_0 = arith.constant 0 : i32
    %c0_i32_1 = arith.constant 0 : i32
    return %c0_i32, %c0_i32_0 : i32, i32
  }
  func.func @transform_4(%arg0: i32) -> (i32, i32) {
    %c0_i32 = arith.constant 0 : i32
    %c0_i32_0 = arith.constant 0 : i32
    %c0_i32_1 = arith.constant 0 : i32
    return %c0_i32, %c0_i32_0 : i32, i32
  }
  func.func @transform_5(%arg0: i32) -> (i32, i32, i32, i32) {
    %c0_i32 = arith.constant 0 : i32
    %c0_i32_0 = arith.constant 0 : i32
    %c0_i32_1 = arith.constant 0 : i32
    %c0_i32_2 = arith.constant 0 : i32
    return %arg0, %c0_i32, %c0_i32_0, %c0_i32_1 : i32, i32, i32, i32
  }
}

</mosaic_0001>

<bundles_post_ra>
// kernel: tpu_custom_call.1
= control target key start
LH: loop header
LB: loop body
LE: loop exit
PB: predicated region body
PF: predicated region fallthrough
CT: control target
= control target key end

     0   :  { %s4249_s18 = smov 0   ;;  %s6067_s0 = inlined_call_operand.vmem [shape: bf16[2,16,16,8], index: 0, kind: input, shape index: {}]   ;;  %s6068_s1 = inlined_call_operand.vmem [shape: bf16[8,4], index: 1, kind: input, shape index: {}]   ;;  %s6069_s2 = inlined_call_operand.vmem [shape: f32[1,4], index: 2, kind: input, shape index: {}]   ;;  %s6070_s3 = inlined_call_operand.vmem [shape: bf16[16,8], index: 3, kind: input, shape index: {}]   ;;  %s6071_s4 = inlined_call_operand.vmem [shape: f32[1,8], index: 4, kind: input, shape index: {}]   ;;  %s6072_s5 = inlined_call_operand.vmem [shape: f32[2,16,16,8], index: 5, kind: output, shape index: {}]  }
   0x1 LB: > { %s3753_s19 = sadd.s32 4294967295, %s4213_s18   ;;  %p3757_p0 = scmp.ge.s32.totalorder %s4213_s18, 1  ;;  %s4213_s18 = sphi %s4249_s18, %s15_s18  }
   0x2   : > { %p187_p1 = scmp.lt.s32.totalorder %s4213_s18, 3 }
   0x4   : > { %p188_p2 = pnand %p3757_p0, %p187_p1 }
   0x5   : > { %p215_p3 = scmp.lt.s32.totalorder (!%p188_p2), %s3753_s19, 1  ;;  %s4216_s28 = smov (!%p188_p2), 4  }
   0x6   : > { %191 = sbr.rel (%p188_p2) target bundleno = 943 (0x3af), region = 40  ;;  %s4217_s29 = smov (!%p188_p2), 8  }
   0x7   : > { %s4218_s30 = smov (!%p188_p2), 12  }
   0xb   : > { %v348_v0 = vld [vmem:[%s6068_s1] sm:$0xf]  ;;  %vm405_vm0 = vcmask 1043456   ;;  %vm226_vm1 = vcmask 31744   ;;  %s6074_s19 = smov (!%p215_p3, %s3753_s19), 1  ;;  %v4215_v2 = vmov -inf  }
   0xc   : > { %3919 = vmatprep.subr.msk.bf16.mxu0 %vm405_vm0, %v348_v0  ;;  %v407_v1 = vsel %vm405_vm0, %v348_v0, 0  ;;  %228 = vst.msk [vmem:[#allocation2 + $0x20] sm:$0xff] %vm226_vm1, %v4215_v2  ;;  %227 = vst.msk [vmem:[#allocation2] sm:$0xff] %vm226_vm1, %v4215_v2  ;;  %s3815_s22 = sshll.u32 %s6074_s19, 7  ;;  %vm356_vm2 = vcmask 64512   ;;  %vm2846_vm3 = vcmask 64544  }
   0xd   : > { %3852 = vmatpush3.bf16.msra.mxu0 %v407_v1  ;;  %229 = vst.msk [vmem:[#allocation2 + $0x40] sm:$0xff] %vm226_vm1, %v4215_v2  ;;  %230 = vst.msk [vmem:[#allocation2 + $0x60] sm:$0xff] %vm226_vm1, %v4215_v2  ;;  %s4306_s25 = scalar_lea.vmem %s6067_s0, %s3815_s22  ;;  %v4343_v19 = vld [vmem:[%s6069_s2] ss:$0 sm:$0xff]  ;;  %vm3007_vm4 = vcmask 97344   ;;  %vm3168_vm5 = vcmask 130144  }
   0xe   : > { %231 = vst.msk [vmem:[#allocation2 + $0x80] sm:$0xff] %vm226_vm1, %v4215_v2  ;;  %232 = vst.msk [vmem:[#allocation2 + $0xa0] sm:$0xff] %vm226_vm1, %v4215_v2  ;;  %v3932_v3 = vld [vmem:[%s4306_s25] sm:$0xff]   ;;  %v3933_v4 = vld [vmem:[%s4306_s25 + $0x8] sm:$0xff]   ;;  %vm3264_vm6 = vcmask 130048   ;;  %s3816_s10 = sshll.u32 %s6074_s19, 8 }
   0xf   : > { %233 = vst.msk [vmem:[#allocation2 + $0xc0] sm:$0xff] %vm226_vm1, %v4215_v2  ;;  %234 = vst.msk [vmem:[#allocation2 + $0xe0] sm:$0xff] %vm226_vm1, %v4215_v2  ;;  %3853 = vmatprep.mubr.msk.bf16.mxu0 %vm356_vm2, %v3932_v3  ;;  %v3934_v5 = vld [vmem:[%s4306_s25 + $0x10] sm:$0xff]   ;;  %v3935_v6 = vld [vmem:[%s4306_s25 + $0x18] sm:$0xff]   ;;  %s5873_s13 = scalar_lea.vmem %s6072_s5, %s3816_s10 }
  0x10   : > { %235 = vst.msk [vmem:[#allocation2 + $0x100] sm:$0xff] %vm226_vm1, %v4215_v2  ;;  %236 = vst.msk [vmem:[#allocation2 + $0x120] sm:$0xff] %vm226_vm1, %v4215_v2  ;;  %3854 = vmatmul.mubr.msk.bf16.vlgmr.msra.gmra.mxu0 %vm356_vm2, %v3933_v4  ;;  %v3936_v7 = vld [vmem:[%s4306_s25 + $0x20] sm:$0xff]   ;;  %v3937_v8 = vld [vmem:[%s4306_s25 + $0x28] sm:$0xff]  }
  0x11   : > { %237 = vst.msk [vmem:[#allocation2 + $0x140] sm:$0xff] %vm226_vm1, %v4215_v2  ;;  %238 = vst.msk [vmem:[#allocation2 + $0x160] sm:$0xff] %vm226_vm1, %v4215_v2  ;;  %3857 = vmatprep.mubr.msk.bf16.mxu0 %vm356_vm2, %v3934_v5  ;;  %v3938_v9 = vld [vmem:[%s4306_s25 + $0x30] sm:$0xff]   ;;  %v3939_v10 = vld [vmem:[%s4306_s25 + $0x38] sm:$0xff]  }
  0x12   : > { %239 = vst.msk [vmem:[#allocation2 + $0x180] sm:$0xff] %vm226_vm1, %v4215_v2  ;;  %240 = vst.msk [vmem:[#allocation2 + $0x1a0] sm:$0xff] %vm226_vm1, %v4215_v2  ;;  %v3940_v11 = vld [vmem:[%s4306_s25 + $0x40] sm:$0xff]   ;;  %v3941_v12 = vld [vmem:[%s4306_s25 + $0x48] sm:$0xff]  }
  0x13   : > { %241 = vst.msk [vmem:[#allocation2 + $0x1c0] sm:$0xff] %vm226_vm1, %v4215_v2  ;;  %242 = vst.msk [vmem:[#allocation2 + $0x1e0] sm:$0xff] %vm226_vm1, %v4215_v2  ;;  %v3942_v13 = vld [vmem:[%s4306_s25 + $0x50] sm:$0xff]   ;;  %v3943_v14 = vld [vmem:[%s4306_s25 + $0x58] sm:$0xff]  }
  0x14   : > { %243 = vst.msk [vmem:[#allocation2 + $0x18] sm:$0xff] %vm226_vm1, %v4215_v2  ;;  %244 = vst.msk [vmem:[#allocation2 + $0x38] sm:$0xff] %vm226_vm1, %v4215_v2  ;;  %v3944_v15 = vld [vmem:[%s4306_s25 + $0x60] sm:$0xff]   ;;  %v3945_v16 = vld [vmem:[%s4306_s25 + $0x68] sm:$0xff]  }
  0x15   : > { %245 = vst.msk [vmem:[#allocation2 + $0x58] sm:$0xff] %vm226_vm1, %v4215_v2  ;;  %246 = vst.msk [vmem:[#allocation2 + $0x78] sm:$0xff] %vm226_vm1, %v4215_v2  ;;  %v3946_v17 = vld [vmem:[%s4306_s25 + $0x70] sm:$0xff]   ;;  %v3947_v18 = vld [vmem:[%s4306_s25 + $0x78] sm:$0xff]  }
  0x16   : > { %247 = vst.msk [vmem:[#allocation2 + $0x98] sm:$0xff] %vm226_vm1, %v4215_v2  ;;  %248 = vst.msk [vmem:[#allocation2 + $0xb8] sm:$0xff] %vm226_vm1, %v4215_v2 }
  0x17   : > { %249 = vst.msk [vmem:[#allocation2 + $0xd8] sm:$0xff] %vm226_vm1, %v4215_v2  ;;  %250 = vst.msk [vmem:[#allocation2 + $0xf8] sm:$0xff] %vm226_vm1, %v4215_v2 }
  0x18   : > { %251 = vst.msk [vmem:[#allocation2 + $0x118] sm:$0xff] %vm226_vm1, %v4215_v2  ;;  %252 = vst.msk [vmem:[#allocation2 + $0x138] sm:$0xff] %vm226_vm1, %v4215_v2  ;;  %3858 = vmatmul.mubr.msk.bf16.gmra.mxu0 %vm356_vm2, %v3935_v6 }
  0x19   : > { %253 = vst.msk [vmem:[#allocation2 + $0x158] sm:$0xff] %vm226_vm1, %v4215_v2  ;;  %254 = vst.msk [vmem:[#allocation2 + $0x178] sm:$0xff] %vm226_vm1, %v4215_v2  ;;  %3861 = vmatprep.mubr.msk.bf16.mxu0 %vm356_vm2, %v3936_v7 }
  0x1a   : > { %255 = vst.msk [vmem:[#allocation2 + $0x198] sm:$0xff] %vm226_vm1, %v4215_v2  ;;  %256 = vst.msk [vmem:[#allocation2 + $0x1b8] sm:$0xff] %vm226_vm1, %v4215_v2 }
  0x1b   : > { %257 = vst.msk [vmem:[#allocation2 + $0x1d8] sm:$0xff] %vm226_vm1, %v4215_v2  ;;  %258 = vst.msk [vmem:[#allocation2 + $0x1f8] sm:$0xff] %vm226_vm1, %v4215_v2 }
  0x1c   : > { %259 = vst.msk [vmem:[#allocation3] sm:$0xff] %vm226_vm1, %v4215_v2  ;;  %260 = vst.msk [vmem:[#allocation3 + $0x8] sm:$0xff] %vm226_vm1, %v4215_v2 }
  0x1d   : > { %261 = vst.msk [vmem:[#allocation3 + $0x10] sm:$0xff] %vm226_vm1, %v4215_v2  ;;  %262 = vst.msk [vmem:[#allocation3 + $0x18] sm:$0xff] %vm226_vm1, %v4215_v2 }
  0x1e   : > { %264 = vst.msk [vmem:[#allocation3 + $0x120] sm:$0xff] %vm226_vm1, %v4215_v2  ;;  %265 = vst.msk [vmem:[#allocation3 + $0x128] sm:$0xff] %vm226_vm1, %v4215_v2 }
  0x1f   : > { %266 = vst.msk [vmem:[#allocation3 + $0x130] sm:$0xff] %vm226_vm1, %v4215_v2  ;;  %267 = vst.msk [vmem:[#allocation3 + $0x138] sm:$0xff] %vm226_vm1, %v4215_v2 }
  0x20   : > { %3862 = vmatmul.mubr.msk.bf16.gmra.mxu0 %vm356_vm2, %v3937_v8 }
  0x21   : > { %3865 = vmatprep.mubr.msk.bf16.mxu0 %vm356_vm2, %v3938_v9 }
  0x28   : > { %3866 = vmatmul.mubr.msk.bf16.gmra.mxu0 %vm356_vm2, %v3939_v10 }
  0x29   : > { %3869 = vmatprep.mubr.msk.bf16.mxu0 %vm356_vm2, %v3940_v11 }
  0x30   : > { %3870 = vmatmul.mubr.msk.bf16.gmra.mxu0 %vm356_vm2, %v3941_v12 }
  0x31   : > { %3873 = vmatprep.mubr.msk.bf16.mxu0 %vm356_vm2, %v3942_v13 }
  0x38   : > { %3874 = vmatmul.mubr.msk.bf16.gmra.mxu0 %vm356_vm2, %v3943_v14 }
  0x39   : > { %3877 = vmatprep.mubr.msk.bf16.mxu0 %vm356_vm2, %v3944_v15 }
  0x40   : > { %3878 = vmatmul.mubr.msk.bf16.gmra.mxu0 %vm356_vm2, %v3945_v16 }
  0x41   : > { %3881 = vmatprep.mubr.msk.bf16.mxu0 %vm356_vm2, %v3946_v17 }
  0x48   : > { %3882 = vmatmul.mubr.msk.bf16.gmra.mxu0 %vm356_vm2, %v3947_v18 }
  0xd0   : > { %v3855_v20 = vpop.f32.mrf.mxu0 }
  0xd1   : > { %v4346_v21 = vadd.f32 %v3855_v20, %v4343_v19 }
  0xd2   : > { %v443_v22 = vpop.f32.mrf.mxu0 }
  0xd3   : > { %v572_v23 = vsub.f32 0.0, %v4346_v21  ;;  %v4350_v24 = vadd.f32 %v4343_v19, %v443_v22 }
  0xd4   : > { %v3856_v25 = vpop.f32.mrf.mxu0 }
  0xd5   : > { %v606_v26 = vmul.f32 1.442695, %v572_v23  ;;  %v570_v27 = vsub.f32 0.0, %v4350_v24  ;;  %v4354_v28 = vadd.f32 %v3856_v25, %v4343_v19 }
  0xd6   : > { %v446_v29 = vpop.f32.mrf.mxu0 }
  0xd7   : > { %3949 = vpow2.f32 %v606_v26  ;;  %v602_v30 = vmul.f32 1.442695, %v570_v27  ;;  %v573_v31 = vsub.f32 0.0, %v4354_v28  ;;  %v4358_v32 = vadd.f32 %v4343_v19, %v446_v29 }
  0xd8   : > { %v3859_v33 = vpop.f32.mrf.mxu0 }
  0xd9   : > { %3951 = vpow2.f32 %v602_v30  ;;  %v608_v34 = vmul.f32 1.442695, %v573_v31  ;;  %v571_v35 = vsub.f32 0.0, %v4358_v32  ;;  %v4362_v36 = vadd.f32 %v3859_v33, %v4343_v19 }
  0xda   : > { %v459_v37 = vpop.f32.mrf.mxu0 }
  0xdb   : > { %3953 = vpow2.f32 %v608_v34  ;;  %v604_v38 = vmul.f32 1.442695, %v571_v35  ;;  %v576_v39 = vsub.f32 0.0, %v4362_v36  ;;  %v4366_v40 = vadd.f32 %v4343_v19, %v459_v37 }
  0xdc   : > { %v3860_v41 = vpop.f32.mrf.mxu0 }
  0xdd   : > { %3955 = vpow2.f32 %v604_v38  ;;  %v614_v42 = vmul.f32 1.442695, %v576_v39  ;;  %v574_v43 = vsub.f32 0.0, %v4366_v40  ;;  %v4370_v44 = vadd.f32 %v3860_v41, %v4343_v19 }
  0xde   : > { %v462_v45 = vpop.f32.mrf.mxu0 }
  0xdf   : > { %3957 = vpow2.f32 %v614_v42  ;;  %v610_v46 = vmul.f32 1.442695, %v574_v43  ;;  %v577_v47 = vsub.f32 0.0, %v4370_v44  ;;  %v4374_v48 = vadd.f32 %v4343_v19, %v462_v45 }
  0xe0   : > { %v3863_v49 = vpop.f32.mrf.mxu0 }
  0xe1   : > { %3959 = vpow2.f32 %v610_v46  ;;  %v616_v50 = vmul.f32 1.442695, %v577_v47  ;;  %v575_v51 = vsub.f32 0.0, %v4374_v48  ;;  %v4378_v52 = vadd.f32 %v3863_v49, %v4343_v19 }
  0xe2   : > { %v475_v53 = vpop.f32.mrf.mxu0 }
  0xe3   : > { %3961 = vpow2.f32 %v616_v50  ;;  %v612_v54 = vmul.f32 1.442695, %v575_v51  ;;  %v580_v55 = vsub.f32 0.0, %v4378_v52  ;;  %v4382_v56 = vadd.f32 %v4343_v19, %v475_v53 }
  0xe4   : > { %v3950_v57 = vpop.eup %3949  ;;  %v3864_v58 = vpop.f32.mrf.mxu0 }
  0xe5   : > { %v668_v59 = vadd.f32 1.0, %v3950_v57  ;;  %3963 = vpow2.f32 %v612_v54  ;;  %v622_v60 = vmul.f32 1.442695, %v580_v55  ;;  %v578_v61 = vsub.f32 0.0, %v4382_v56 }
  0xe6   : > { %v3952_v62 = vpop.eup %3951  ;;  %v4386_v63 = vadd.f32 %v3864_v58, %v4343_v19  ;;  %v478_v0 = vpop.f32.mrf.mxu0 }
  0xe7   : > { %3965 = vrcp.f32 %v668_v59  ;;  %v666_v1 = vadd.f32 1.0, %v3952_v62  ;;  %v618_v2 = vmul.f32 1.442695, %v578_v61  ;;  %v4389_v3 = vadd.f32 %v4343_v19, %v478_v0 }
  0xe8   : > { %v3954_v4 = vpop.eup %3953  ;;  %3967 = vpow2.f32 %v622_v60  ;;  %v581_v5 = vsub.f32 0.0, %v4386_v63  ;;  %v3867_v6 = vpop.f32.mrf.mxu0 }
  0xe9   : > { %3969 = vrcp.f32 %v666_v1  ;;  %v669_v7 = vadd.f32 1.0, %v3954_v4  ;;  %v579_v8 = vsub.f32 0.0, %v4389_v3  ;;  %v4394_v9 = vadd.f32 %v3867_v6, %v4343_v19 }
  0xea   : > { %v3956_v10 = vpop.eup %3955  ;;  %3971 = vpow2.f32 %v618_v2  ;;  %v624_v11 = vmul.f32 1.442695, %v581_v5  ;;  %v491_v12 = vpop.f32.mrf.mxu0 }
  0xeb   : > { %3973 = vrcp.f32 %v669_v7  ;;  %v667_v13 = vadd.f32 1.0, %v3956_v10  ;;  %v620_v14 = vmul.f32 1.442695, %v579_v8  ;;  %v584_v15 = vsub.f32 0.0, %v4394_v9 }
  0xec   : > { %v3958_v16 = vpop.eup %3957  ;;  %3975 = vpow2.f32 %v624_v11  ;;  %v4398_v17 = vadd.f32 %v4343_v19, %v491_v12  ;;  %v3868_v18 = vpop.f32.mrf.mxu0  ;;  %v1115_v11 = vld [vmem:[#allocation3] sm:$0xff]  ;;  %v4432_v12 = vld [vmem:[#allocation3 + $0x10] sm:$0xff] }
  0xed   : > { %3977 = vrcp.f32 %v667_v13  ;;  %v672_v20 = vadd.f32 1.0, %v3958_v16  ;;  %v630_v22 = vmul.f32 1.442695, %v584_v15  ;;  %v4401_v23 = vadd.f32 %v3868_v18, %v4343_v19 }
  0xee   : > { %v3960_v25 = vpop.eup %3959  ;;  %3979 = vpow2.f32 %v620_v14  ;;  %v582_v26 = vsub.f32 0.0, %v4398_v17  ;;  %v494_v27 = vpop.f32.mrf.mxu0 }
  0xef   : > { %3981 = vrcp.f32 %v672_v20  ;;  %v670_v29 = vadd.f32 1.0, %v3960_v25  ;;  %v585_v30 = vsub.f32 0.0, %v4401_v23  ;;  %v4406_v31 = vadd.f32 %v4343_v19, %v494_v27  ;;  %v1116_v25 = vld [vmem:[#allocation3 + $0x8] sm:$0xff] }
  0xf0   : > { %v3962_v33 = vpop.eup %3961  ;;  %3983 = vpow2.f32 %v630_v22  ;;  %v626_v34 = vmul.f32 1.442695, %v582_v26  ;;  %v3871_v35 = vpop.f32.mrf.mxu0  ;;  %v4443_v26 = vld [vmem:[#allocation3 + $0x18] sm:$0xff] }
  0xf1   : > { %3985 = vrcp.f32 %v670_v29  ;;  %v673_v37 = vadd.f32 1.0, %v3962_v33  ;;  %v632_v38 = vmul.f32 1.442695, %v585_v30  ;;  %v583_v39 = vsub.f32 0.0, %v4406_v31 }
  0xf2   : > { %v3964_v41 = vpop.eup %3963  ;;  %3987 = vpow2.f32 %v626_v34  ;;  %v4410_v42 = vadd.f32 %v3871_v35, %v4343_v19  ;;  %v507_v43 = vpop.f32.mrf.mxu0  ;;  %v4447_v34 = vmax.f32 %v1115_v11, %v4432_v12 }
  0xf3   : > { %3989 = vrcp.f32 %v673_v37  ;;  %v671_v45 = vadd.f32 1.0, %v3964_v41  ;;  %v628_v46 = vmul.f32 1.442695, %v583_v39  ;;  %v4413_v47 = vadd.f32 %v4343_v19, %v507_v43 }
  0xf4   : > { %v3966_v49 = vpop.eup %3965  ;;  %3991 = vpow2.f32 %v632_v38  ;;  %v588_v50 = vsub.f32 0.0, %v4410_v42  ;;  %v3872_v51 = vpop.f32.mrf.mxu0 }
  0xf5   : > { %v3968_v53 = vpop.eup %3967  ;;  %v732_v54 = vmul.f32 %v3966_v49, %v4346_v21  ;;  %3993 = vrcp.f32 %v671_v45  ;;  %v586_v55 = vsub.f32 0.0, %v4413_v47  ;;  %v4419_v57 = vadd.f32 %v3872_v51, %v4343_v19 }
  0xf6   : > { %v3970_v58 = vpop.eup %3969  ;;  %v676_v59 = vadd.f32 1.0, %v3968_v53  ;;  %3995 = vpow2.f32 %v628_v46  ;;  %v638_v60 = vmul.f32 1.442695, %v588_v50  ;;  %v510_v61 = vpop.f32.mrf.mxu0  ;;  %v4457_v50 = vmax.f32 %v1116_v25, %v4443_v26 }
  0xf7   : > { %v3972_v62 = vpop.eup %3971  ;;  %764 = vst.msk [vmem:[#allocation2 + $0x28] sm:$0xff] %vm226_vm1, %v732_v54  ;;  %2688 = vst.msk [vmem:[#allocation4 + $0x10] sm:$0xff] %vm226_vm1, %v732_v54  ;;  %v730_v0 = vmul.f32 %v3970_v58, %v4350_v24  ;;  %v634_v1 = vmul.f32 1.442695, %v586_v55  ;;  %v589_v21 = vsub.f32 0.0, %v4419_v57  ;;  %v4426_v2 = vadd.f32 %v4343_v19, %v510_v61 }
  0xf8   : > { %v3974_v4 = vpop.eup %3973  ;;  %3997 = vrcp.f32 %v676_v59  ;;  %v674_v5 = vadd.f32 1.0, %v3972_v62  ;;  %v3875_v6 = vpop.f32.mrf.mxu0 }
  0xf9   : > { %v3976_v7 = vpop.eup %3975  ;;  %762 = vst.msk [vmem:[#allocation2 + $0x8] sm:$0xff] %vm226_vm1, %v730_v0  ;;  %2686 = vst.msk [vmem:[#allocation4] sm:$0xff] %vm226_vm1, %v730_v0  ;;  %v733_v8 = vmul.f32 %v3974_v4, %v4354_v28  ;;  %3999 = vpow2.f32 %v638_v60  ;;  %v640_v10 = vmul.f32 1.442695, %v589_v21  ;;  %v587_v24 = vsub.f32 0.0, %v4426_v2 }
  0xfa   : > { %v3978_v13 = vpop.eup %3977  ;;  %4001 = vrcp.f32 %v674_v5  ;;  %v677_v14 = vadd.f32 1.0, %v3976_v7  ;;  %v4435_v15 = vadd.f32 %v3875_v6, %v4343_v19  ;;  %v523_v16 = vpop.f32.mrf.mxu0 }
  0xfb   : > { %v3980_v18 = vpop.eup %3979  ;;  %765 = vst.msk [vmem:[#allocation2 + $0x30] sm:$0xff] %vm226_vm1, %v733_v8  ;;  %2689 = vst.msk [vmem:[#allocation4 + $0x18] sm:$0xff] %vm226_vm1, %v733_v8  ;;  %v731_v28 = vmul.f32 %v3978_v13, %v4358_v32  ;;  %4003 = vpow2.f32 %v634_v1  ;;  %v636_v20 = vmul.f32 1.442695, %v587_v24  ;;  %v4441_v22 = vadd.f32 %v4343_v19, %v523_v16 }
  0xfc   : > { %v3982_v27 = vpop.eup %3981  ;;  %4005 = vrcp.f32 %v677_v14  ;;  %v675_v29 = vadd.f32 1.0, %v3980_v18  ;;  %v592_v30 = vsub.f32 0.0, %v4435_v15  ;;  %v3876_v33 = vpop.f32.mrf.mxu0 }
  0xfd   : > { %v3984_v35 = vpop.eup %3983  ;;  %763 = vst.msk [vmem:[#allocation2 + $0x10] sm:$0xff] %vm226_vm1, %v731_v28  ;;  %2687 = vst.msk [vmem:[#allocation4 + $0x8] sm:$0xff] %vm226_vm1, %v731_v28  ;;  %v736_v32 = vmul.f32 %v3982_v27, %v4362_v36  ;;  %4007 = vpow2.f32 %v640_v10  ;;  %v590_v37 = vsub.f32 0.0, %v4441_v22  ;;  %v4454_v38 = vadd.f32 %v3876_v33, %v4343_v19 }
  0xfe   : > { %v3986_v39 = vpop.eup %3985  ;;  %v796_v41 = vld [vmem:[#allocation2 + $0x26] sm:$0xff]  ;;  %4009 = vrcp.f32 %v675_v29  ;;  %v680_v45 = vadd.f32 1.0, %v3984_v35  ;;  %v646_v46 = vmul.f32 1.442695, %v592_v30  ;;  %v526_v49 = vpop.f32.mrf.mxu0 }
  0xff   : > { %v828_v43 = vld [vmem:[#allocation2 + $0x27] sm:$0xff]  ;;  %v3988_v51 = vpop.eup %3987  ;;  %768 = vst.msk [vmem:[#allocation2 + $0x68] sm:$0xff] %vm226_vm1, %v736_v32  ;;  %2692 = vst.msk [vmem:[#allocation4 + $0x30] sm:$0xff] %vm226_vm1, %v736_v32  ;;  %v734_v36 = vmul.f32 %v3986_v39, %v4366_v40  ;;  %4011 = vpow2.f32 %v636_v20  ;;  %v642_v54 = vmul.f32 1.442695, %v590_v37  ;;  %v593_v62 = vsub.f32 0.0, %v4454_v38 }
 0x100   : > { %v860_v53 = vmax.f32 %v796_v41, %v828_v43  ;;  %v3990_v55 = vpop.eup %3989  ;;  %v892_v58 = vld [vmem:[#allocation2 + $0x28] sm:$0xff]  ;;  %4013 = vrcp.f32 %v680_v45  ;;  %v678_v61 = vadd.f32 1.0, %v3988_v51  ;;  %v4464_v0 = vadd.f32 %v4343_v19, %v526_v49  ;;  %v3879_v1 = vpop.f32.mrf.mxu0 }
 0x101   : > { %v794_v59 = vld [vmem:[#allocation2 + $0x6] sm:$0xff]  ;;  %v3992_v21 = vpop.eup %3991  ;;  %766 = vst.msk [vmem:[#allocation2 + $0x48] sm:$0xff] %vm226_vm1, %v734_v36  ;;  %2690 = vst.msk [vmem:[#allocation4 + $0x20] sm:$0xff] %vm226_vm1, %v734_v36  ;;  %v737_v40 = vmul.f32 %v3990_v55, %v4370_v44  ;;  %4015 = vpow2.f32 %v646_v46  ;;  %v648_v11 = vmul.f32 1.442695, %v593_v62  ;;  %v4472_v13 = vadd.f32 %v3879_v1, %v4343_v19 }
 0x102   : > { %v826_v60 = vld [vmem:[#allocation2 + $0x7] sm:$0xff]  ;;  %v4466_v4 = vmax.f32 %v860_v53, %v892_v58  ;;  %v3994_v6 = vpop.eup %3993  ;;  %v829_v10 = vld [vmem:[#allocation2 + $0x2f] sm:$0xff]  ;;  %4017 = vrcp.f32 %v678_v61  ;;  %v681_v24 = vadd.f32 1.0, %v3992_v21  ;;  %v539_v14 = vpop.f32.mrf.mxu0  ;;  %v591_v30 = vsub.f32 0.0, %v4464_v0 }
 0x103   : > { %v858_v5 = vmax.f32 %v794_v59, %v826_v60  ;;  %v890_v7 = vld [vmem:[#allocation2 + $0x8] sm:$0xff]  ;;  %v3996_v16 = vpop.eup %3995  ;;  %769 = vst.msk [vmem:[#allocation2 + $0x70] sm:$0xff] %vm226_vm1, %v737_v40  ;;  %2693 = vst.msk [vmem:[#allocation4 + $0x38] sm:$0xff] %vm226_vm1, %v737_v40  ;;  %v735_v44 = vmul.f32 %v3994_v6, %v4374_v48  ;;  %4019 = vpow2.f32 %v642_v54  ;;  %v893_v20 = vld [vmem:[#allocation2 + $0x30] sm:$0xff]  ;;  %v596_v33 = vsub.f32 0.0, %v4472_v13 }
 0x104   : > { %v797_v8 = vld [vmem:[#allocation2 + $0x2e] sm:$0xff]  ;;  %4021 = vrcp.f32 %v681_v24  ;;  %v679_v29 = vadd.f32 1.0, %v3996_v16  ;;  %v3880_v35 = vpop.f32.mrf.mxu0  ;;  %v4484_v48 = vadd.f32 %v4343_v19, %v539_v14  ;;  %v644_v51 = vmul.f32 1.442695, %v591_v30 }
 0x105   : > { %v4474_v18 = vmax.f32 %v858_v5, %v890_v7  ;;  %v861_v28 = vmax.f32 %v797_v8, %v829_v10  ;;  %v795_v25 = vld [vmem:[#allocation2 + $0xe] sm:$0xff]  ;;  %v3998_v32 = vpop.eup %3997  ;;  %767 = vst.msk [vmem:[#allocation2 + $0x50] sm:$0xff] %vm226_vm1, %v735_v44  ;;  %2691 = vst.msk [vmem:[#allocation4 + $0x28] sm:$0xff] %vm226_vm1, %v735_v44  ;;  %4023 = vpow2.f32 %v648_v11  ;;  %v4488_v53 = vadd.f32 %v3880_v35, %v4343_v19 }
 0x106   : > { %v827_v27 = vld [vmem:[#allocation2 + $0xf] sm:$0xff]  ;;  %v4000_v41 = vpop.eup %3999  ;;  %v800_v46 = vld [vmem:[#allocation2 + $0x66] sm:$0xff]  ;;  %v740_v49 = vmul.f32 %v3998_v32, %v4378_v52  ;;  %4025 = vrcp.f32 %v679_v29  ;;  %v4490_v36 = vpop.f32.mrf.mxu0  ;;  %v654_v62 = vmul.f32 1.442695, %v596_v33  ;;  %v594_v7 = vsub.f32 0.0, %v4484_v48 }
 0x107   : > { %v925_v37 = vmax.f32 %v861_v28, %v893_v20  ;;  %v859_v39 = vmax.f32 %v795_v25, %v827_v27  ;;  %v957_v43 = vld [vmem:[#allocation2 + $0x31] sm:$0xff]  ;;  %v4002_v54 = vpop.eup %4001  ;;  %v832_v60 = vld [vmem:[#allocation2 + $0x67] sm:$0xff]  ;;  %v684_v61 = vadd.f32 1.0, %v4000_v41  ;;  %4027 = vpow2.f32 %v644_v51 }
 0x108   : > { %v891_v45 = vld [vmem:[#allocation2 + $0x10] sm:$0xff]  ;;  %v4004_v1 = vpop.eup %4003  ;;  %v864_v5 = vmax.f32 %v800_v46, %v832_v60  ;;  %v798_v40 = vld [vmem:[#allocation2 + $0x46] sm:$0xff]  ;;  %772 = vst.msk [vmem:[#allocation2 + $0xa8] sm:$0xff] %vm226_vm1, %v740_v49  ;;  %2696 = vst.msk [vmem:[#allocation4 + $0x50] sm:$0xff] %vm226_vm1, %v740_v49  ;;  %v738_v52 = vmul.f32 %v4002_v54, %v4382_v56  ;;  %v4496_v8 = vpop.f32.mrf.mxu0  ;;  %v650_v51 = vmul.f32 1.442695, %v594_v7 }
 0x109   : > { %v989_v55 = vmax.f32 %v925_v37, %v957_v43  ;;  %v1021_v58 = vld [vmem:[#allocation2 + $0x32] sm:$0xff]  ;;  %v923_v59 = vmax.f32 %v859_v39, %v891_v45  ;;  %v830_v6 = vld [vmem:[#allocation2 + $0x47] sm:$0xff]  ;;  %v4006_v10 = vpop.eup %4005  ;;  %4029 = vrcp.f32 %v684_v61  ;;  %v682_v30 = vadd.f32 1.0, %v4004_v1 }
 0x10a   : > { %v955_v21 = vld [vmem:[#allocation2 + $0x11] sm:$0xff]  ;;  %v896_v16 = vld [vmem:[#allocation2 + $0x68] sm:$0xff]  ;;  %v862_v28 = vmax.f32 %v798_v40, %v830_v6  ;;  %v4008_v44 = vpop.eup %4007  ;;  %770 = vst.msk [vmem:[#allocation2 + $0x88] sm:$0xff] %vm226_vm1, %v738_v52  ;;  %2694 = vst.msk [vmem:[#allocation4 + $0x40] sm:$0xff] %vm226_vm1, %v738_v52  ;;  %v741_v56 = vmul.f32 %v4006_v10, %v4386_v63  ;;  %4031 = vpow2.f32 %v654_v62  ;;  %v4506_v41 = vpop.f32.mrf.mxu0  ;;  %v597_v54 = vsub.f32 0.0, %v4488_v53 }
 0x10b   : > { %v1053_v24 = vmax.f32 %v989_v55, %v1021_v58  ;;  %v987_v11 = vmax.f32 %v923_v59, %v955_v21  ;;  %v1019_v14 = vld [vmem:[#allocation2 + $0x12] sm:$0xff]  ;;  %v4498_v20 = vmax.f32 %v864_v5, %v896_v16  ;;  %v894_v25 = vld [vmem:[#allocation2 + $0x48] sm:$0xff]  ;;  %v4010_v33 = vpop.eup %4009  ;;  %v685_v39 = vadd.f32 1.0, %v4008_v44 }
 0x10c   : > { %v801_v27 = vld [vmem:[#allocation2 + $0x6e] sm:$0xff]  ;;  %v4504_v32 = vmax.f32 %v862_v28, %v894_v25  ;;  %v4012_v43 = vpop.eup %4011  ;;  %773 = vst.msk [vmem:[#allocation2 + $0xb0] sm:$0xff] %vm226_vm1, %v741_v56  ;;  %2697 = vst.msk [vmem:[#allocation4 + $0x58] sm:$0xff] %vm226_vm1, %v741_v56  ;;  %v739_v63 = vmul.f32 %v4010_v33, %v4389_v3  ;;  %4033 = vrcp.f32 %v682_v30  ;;  %v656_v21 = vmul.f32 1.442695, %v597_v54 }
 0x10d   : > { %v833_v29 = vld [vmem:[#allocation2 + $0x6f] sm:$0xff]  ;;  %1086 = vst.msk [vmem:[#allocation3 + $0x38] sm:$0xff] %vm226_vm1, %v1053_v24  ;;  %v1051_v35 = vmax.f32 %v987_v11, %v1019_v14  ;;  %v4014_v55 = vpop.eup %4013  ;;  %4035 = vrcp.f32 %v685_v39  ;;  %v683_v60 = vadd.f32 1.0, %v4012_v43  ;;  %v4518_v5 = vadd.f32 %v4343_v19, %v4490_v36  ;;  %v3884_v11 = vpop.f32.mrf.mxu0 }
 0x10e   : > { %v865_v37 = vmax.f32 %v801_v27, %v833_v29  ;;  %v897_v45 = vld [vmem:[#allocation2 + $0x70] sm:$0xff]  ;;  %v4016_v61 = vpop.eup %4015  ;;  %771 = vst.msk [vmem:[#allocation2 + $0x90] sm:$0xff] %vm226_vm1, %v739_v63  ;;  %2695 = vst.msk [vmem:[#allocation4 + $0x48] sm:$0xff] %vm226_vm1, %v739_v63  ;;  %v744_v3 = vmul.f32 %v4014_v55, %v4394_v9  ;;  %4037 = vpow2.f32 %v650_v51 }
 0x10f   : > { %v799_v46 = vld [vmem:[#allocation2 + $0x4e] sm:$0xff]  ;;  %1084 = vst.msk [vmem:[#allocation3 + $0x28] sm:$0xff] %vm226_vm1, %v1051_v35  ;;  %v4018_v40 = vpop.eup %4017  ;;  %v804_v7 = vld [vmem:[#allocation2 + $0xa6] sm:$0xff]  ;;  %4039 = vrcp.f32 %v683_v60  ;;  %v688_v24 = vadd.f32 1.0, %v4016_v61  ;;  %v595_v36 = vsub.f32 0.0, %v4518_v5  ;;  %v558_v60 = vpop.f32.mrf.mxu0 }
 0x110   : > { %v831_v49 = vld [vmem:[#allocation2 + $0x4f] sm:$0xff]  ;;  %v929_v58 = vmax.f32 %v865_v37, %v897_v45  ;;  %v836_v10 = vld [vmem:[#allocation2 + $0xa7] sm:$0xff]  ;;  %v4020_v14 = vpop.eup %4019  ;;  %776 = vst.msk [vmem:[#allocation2 + $0xe8] sm:$0xff] %vm226_vm1, %v744_v3  ;;  %2700 = vst.msk [vmem:[#allocation4 + $0x70] sm:$0xff] %vm226_vm1, %v744_v3  ;;  %v742_v9 = vmul.f32 %v4018_v40, %v4398_v17  ;;  %4041 = vpow2.f32 %v656_v21 }
 0x111   : > { %v863_v59 = vmax.f32 %v799_v46, %v831_v49  ;;  %v961_v62 = vld [vmem:[#allocation2 + $0x71] sm:$0xff]  ;;  %v868_v44 = vmax.f32 %v804_v7, %v836_v10  ;;  %v4022_v25 = vpop.eup %4021  ;;  %v900_v56 = vld [vmem:[#allocation2 + $0xa8] sm:$0xff]  ;;  %4043 = vrcp.f32 %v688_v24  ;;  %v686_v35 = vadd.f32 1.0, %v4020_v14 }
 0x112   : > { %v895_v1 = vld [vmem:[#allocation2 + $0x50] sm:$0xff]  ;;  %v993_v6 = vmax.f32 %v929_v58, %v961_v62  ;;  %v802_v30 = vld [vmem:[#allocation2 + $0x86] sm:$0xff]  ;;  %v4024_v37 = vpop.eup %4023  ;;  %774 = vst.msk [vmem:[#allocation2 + $0xc8] sm:$0xff] %vm226_vm1, %v742_v9  ;;  %2698 = vst.msk [vmem:[#allocation4 + $0x60] sm:$0xff] %vm226_vm1, %v742_v9  ;;  %v745_v17 = vmul.f32 %v4022_v25, %v4401_v23  ;;  %v652_v46 = vmul.f32 1.442695, %v595_v36  ;;  %v4548_v7 = vadd.f32 %v3884_v11, %v4343_v19 }
 0x113   : > { %v927_v52 = vmax.f32 %v863_v59, %v895_v1  ;;  %v1025_v16 = vld [vmem:[#allocation2 + $0x72] sm:$0xff]  ;;  %v834_v33 = vld [vmem:[#allocation2 + $0x87] sm:$0xff]  ;;  %v4524_v43 = vmax.f32 %v868_v44, %v900_v56  ;;  %v4026_v49 = vpop.eup %4025  ;;  %4045 = vrcp.f32 %v686_v35  ;;  %v689_v58 = vadd.f32 1.0, %v4024_v37 }
 0x114   : > { %v959_v28 = vld [vmem:[#allocation2 + $0x51] sm:$0xff]  ;;  %v1057_v27 = vmax.f32 %v993_v6, %v1025_v16  ;;  %v866_v45 = vmax.f32 %v802_v30, %v834_v33  ;;  %v898_v51 = vld [vmem:[#allocation2 + $0x88] sm:$0xff]  ;;  %v4532_v59 = vadd.f32 %v4496_v8, %v4343_v19  ;;  %777 = vst.msk [vmem:[#allocation2 + $0xf0] sm:$0xff] %vm226_vm1, %v745_v17  ;;  %2701 = vst.msk [vmem:[#allocation4 + $0x78] sm:$0xff] %vm226_vm1, %v745_v17  ;;  %4047 = vpow2.f32 %v652_v46  ;;  %v4028_v3 = vpop.eup %4027 }
 0x115   : > { %v991_v29 = vmax.f32 %v927_v52, %v959_v28  ;;  %v1023_v39 = vld [vmem:[#allocation2 + $0x52] sm:$0xff]  ;;  %v4534_v61 = vld [vmem:[#allocation2 + $0x9] sm:$0xff]  ;;  %v743_v1 = vmul.f32 %v4026_v49, %v4406_v31  ;;  %4049 = vrcp.f32 %v689_v58  ;;  %v4545_v52 = vadd.f32 %v4343_v19, %v4506_v41 }
 0x116   : > { %1090 = vst.msk [vmem:[#allocation3 + $0x58] sm:$0xff] %vm226_vm1, %v1057_v27  ;;  %v805_v54 = vld [vmem:[#allocation2 + $0xae] sm:$0xff]  ;;  %v4536_v62 = vmax.f32 %v866_v45, %v898_v51  ;;  %v600_v6 = vsub.f32 0.0, %v4532_v59  ;;  %v4030_v10 = vpop.eup %4029  ;;  %v687_v14 = vadd.f32 1.0, %v4028_v3  ;;  %v4553_v16 = vadd.f32 %v4343_v19, %v558_v60 }
 0x117   : > { %v1055_v63 = vmax.f32 %v991_v29, %v1023_v39  ;;  %v837_v55 = vld [vmem:[#allocation2 + $0xaf] sm:$0xff]  ;;  %775 = vst.msk [vmem:[#allocation2 + $0xd0] sm:$0xff] %vm226_vm1, %v743_v1  ;;  %2699 = vst.msk [vmem:[#allocation4 + $0x68] sm:$0xff] %vm226_vm1, %v743_v1  ;;  %v4032_v28 = vpop.eup %4031  ;;  %v808_v36 = vld [vmem:[#allocation2 + $0xe6] sm:$0xff]  ;;  %v748_v41 = vmul.f32 %v4030_v10, %v4410_v42  ;;  %v598_v11 = vsub.f32 0.0, %v4545_v52  ;;  %v986_v27 = vmax.f32 %v4474_v18, %v4534_v61 }
 0x118   : > { %v869_v23 = vmax.f32 %v805_v54, %v837_v55  ;;  %v901_v21 = vld [vmem:[#allocation2 + $0xb0] sm:$0xff]  ;;  %v662_v25 = vmul.f32 1.442695, %v600_v6  ;;  %v840_v33 = vld [vmem:[#allocation2 + $0xe7] sm:$0xff]  ;;  %4051 = vrcp.f32 %v687_v14  ;;  %v692_v35 = vadd.f32 1.0, %v4032_v28 }
 0x119   : > { %1088 = vst.msk [vmem:[#allocation3 + $0x48] sm:$0xff] %vm226_vm1, %v1055_v63  ;;  %v803_v40 = vld [vmem:[#allocation2 + $0x8e] sm:$0xff]  ;;  %v4034_v19 = vpop.eup %4033  ;;  %v872_v39 = vmax.f32 %v808_v36, %v840_v33  ;;  %v806_v45 = vld [vmem:[#allocation2 + $0xc6] sm:$0xff]  ;;  %780 = vst.msk [vmem:[#allocation2 + $0x128] sm:$0xff] %vm226_vm1, %v748_v41  ;;  %v658_v42 = vmul.f32 1.442695, %v598_v11 }
 0x11a   : > { %v835_v8 = vld [vmem:[#allocation2 + $0x8f] sm:$0xff]  ;;  %v933_v24 = vmax.f32 %v869_v23, %v901_v21  ;;  %v838_v17 = vld [vmem:[#allocation2 + $0xc7] sm:$0xff]  ;;  %2704 = vst.msk [vmem:[#allocation4 + $0x90] sm:$0xff] %vm226_vm1, %v748_v41  ;;  %4053 = vpow2.f32 %v662_v25  ;;  %v601_v46 = vsub.f32 0.0, %v4548_v7  ;;  %v4036_v49 = vpop.eup %4035  ;;  %v746_v23 = vmul.f32 %v4034_v19, %v4413_v47 }
 0x11b   : > { %v867_v31 = vmax.f32 %v803_v40, %v835_v8  ;;  %v965_v44 = vld [vmem:[#allocation2 + $0xb1] sm:$0xff]  ;;  %v4562_v63 = vld [vmem:[#allocation2 + $0x29] sm:$0xff]  ;;  %v870_v60 = vmax.f32 %v806_v45, %v838_v17  ;;  %v4038_v1 = vpop.eup %4037  ;;  %v749_v6 = vmul.f32 %v4036_v49, %v4419_v57  ;;  %4055 = vrcp.f32 %v692_v35 }
 0x11c   : > { %v899_v9 = vld [vmem:[#allocation2 + $0x90] sm:$0xff]  ;;  %v997_v29 = vmax.f32 %v933_v24, %v965_v44  ;;  %v904_v58 = vld [vmem:[#allocation2 + $0xe8] sm:$0xff]  ;;  %v664_v10 = vmul.f32 1.442695, %v601_v46  ;;  %v4040_v24 = vpop.eup %4039  ;;  %778 = vst.msk [vmem:[#allocation2 + $0x108] sm:$0xff] %vm226_vm1, %v746_v23  ;;  %2702 = vst.msk [vmem:[#allocation4 + $0x80] sm:$0xff] %vm226_vm1, %v746_v23  ;;  %4057 = vpow2.f32 %v658_v42 }
 0x11d   : > { %v1029_v56 = vld [vmem:[#allocation2 + $0xb2] sm:$0xff]  ;;  %v931_v30 = vmax.f32 %v867_v31, %v899_v9  ;;  %v4565_v3 = vmax.f32 %v872_v39, %v904_v58  ;;  %v902_v21 = vld [vmem:[#allocation2 + $0xc8] sm:$0xff]  ;;  %v690_v47 = vadd.f32 1.0, %v4038_v1  ;;  %v4042_v9 = vpop.eup %4041  ;;  %781 = vst.msk [vmem:[#allocation2 + $0x130] sm:$0xff] %vm226_vm1, %v749_v6  ;;  %2705 = vst.msk [vmem:[#allocation4 + $0x98] sm:$0xff] %vm226_vm1, %v749_v6  ;;  %v747_v57 = vmul.f32 %v4040_v24, %v4426_v2 }
 0x11e   : > { %v963_v37 = vld [vmem:[#allocation2 + $0x91] sm:$0xff]  ;;  %v1061_v51 = vmax.f32 %v997_v29, %v1029_v56  ;;  %v958_v31 = vld [vmem:[#allocation2 + $0x49] sm:$0xff]  ;;  %v4569_v28 = vmax.f32 %v870_v60, %v902_v21  ;;  %v599_v11 = vsub.f32 0.0, %v4553_v16  ;;  %v988_v29 = vmax.f32 %v4466_v4, %v4562_v63  ;;  %v4044_v56 = vpop.eup %4043 }
 0x11f   : > { %v995_v54 = vmax.f32 %v931_v30, %v963_v37  ;;  %v1027_v55 = vld [vmem:[#allocation2 + $0x92] sm:$0xff]  ;;  %v1020_v30 = vld [vmem:[#allocation2 + $0x2a] sm:$0xff]  ;;  %4059 = vrcp.f32 %v690_v47  ;;  %v693_v37 = vadd.f32 1.0, %v4042_v9  ;;  %779 = vst.msk [vmem:[#allocation2 + $0x110] sm:$0xff] %vm226_vm1, %v747_v57  ;;  %2703 = vst.msk [vmem:[#allocation4 + $0x88] sm:$0xff] %vm226_vm1, %v747_v57  ;;  %v752_v2 = vmul.f32 %v4044_v56, %v4435_v15 }
 0x120   : > { %v809_v40 = vld [vmem:[#allocation2 + $0xee] sm:$0xff]  ;;  %1094 = vst.msk [vmem:[#allocation3 + $0x78] sm:$0xff] %vm226_vm1, %v1061_v51  ;;  %4061 = vpow2.f32 %v664_v10  ;;  %v660_v4 = vmul.f32 1.442695, %v599_v11  ;;  %v990_v42 = vmax.f32 %v4504_v32, %v958_v31  ;;  %v4046_v46 = vpop.eup %4045  ;;  %v812_v51 = vld [vmem:[#allocation2 + $0x126] sm:$0xff] }
 0x121   : > { %v841_v8 = vld [vmem:[#allocation2 + $0xef] sm:$0xff]  ;;  %v1059_v14 = vmax.f32 %v995_v54, %v1027_v55  ;;  %v844_v54 = vld [vmem:[#allocation2 + $0x127] sm:$0xff]  ;;  %4063 = vrcp.f32 %v693_v37  ;;  %v4048_v60 = vpop.eup %4047  ;;  %784 = vst.msk [vmem:[#allocation2 + $0x168] sm:$0xff] %vm226_vm1, %v752_v2  ;;  %2708 = vst.msk [vmem:[#allocation4 + $0xb0] sm:$0xff] %vm226_vm1, %v752_v2  ;;  %v750_v32 = vmul.f32 %v4046_v46, %v4441_v22 }
 0x122   : > { %v873_v44 = vmax.f32 %v809_v40, %v841_v8  ;;  %v905_v36 = vld [vmem:[#allocation2 + $0xf0] sm:$0xff]  ;;  %v4589_v58 = vld [vmem:[#allocation3 + $0x28] sm:$0xff]  ;;  %v876_v21 = vmax.f32 %v812_v51, %v844_v54  ;;  %4065 = vpow2.f32 %v660_v4  ;;  %v1052_v40 = vmax.f32 %v988_v29, %v1020_v30  ;;  %v4050_v8 = vpop.eup %4049 }
 0x123   : > { %v807_v41 = vld [vmem:[#allocation2 + $0xce] sm:$0xff]  ;;  %1092 = vst.msk [vmem:[#allocation3 + $0x68] sm:$0xff] %vm226_vm1, %v1059_v14  ;;  %v691_v24 = vadd.f32 1.0, %v4048_v60  ;;  %v4595_v14 = vld [vmem:[#allocation3 + $0x38] sm:$0xff]  ;;  %v810_v9 = vld [vmem:[#allocation2 + $0x106] sm:$0xff]  ;;  %v753_v22 = vmul.f32 %v4050_v8, %v4454_v38  ;;  %v1183_v38 = vmax.f32 %v4443_v26, %v4589_v58 }
 0x124   : > { %v839_v25 = vld [vmem:[#allocation2 + $0xcf] sm:$0xff]  ;;  %v937_v35 = vmax.f32 %v873_v44, %v905_v36  ;;  %v842_v36 = vld [vmem:[#allocation2 + $0x107] sm:$0xff]  ;;  %782 = vst.msk [vmem:[#allocation2 + $0x148] sm:$0xff] %vm226_vm1, %v750_v32  ;;  %2706 = vst.msk [vmem:[#allocation4 + $0xa0] sm:$0xff] %vm226_vm1, %v750_v32 }
 0x125   : > { %v1018_v33 = vld [vmem:[#allocation2 + $0xa] sm:$0xff]  ;;  %v871_v19 = vmax.f32 %v807_v41, %v839_v25  ;;  %v1033_v1 = vld [vmem:[#allocation2 + $0xf2] sm:$0xff]  ;;  %1085 = vst.msk [vmem:[#allocation3 + $0x30] sm:$0xff] %vm226_vm1, %v1052_v40  ;;  %v1245_v25 = vmax.f32 %v4457_v50, %v4589_v58  ;;  %v874_v11 = vmax.f32 %v810_v9, %v842_v36  ;;  %4067 = vrcp.f32 %v691_v24  ;;  %785 = vst.msk [vmem:[#allocation2 + $0x170] sm:$0xff] %vm226_vm1, %v753_v22 }
 0x126   : > { %v4580_v39 = vld [vmem:[#allocation2 + $0x69] sm:$0xff]  ;;  %v969_v45 = vld [vmem:[#allocation2 + $0xf1] sm:$0xff]  ;;  %v1050_v55 = vmax.f32 %v986_v27, %v1018_v33  ;;  %v4052_v33 = vpop.eup %4051  ;;  %2709 = vst.msk [vmem:[#allocation4 + $0xb8] sm:$0xff] %vm226_vm1, %v753_v22 }
 0x127   : > { %v903_v17 = vld [vmem:[#allocation2 + $0xd0] sm:$0xff]  ;;  %v1001_v49 = vmax.f32 %v937_v35, %v969_v45  ;;  %v908_v27 = vld [vmem:[#allocation2 + $0x128] sm:$0xff]  ;;  %v992_v41 = vmax.f32 %v4498_v20, %v4580_v39  ;;  %v1310_v39 = vmax.f32 %v1245_v25, %v4595_v14  ;;  %v751_v46 = vmul.f32 %v4052_v33, %v4464_v0 }
 0x128   : > { %v935_v63 = vmax.f32 %v871_v19, %v903_v17  ;;  %v1022_v23 = vld [vmem:[#allocation2 + $0x4a] sm:$0xff]  ;;  %1083 = vst.msk [vmem:[#allocation3 + $0x20] sm:$0xff] %vm226_vm1, %v1050_v55  ;;  %v1031_v44 = vld [vmem:[#allocation2 + $0xd2] sm:$0xff]  ;;  %v4597_v47 = vmax.f32 %v876_v21, %v908_v27  ;;  %v4054_v17 = vpop.eup %4053 }
 0x129   : > { %v967_v15 = vld [vmem:[#allocation2 + $0xd1] sm:$0xff]  ;;  %v962_v10 = vld [vmem:[#allocation2 + $0x89] sm:$0xff]  ;;  %v1065_v18 = vmax.f32 %v1001_v49, %v1033_v1  ;;  %v1054_v31 = vmax.f32 %v990_v42, %v1022_v23  ;;  %v1247_v49 = vmax.f32 %v1183_v38, %v4595_v14  ;;  %783 = vst.msk [vmem:[#allocation2 + $0x150] sm:$0xff] %vm226_vm1, %v751_v46  ;;  %2707 = vst.msk [vmem:[#allocation4 + $0xa8] sm:$0xff] %vm226_vm1, %v751_v46 }
 0x12a   : > { %v1024_v6 = vld [vmem:[#allocation2 + $0x6a] sm:$0xff]  ;;  %v999_v61 = vmax.f32 %v935_v63, %v967_v15  ;;  %v994_v45 = vmax.f32 %v4536_v62, %v962_v10  ;;  %v1185_v63 = vmax.f32 %v4589_v58, %v4595_v14  ;;  %v696_v62 = vadd.f32 1.0, %v4054_v17  ;;  %v4630_v1 = vld [vmem:[#allocation3 + $0x58] sm:$0xff]  ;;  %v4056_v15 = vpop.eup %4055 }
 0x12b   : > { %1098 = vst.msk [vmem:[#allocation3 + $0x98] sm:$0xff] %vm226_vm1, %v1065_v18  ;;  %v813_v29 = vld [vmem:[#allocation2 + $0x12e] sm:$0xff]  ;;  %1087 = vst.msk [vmem:[#allocation3 + $0x40] sm:$0xff] %vm226_vm1, %v1054_v31  ;;  %v1056_v37 = vmax.f32 %v992_v41, %v1024_v6  ;;  %v816_v32 = vld [vmem:[#allocation2 + $0x166] sm:$0xff]  ;;  %v756_v24 = vmul.f32 %v4056_v15, %v4472_v13 }
 0x12c   : > { %v1063_v57 = vmax.f32 %v999_v61, %v1031_v44  ;;  %v845_v56 = vld [vmem:[#allocation2 + $0x12f] sm:$0xff]  ;;  %v848_v27 = vld [vmem:[#allocation2 + $0x167] sm:$0xff]  ;;  %4069 = vrcp.f32 %v696_v62  ;;  %v4058_v44 = vpop.eup %4057 }
 0x12d   : > { %v4609_v30 = vld [vmem:[#allocation3 + $0x48] sm:$0xff]  ;;  %v877_v19 = vmax.f32 %v813_v29, %v845_v56  ;;  %v909_v26 = vld [vmem:[#allocation2 + $0x130] sm:$0xff]  ;;  %1089 = vst.msk [vmem:[#allocation3 + $0x50] sm:$0xff] %vm226_vm1, %v1056_v37  ;;  %v880_v36 = vmax.f32 %v816_v32, %v848_v27  ;;  %v4060_v13 = vpop.eup %4059  ;;  %788 = vst.msk [vmem:[#allocation2 + $0x1a8] sm:$0xff] %vm226_vm1, %v756_v24 }
 0x12e   : > { %v4613_v35 = vld [vmem:[#allocation2 + $0xa9] sm:$0xff]  ;;  %1096 = vst.msk [vmem:[#allocation3 + $0x88] sm:$0xff] %vm226_vm1, %v1063_v57  ;;  %v973_v55 = vld [vmem:[#allocation2 + $0x131] sm:$0xff]  ;;  %v4628_v23 = vmax.f32 %v1310_v39, %v4609_v30  ;;  %v1312_v58 = vmax.f32 %v1247_v49, %v4609_v30  ;;  %v4636_v8 = vmax.f32 %v1185_v63, %v4609_v30  ;;  %2712 = vst.msk [vmem:[#allocation4 + $0xd0] sm:$0xff] %vm226_vm1, %v756_v24 }
 0x12f   : > { %v906_v20 = vld [vmem:[#allocation2 + $0x108] sm:$0xff]  ;;  %v941_v54 = vmax.f32 %v877_v19, %v909_v26  ;;  %v1037_v21 = vld [vmem:[#allocation2 + $0x132] sm:$0xff]  ;;  %v996_v6 = vmax.f32 %v4524_v43, %v4613_v35  ;;  %v4641_v31 = vld [vmem:[#allocation3 + $0x20] sm:$0xff] }
 0x130   : > { %v4620_v2 = vmax.f32 %v874_v11, %v906_v20  ;;  %v811_v4 = vld [vmem:[#allocation2 + $0x10e] sm:$0xff]  ;;  %1407 = vst.msk [vmem:[#allocation2 + $0x10] sm:$0xff] %vm226_vm1, %v4628_v23  ;;  %v814_v22 = vld [vmem:[#allocation2 + $0x146] sm:$0xff]  ;;  %v1244_v25 = vmax.f32 %v4447_v34, %v4641_v31  ;;  %v1182_v57 = vmax.f32 %v4432_v12, %v4641_v31  ;;  %v4650_v11 = vmax.f32 %v1312_v58, %v4630_v1  ;;  %v4062_v12 = vpop.eup %4061 }
 0x131   : > { %v843_v42 = vld [vmem:[#allocation2 + $0x10f] sm:$0xff]  ;;  %v1005_v10 = vmax.f32 %v941_v54, %v973_v55  ;;  %v846_v41 = vld [vmem:[#allocation2 + $0x147] sm:$0xff]  ;;  %v694_v20 = vadd.f32 1.0, %v4058_v44  ;;  %v4064_v49 = vpop.eup %4063  ;;  %v697_v15 = vadd.f32 1.0, %v4062_v12 }
 0x132   : > { %v1026_v51 = vld [vmem:[#allocation2 + $0x8a] sm:$0xff]  ;;  %v875_v60 = vmax.f32 %v811_v4, %v843_v42  ;;  %v1035_v9 = vld [vmem:[#allocation2 + $0x112] sm:$0xff]  ;;  %v878_v33 = vmax.f32 %v814_v22, %v846_v41  ;;  %v4657_v37 = vld [vmem:[#allocation3 + $0x40] sm:$0xff]  ;;  %v754_v4 = vmul.f32 %v4060_v13, %v4484_v48  ;;  %1409 = vst.msk [vmem:[#allocation2 + $0x30] sm:$0xff] %vm226_vm1, %v4650_v11  ;;  %v4066_v55 = vpop.eup %4065  ;;  %v757_v48 = vmul.f32 %v4064_v49, %v4488_v53 }
 0x133   : > { %v907_v0 = vld [vmem:[#allocation2 + $0x110] sm:$0xff]  ;;  %v1058_v40 = vmax.f32 %v994_v45, %v1026_v51  ;;  %v1069_v29 = vmax.f32 %v1005_v10, %v1037_v21  ;;  %v912_v38 = vld [vmem:[#allocation2 + $0x168] sm:$0xff]  ;;  %4071 = vrcp.f32 %v694_v20  ;;  %v1314_v53 = vmax.f32 %v4636_v8, %v4630_v1  ;;  %v4068_v8 = vpop.eup %4067 }
 0x134   : > { %v939_v18 = vmax.f32 %v875_v60, %v907_v0  ;;  %v971_v61 = vld [vmem:[#allocation2 + $0x111] sm:$0xff]  ;;  %v4659_v39 = vmax.f32 %v880_v36, %v912_v38  ;;  %v910_v45 = vld [vmem:[#allocation2 + $0x148] sm:$0xff]  ;;  %786 = vst.msk [vmem:[#allocation2 + $0x188] sm:$0xff] %vm226_vm1, %v754_v4  ;;  %2710 = vst.msk [vmem:[#allocation4 + $0xc0] sm:$0xff] %vm226_vm1, %v754_v4  ;;  %4073 = vrcp.f32 %v697_v15 }
 0x135   : > { %1091 = vst.msk [vmem:[#allocation3 + $0x60] sm:$0xff] %vm226_vm1, %v1058_v40  ;;  %v4655_v19 = vld [vmem:[#allocation3 + $0x30] sm:$0xff]  ;;  %1102 = vst.msk [vmem:[#allocation3 + $0xb8] sm:$0xff] %vm226_vm1, %v1069_v29  ;;  %v4667_v51 = vmax.f32 %v878_v33, %v910_v45  ;;  %v4674_v32 = vld [vmem:[#allocation3 + $0x68] sm:$0xff]  ;;  %v755_v33 = vmul.f32 %v4068_v8, %v4518_v5 }
 0x136   : > { %v1003_v56 = vmax.f32 %v939_v18, %v971_v61  ;;  %v817_v17 = vld [vmem:[#allocation2 + $0x16e] sm:$0xff]  ;;  %v1309_v42 = vmax.f32 %v1244_v25, %v4655_v19  ;;  %v1246_v46 = vmax.f32 %v1182_v57, %v4655_v19  ;;  %v695_v18 = vadd.f32 1.0, %v4066_v55  ;;  %789 = vst.msk [vmem:[#allocation2 + $0x1b0] sm:$0xff] %vm226_vm1, %v757_v48  ;;  %2713 = vst.msk [vmem:[#allocation4 + $0xd8] sm:$0xff] %vm226_vm1, %v757_v48 }
 0x137   : > { %v849_v26 = vld [vmem:[#allocation2 + $0x16f] sm:$0xff]  ;;  %v1184_v27 = vmax.f32 %v4641_v31, %v4655_v19  ;;  %v4693_v13 = vmax.f32 %v1314_v53, %v4674_v32  ;;  %v852_v38 = vld [vmem:[#allocation2 + $0x1a7] sm:$0xff]  ;;  %v1186_v35 = vmax.f32 %v4655_v19, %v4657_v37  ;;  %787 = vst.msk [vmem:[#allocation2 + $0x190] sm:$0xff] %vm226_vm1, %v755_v33  ;;  %2711 = vst.msk [vmem:[#allocation4 + $0xc8] sm:$0xff] %vm226_vm1, %v755_v33 }
 0x138   : > { %v1067_v63 = vmax.f32 %v1003_v56, %v1035_v9  ;;  %v881_v54 = vmax.f32 %v817_v17, %v849_v26  ;;  %v1028_v60 = vld [vmem:[#allocation2 + $0xaa] sm:$0xff]  ;;  %v1374_v21 = vmax.f32 %v1309_v42, %v4657_v37  ;;  %v1311_v0 = vmax.f32 %v1246_v46, %v4657_v37  ;;  %v1041_v41 = vld [vmem:[#allocation2 + $0x172] sm:$0xff] }
 0x139   : > { %v913_v62 = vld [vmem:[#allocation2 + $0x170] sm:$0xff]  ;;  %v1060_v31 = vmax.f32 %v996_v6, %v1028_v60  ;;  %4075 = vrcp.f32 %v695_v18  ;;  %v1248_v57 = vmax.f32 %v1184_v27, %v4657_v37  ;;  %v820_v56 = vld [vmem:[#allocation2 + $0x1a6] sm:$0xff]  ;;  %v1187_v6 = vmax.f32 %v4595_v14, %v4609_v30  ;;  %1411 = vst.msk [vmem:[#allocation2 + $0x50] sm:$0xff] %vm226_vm1, %v4693_v13  ;;  %v4070_v48 = vpop.eup %4069 }
 0x13a   : > { %1100 = vst.msk [vmem:[#allocation3 + $0xa8] sm:$0xff] %vm226_vm1, %v1067_v63  ;;  %v945_v58 = vmax.f32 %v881_v54, %v913_v62  ;;  %v815_v40 = vld [vmem:[#allocation2 + $0x14e] sm:$0xff]  ;;  %2750 = vrot.lane.b32.xlu0 %v1374_v21, %s4216_s28  ;;  %1406 = vst.msk [vmem:[#allocation2 + $0x8] sm:$0xff] %vm226_vm1, %v1374_v21  ;;  %v884_v45 = vmax.f32 %v820_v56, %v852_v38  ;;  %v1191_v38 = vmax.f32 %v4630_v1, %v4674_v32 }
 0x13b   : > { %v847_v10 = vld [vmem:[#allocation2 + $0x14f] sm:$0xff]  ;;  %1093 = vst.msk [vmem:[#allocation3 + $0x70] sm:$0xff] %vm226_vm1, %v1060_v31  ;;  %v1251_v19 = vmax.f32 %v1187_v6, %v4630_v1  ;;  %v818_v54 = vld [vmem:[#allocation2 + $0x186] sm:$0xff] }
 0x13c   : > { %v4677_v61 = vld [vmem:[#allocation3 + $0x50] sm:$0xff]  ;;  %v879_v9 = vmax.f32 %v815_v40, %v847_v10  ;;  %v4698_v43 = vld [vmem:[#allocation3 + $0x60] sm:$0xff]  ;;  %v916_v46 = vld [vmem:[#allocation2 + $0x1a8] sm:$0xff] }
 0x13d   : > { %v966_v24 = vld [vmem:[#allocation2 + $0xc9] sm:$0xff]  ;;  %v977_v44 = vld [vmem:[#allocation2 + $0x171] sm:$0xff]  ;;  %v1376_v36 = vmax.f32 %v1311_v0, %v4677_v61  ;;  %v1313_v17 = vmax.f32 %v1248_v57, %v4677_v61  ;;  %v4714_v14 = vmax.f32 %v1186_v35, %v4677_v61  ;;  %v1188_v49 = vmax.f32 %v4657_v37, %v4677_v61 }
 0x13e   : > { %v1009_v22 = vmax.f32 %v945_v58, %v977_v44  ;;  %v911_v25 = vld [vmem:[#allocation2 + $0x150] sm:$0xff]  ;;  %v998_v5 = vmax.f32 %v4569_v28, %v966_v24  ;;  %2752 = vrot.lane.b32.xlu0 %v4628_v23, %s4216_s28  ;;  %v4720_v63 = vmax.f32 %v884_v45, %v916_v46  ;;  %v850_v55 = vld [vmem:[#allocation2 + $0x187] sm:$0xff]  ;;  %v1189_v23 = vmax.f32 %v4609_v30, %v4630_v1  ;;  %v4732_v10 = vld [vmem:[#allocation3 + $0x78] sm:$0xff] }
 0x13f   : > { %v943_v29 = vmax.f32 %v879_v9, %v911_v25  ;;  %2754 = vrot.lane.b32.xlu1 %v1376_v36, %s4216_s28  ;;  %1408 = vst.msk [vmem:[#allocation2 + $0x28] sm:$0xff] %vm226_vm1, %v1376_v36  ;;  %v975_v12 = vld [vmem:[#allocation2 + $0x151] sm:$0xff]  ;;  %v968_v26 = vld [vmem:[#allocation2 + $0xe9] sm:$0xff]  ;;  %v1378_v60 = vmax.f32 %v1313_v17, %v4698_v43  ;;  %v882_v58 = vmax.f32 %v818_v54, %v850_v55 }
 0x140   : > { %v1073_v20 = vmax.f32 %v1009_v22, %v1041_v41  ;;  %v1030_v4 = vld [vmem:[#allocation2 + $0xca] sm:$0xff]  ;;  %v1039_v28 = vld [vmem:[#allocation2 + $0x152] sm:$0xff]  ;;  %v1315_v37 = vmax.f32 %v4714_v14, %v4698_v43  ;;  %v1316_v40 = vmax.f32 %v1251_v19, %v4674_v32  ;;  %v760_v30 = vmul.f32 %v4070_v48, %v4532_v59  ;;  %v4072_v35 = vpop.eup %4071 }
 0x141   : > { %v1007_v42 = vmax.f32 %v943_v29, %v975_v12  ;;  %v1062_v62 = vmax.f32 %v998_v5, %v1030_v4  ;;  %v4725_v15 = vld [vmem:[#allocation2 + $0x129] sm:$0xff]  ;;  %1410 = vst.msk [vmem:[#allocation2 + $0x48] sm:$0xff] %vm226_vm1, %v1378_v60  ;;  %v4738_v24 = vmax.f32 %v1188_v49, %v4698_v43  ;;  %v1000_v44 = vmax.f32 %v4565_v3, %v968_v26  ;;  %v981_v12 = vld [vmem:[#allocation2 + $0x1b1] sm:$0xff] }
 0x142   : > { %1106 = vst.msk [vmem:[#allocation3 + $0xd8] sm:$0xff] %vm226_vm1, %v1073_v20  ;;  %v970_v21 = vld [vmem:[#allocation2 + $0x109] sm:$0xff]  ;;  %2758 = vrot.lane.b32.xlu0 %v1378_v60, %s4216_s28  ;;  %v1381_v59 = vmax.f32 %v1316_v40, %v4732_v10  ;;  %v1190_v41 = vmax.f32 %v4677_v61, %v4698_v43  ;;  %792 = vst.msk [vmem:[#allocation2 + $0x1e8] sm:$0xff] %vm226_vm1, %v760_v30  ;;  %v1193_v5 = vmax.f32 %v4674_v32, %v4732_v10  ;;  %v4074_v60 = vpop.eup %4073 }
 0x143   : > { %v1071_v0 = vmax.f32 %v1007_v42, %v1039_v28  ;;  %2756 = vrot.lane.b32.xlu1 %v4650_v11, %s4216_s28  ;;  %v914_v18 = vld [vmem:[#allocation2 + $0x188] sm:$0xff]  ;;  %1095 = vst.msk [vmem:[#allocation3 + $0x80] sm:$0xff] %vm226_vm1, %v1062_v62  ;;  %v1253_v11 = vmax.f32 %v1189_v23, %v4674_v32  ;;  %v917_v25 = vld [vmem:[#allocation2 + $0x1b0] sm:$0xff]  ;;  %2716 = vst.msk [vmem:[#allocation4 + $0xf0] sm:$0xff] %vm226_vm1, %v760_v30  ;;  %v1002_v33 = vmax.f32 %v4620_v2, %v970_v21 }
 0x144   : > { %v821_v27 = vld [vmem:[#allocation2 + $0x1ae] sm:$0xff]  ;;  %v4743_v31 = vmax.f32 %v882_v58, %v914_v18  ;;  %v1438_v3 = vld [vmem:[#allocation2 + $0x6] sm:$0xff]  ;;  %1413 = vst.msk [vmem:[#allocation2 + $0x70] sm:$0xff] %vm226_vm1, %v1381_v59  ;;  %v1004_v1 = vmax.f32 %v4597_v47, %v4725_v15  ;;  %v758_v4 = vmul.f32 %v4072_v35, %v4545_v52 }
 0x145   : > { %v853_v53 = vld [vmem:[#allocation2 + $0x1af] sm:$0xff]  ;;  %1104 = vst.msk [vmem:[#allocation3 + $0xc8] sm:$0xff] %vm226_vm1, %v1071_v0  ;;  %v1470_v57 = vld [vmem:[#allocation2 + $0x7] sm:$0xff]  ;;  %v1318_v29 = vmax.f32 %v1253_v11, %v4732_v10 }
 0x146   : > { %v1032_v9 = vld [vmem:[#allocation2 + $0xea] sm:$0xff]  ;;  %v885_v8 = vmax.f32 %v821_v27, %v853_v53  ;;  %v1502_v45 = vmax.f32 %v1438_v3, %v1470_v57  ;;  %v1045_v32 = vld [vmem:[#allocation2 + $0x1b2] sm:$0xff]  ;;  %790 = vst.msk [vmem:[#allocation2 + $0x1c8] sm:$0xff] %vm226_vm1, %v758_v4  ;;  %2714 = vst.msk [vmem:[#allocation4 + $0xe0] sm:$0xff] %vm226_vm1, %v758_v4  ;;  %v4076_v40 = vpop.eup %4075  ;;  %v761_v53 = vmul.f32 %v4074_v60, %v4548_v7 }
 0x147   : > { %v1034_v36 = vld [vmem:[#allocation2 + $0x10a] sm:$0xff]  ;;  %v1064_v56 = vmax.f32 %v1000_v44, %v1032_v9  ;;  %2760 = vrot.lane.b32.xlu1 %v4693_v13, %s4216_s28  ;;  %v4772_v13 = vmax.f32 %v1191_v38, %v4732_v10  ;;  %v1043_v3 = vld [vmem:[#allocation2 + $0x192] sm:$0xff]  ;;  %v759_v57 = vmul.f32 %v4076_v40, %v4553_v16 }
 0x148   : > { %v4747_v22 = vld [vmem:[#allocation3 + $0x88] sm:$0xff]  ;;  %v949_v20 = vmax.f32 %v885_v8, %v917_v25  ;;  %v1066_v19 = vmax.f32 %v1002_v33, %v1034_v36  ;;  %v915_v52 = vld [vmem:[#allocation2 + $0x190] sm:$0xff]  ;;  %v4792_v8 = vld [vmem:[#allocation3 + $0x98] sm:$0xff]  ;;  %793 = vst.msk [vmem:[#allocation2 + $0x1f0] sm:$0xff] %vm226_vm1, %v761_v53 }
 0x149   : > { %v4757_v6 = vld [vmem:[#allocation2 + $0x149] sm:$0xff]  ;;  %v4768_v46 = vmax.f32 %v1318_v29, %v4747_v22  ;;  %1097 = vst.msk [vmem:[#allocation3 + $0x90] sm:$0xff] %vm226_vm1, %v1064_v56  ;;  %v4775_v47 = vmax.f32 %v1193_v5, %v4747_v22  ;;  %v1320_v15 = vmax.f32 %v4772_v13, %v4747_v22  ;;  %v1195_v0 = vmax.f32 %v4732_v10, %v4747_v22  ;;  %v979_v25 = vld [vmem:[#allocation2 + $0x191] sm:$0xff] }
 0x14a   : > { %v1534_v17 = vld [vmem:[#allocation2 + $0x8] sm:$0xff]  ;;  %v1013_v28 = vmax.f32 %v949_v20, %v981_v12  ;;  %1099 = vst.msk [vmem:[#allocation3 + $0xa0] sm:$0xff] %vm226_vm1, %v1066_v19  ;;  %v1006_v58 = vmax.f32 %v4667_v51, %v4757_v6  ;;  %v1535_v11 = vld [vmem:[#allocation2 + $0x10] sm:$0xff]  ;;  %2717 = vst.msk [vmem:[#allocation4 + $0xf8] sm:$0xff] %vm226_vm1, %v761_v53 }
 0x14b   : > { %v819_v26 = vld [vmem:[#allocation2 + $0x18e] sm:$0xff]  ;;  %v1566_v55 = vmax.f32 %v1502_v45, %v1534_v17  ;;  %1415 = vst.msk [vmem:[#allocation2 + $0x90] sm:$0xff] %vm226_vm1, %v4768_v46  ;;  %v1440_v9 = vld [vmem:[#allocation2 + $0x26] sm:$0xff]  ;;  %2764 = vrot.lane.b32.xlu1 %v1381_v59, %s4216_s28  ;;  %791 = vst.msk [vmem:[#allocation2 + $0x1d0] sm:$0xff] %vm226_vm1, %v759_v57  ;;  %v1385_v61 = vmax.f32 %v1320_v15, %v4792_v8 }
 0x14c   : > { %v851_v2 = vld [vmem:[#allocation2 + $0x18f] sm:$0xff]  ;;  %v1077_v18 = vmax.f32 %v1013_v28, %v1045_v32  ;;  %v1472_v36 = vld [vmem:[#allocation2 + $0x27] sm:$0xff]  ;;  %2715 = vst.msk [vmem:[#allocation4 + $0xe8] sm:$0xff] %vm226_vm1, %v759_v57 }
 0x14d   : > { %v1598_v42 = vld [vmem:[#allocation2 + $0x9] sm:$0xff]  ;;  %v883_v54 = vmax.f32 %v819_v26, %v851_v2  ;;  %v1504_v56 = vmax.f32 %v1440_v9, %v1472_v36  ;;  %v1599_v20 = vld [vmem:[#allocation2 + $0x11] sm:$0xff]  ;;  %v4815_v2 = vld [vmem:[#allocation3 + $0x80] sm:$0xff]  ;;  %1417 = vst.msk [vmem:[#allocation2 + $0xb0] sm:$0xff] %vm226_vm1, %v1385_v61 }
 0x14e   : > { %v1036_v49 = vld [vmem:[#allocation2 + $0x12a] sm:$0xff]  ;;  %v1630_v30 = vmax.f32 %v1566_v55, %v1598_v42  ;;  %1110 = vst.msk [vmem:[#allocation3 + $0xf8] sm:$0xff] %vm226_vm1, %v1077_v18  ;;  %v1663_v42 = vld [vmem:[#allocation2 + $0x12] sm:$0xff] }
 0x14f   : > { %v1662_v62 = vld [vmem:[#allocation2 + $0xa] sm:$0xff]  ;;  %v1068_v21 = vmax.f32 %v1004_v1, %v1036_v49  ;;  %v947_v27 = vmax.f32 %v883_v54, %v915_v52  ;;  %2768 = vrot.lane.b32.xlu1 %v4768_v46, %s4216_s28 }
 0x150   : > { %v1439_v23 = vld [vmem:[#allocation2 + $0xe] sm:$0xff]  ;;  %v824_v59 = vld [vmem:[#allocation2 + $0x1e6] sm:$0xff]  ;;  %v1694_v16 = vmax.f32 %v1630_v30, %v1662_v62 }
 0x151   : > { %v1471_v48 = vld [vmem:[#allocation2 + $0xf] sm:$0xff]  ;;  %1101 = vst.msk [vmem:[#allocation3 + $0xb0] sm:$0xff] %vm226_vm1, %v1068_v21  ;;  %v1011_v33 = vmax.f32 %v947_v27, %v979_v25  ;;  %v856_v35 = vld [vmem:[#allocation2 + $0x1e7] sm:$0xff]  ;;  %v1322_v27 = vmax.f32 %v4775_v47, %v4792_v8 }
 0x152   : > { %v4789_v44 = vld [vmem:[#allocation3 + $0x70] sm:$0xff]  ;;  %v1503_v29 = vmax.f32 %v1439_v23, %v1471_v48  ;;  %v1536_v38 = vld [vmem:[#allocation2 + $0x28] sm:$0xff]  ;;  %v888_v45 = vmax.f32 %v824_v59, %v856_v35  ;;  %1726 = vst.msk [vmem:[#allocation3 + $0x20] sm:$0xff] %vm226_vm1, %v1694_v16 }
 0x153   : > { %v1380_v7 = vmax.f32 %v1315_v37, %v4789_v44  ;;  %v1600_v12 = vld [vmem:[#allocation2 + $0x29] sm:$0xff]  ;;  %v1317_v14 = vmax.f32 %v4738_v24, %v4789_v44  ;;  %v4809_v37 = vmax.f32 %v1190_v41, %v4789_v44  ;;  %v1568_v5 = vmax.f32 %v1504_v56, %v1536_v38  ;;  %v1601_v36 = vld [vmem:[#allocation2 + $0x31] sm:$0xff]  ;;  %2772 = vrot.lane.b32.xlu1 %v1385_v61, %s4216_s28 }
 0x154   : > { %v1567_v17 = vmax.f32 %v1503_v29, %v1535_v11  ;;  %v1537_v1 = vld [vmem:[#allocation2 + $0x30] sm:$0xff]  ;;  %v1075_v41 = vmax.f32 %v1011_v33, %v1043_v3  ;;  %v920_v4 = vld [vmem:[#allocation2 + $0x1e8] sm:$0xff]  ;;  %v1192_v18 = vmax.f32 %v4698_v43, %v4789_v44  ;;  %v1194_v53 = vmax.f32 %v4789_v44, %v4815_v2 }
 0x155   : > { %1412 = vst.msk [vmem:[#allocation2 + $0x68] sm:$0xff] %vm226_vm1, %v1380_v7  ;;  %2762 = vrot.lane.b32.xlu0 %v1380_v7, %s4216_s28  ;;  %v1441_v26 = vld [vmem:[#allocation2 + $0x2e] sm:$0xff]  ;;  %v1382_v19 = vmax.f32 %v1317_v14, %v4815_v2  ;;  %v1442_v49 = vld [vmem:[#allocation2 + $0x46] sm:$0xff]  ;;  %v1319_v32 = vmax.f32 %v4809_v37, %v4815_v2  ;;  %v4824_v54 = vmax.f32 %v888_v45, %v920_v4 }
 0x156   : > { %v1473_v24 = vld [vmem:[#allocation2 + $0x2f] sm:$0xff]  ;;  %v1474_v28 = vld [vmem:[#allocation2 + $0x47] sm:$0xff]  ;;  %v1631_v55 = vmax.f32 %v1567_v17, %v1599_v20  ;;  %v1632_v60 = vmax.f32 %v1568_v5, %v1600_v12  ;;  %1108 = vst.msk [vmem:[#allocation3 + $0xe8] sm:$0xff] %vm226_vm1, %v1075_v41  ;;  %v4844_v47 = vmax.f32 %v1192_v18, %v4815_v2  ;;  %v1259_v33 = vmax.f32 %v1195_v0, %v4792_v8 }
 0x157   : > { %v1505_v13 = vmax.f32 %v1441_v26, %v1473_v24  ;;  %v1664_v52 = vld [vmem:[#allocation2 + $0x2a] sm:$0xff]  ;;  %v1506_v62 = vmax.f32 %v1442_v49, %v1474_v28  ;;  %1414 = vst.msk [vmem:[#allocation2 + $0x88] sm:$0xff] %vm226_vm1, %v1382_v19  ;;  %v1665_v20 = vld [vmem:[#allocation2 + $0x32] sm:$0xff] }
 0x158   : > { %v1538_v23 = vld [vmem:[#allocation2 + $0x48] sm:$0xff]  ;;  %v1695_v11 = vmax.f32 %v1631_v55, %v1663_v42  ;;  %v1696_v9 = vmax.f32 %v1632_v60, %v1664_v52  ;;  %v4840_v38 = vld [vmem:[#allocation3 + $0x90] sm:$0xff]  ;;  %v4872_v60 = vld [vmem:[#allocation3 + $0xb8] sm:$0xff] }
 0x159   : > { %v4827_v48 = vld [vmem:[#allocation3 + $0xa8] sm:$0xff]  ;;  %v1569_v40 = vmax.f32 %v1505_v13, %v1537_v1  ;;  %2766 = vrot.lane.b32.xlu0 %v1382_v19, %s4216_s28  ;;  %v1570_v25 = vmax.f32 %v1506_v62, %v1538_v23  ;;  %v1384_v37 = vmax.f32 %v1319_v32, %v4840_v38  ;;  %v1539_v10 = vld [vmem:[#allocation2 + $0x50] sm:$0xff]  ;;  %v1321_v0 = vmax.f32 %v4844_v47, %v4840_v38 }
 0x15a   : > { %v822_v15 = vld [vmem:[#allocation2 + $0x1c6] sm:$0xff]  ;;  %v1443_v3 = vld [vmem:[#allocation2 + $0x4e] sm:$0xff]  ;;  %v1387_v44 = vmax.f32 %v1322_v27, %v4827_v48  ;;  %1727 = vst.msk [vmem:[#allocation3 + $0x28] sm:$0xff] %vm226_vm1, %v1695_v11  ;;  %1728 = vst.msk [vmem:[#allocation3 + $0x30] sm:$0xff] %vm226_vm1, %v1696_v9  ;;  %v4862_v26 = vmax.f32 %v1194_v53, %v4840_v38  ;;  %v1324_v13 = vmax.f32 %v1259_v33, %v4827_v48 }
 0x15b   : > { %v854_v21 = vld [vmem:[#allocation2 + $0x1c7] sm:$0xff]  ;;  %v1633_v56 = vmax.f32 %v1569_v40, %v1601_v36  ;;  %v1475_v43 = vld [vmem:[#allocation2 + $0x4f] sm:$0xff]  ;;  %1416 = vst.msk [vmem:[#allocation2 + $0xa8] sm:$0xff] %vm226_vm1, %v1384_v37  ;;  %v1196_v52 = vmax.f32 %v4815_v2, %v4840_v38  ;;  %v1197_v62 = vmax.f32 %v4747_v22, %v4792_v8  ;;  %v1199_v40 = vmax.f32 %v4792_v8, %v4827_v48 }
 0x15c   : > { %v1602_v46 = vld [vmem:[#allocation2 + $0x49] sm:$0xff]  ;;  %v886_v30 = vmax.f32 %v822_v15, %v854_v21  ;;  %v1507_v14 = vmax.f32 %v1443_v3, %v1475_v43  ;;  %1419 = vst.msk [vmem:[#allocation2 + $0xd0] sm:$0xff] %vm226_vm1, %v1387_v44  ;;  %v1603_v55 = vld [vmem:[#allocation2 + $0x51] sm:$0xff]  ;;  %2776 = vrot.lane.b32.xlu1 %v1387_v44, %s4216_s28 }
 0x15d   : > { %v4838_v57 = vld [vmem:[#allocation2 + $0x169] sm:$0xff]  ;;  %v1634_v12 = vmax.f32 %v1570_v25, %v1602_v46  ;;  %v1697_v5 = vmax.f32 %v1633_v56, %v1665_v20  ;;  %2770 = vrot.lane.b32.xlu0 %v1384_v37, %s4216_s28  ;;  %v985_v23 = vld [vmem:[#allocation2 + $0x1f1] sm:$0xff] }
 0x15e   : > { %v1038_v29 = vld [vmem:[#allocation2 + $0x14a] sm:$0xff]  ;;  %v1571_v42 = vmax.f32 %v1507_v14, %v1539_v10  ;;  %v1008_v21 = vmax.f32 %v4659_v39, %v4838_v57  ;;  %v1049_v22 = vld [vmem:[#allocation2 + $0x1f2] sm:$0xff] }
 0x15f   : > { %v918_v7 = vld [vmem:[#allocation2 + $0x1c8] sm:$0xff]  ;;  %v921_v24 = vld [vmem:[#allocation2 + $0x1f0] sm:$0xff]  ;;  %v1070_v19 = vmax.f32 %v1006_v58, %v1038_v29  ;;  %1729 = vst.msk [vmem:[#allocation3 + $0x38] sm:$0xff] %vm226_vm1, %v1697_v5  ;;  %v1389_v58 = vmax.f32 %v1324_v13, %v4872_v60 }
 0x160   : > { %v4851_v59 = vmax.f32 %v886_v30, %v918_v7  ;;  %v825_v35 = vld [vmem:[#allocation2 + $0x1ee] sm:$0xff]  ;;  %v1635_v51 = vmax.f32 %v1571_v42, %v1603_v55  ;;  %v1444_v6 = vld [vmem:[#allocation2 + $0x66] sm:$0xff]  ;;  %v4888_v30 = vmax.f32 %v1197_v62, %v4827_v48  ;;  %v4896_v7 = vmax.f32 %v1199_v40, %v4872_v60 }
 0x161   : > { %v857_v16 = vld [vmem:[#allocation2 + $0x1ef] sm:$0xff]  ;;  %1103 = vst.msk [vmem:[#allocation3 + $0xc0] sm:$0xff] %vm226_vm1, %v1070_v19  ;;  %v1476_v53 = vld [vmem:[#allocation2 + $0x67] sm:$0xff]  ;;  %1421 = vst.msk [vmem:[#allocation2 + $0xf0] sm:$0xff] %vm226_vm1, %v1389_v58  ;;  %2780 = vrot.lane.b32.xlu1 %v1389_v58, %s4216_s28 }
 0x162   : > { %v4856_v45 = vld [vmem:[#allocation2 + $0x189] sm:$0xff]  ;;  %v889_v17 = vmax.f32 %v825_v35, %v857_v16  ;;  %v1667_v27 = vld [vmem:[#allocation2 + $0x52] sm:$0xff]  ;;  %v1508_v25 = vmax.f32 %v1444_v6, %v1476_v53  ;;  %v4898_v35 = vld [vmem:[#allocation3 + $0xa0] sm:$0xff]  ;;  %v1326_v16 = vmax.f32 %v4888_v30, %v4872_v60 }
 0x163   : > { %v1666_v1 = vld [vmem:[#allocation2 + $0x4a] sm:$0xff]  ;;  %v1010_v11 = vmax.f32 %v4743_v31, %v4856_v45  ;;  %v1699_v39 = vmax.f32 %v1635_v51, %v1667_v27  ;;  %v1047_v20 = vld [vmem:[#allocation2 + $0x1d2] sm:$0xff]  ;;  %v1386_v14 = vmax.f32 %v1321_v0, %v4898_v35  ;;  %v4908_v5 = vmax.f32 %v1196_v52, %v4898_v35 }
 0x164   : > { %v823_v61 = vld [vmem:[#allocation2 + $0x1ce] sm:$0xff]  ;;  %v1698_v4 = vmax.f32 %v1634_v12, %v1666_v1  ;;  %v953_v28 = vmax.f32 %v889_v17, %v921_v24  ;;  %v1446_v37 = vld [vmem:[#allocation2 + $0x86] sm:$0xff]  ;;  %v1323_v17 = vmax.f32 %v4862_v26, %v4898_v35  ;;  %v1198_v0 = vmax.f32 %v4840_v38, %v4898_v35 }
 0x165   : > { %v855_v41 = vld [vmem:[#allocation2 + $0x1cf] sm:$0xff]  ;;  %1731 = vst.msk [vmem:[#allocation3 + $0x48] sm:$0xff] %vm226_vm1, %v1699_v39  ;;  %v1478_v45 = vld [vmem:[#allocation2 + $0x87] sm:$0xff]  ;;  %1418 = vst.msk [vmem:[#allocation2 + $0xc8] sm:$0xff] %vm226_vm1, %v1386_v14  ;;  %2774 = vrot.lane.b32.xlu0 %v1386_v14, %s4216_s28 }
 0x166   : > { %v1040_v49 = vld [vmem:[#allocation2 + $0x16a] sm:$0xff]  ;;  %v887_v32 = vmax.f32 %v823_v61, %v855_v41  ;;  %1730 = vst.msk [vmem:[#allocation3 + $0x40] sm:$0xff] %vm226_vm1, %v1698_v4  ;;  %v1017_v46 = vmax.f32 %v953_v28, %v985_v23  ;;  %v1510_v41 = vmax.f32 %v1446_v37, %v1478_v45  ;;  %v1669_v23 = vld [vmem:[#allocation2 + $0x72] sm:$0xff] }
 0x167   : > { %v919_v15 = vld [vmem:[#allocation2 + $0x1d0] sm:$0xff]  ;;  %v1072_v29 = vmax.f32 %v1008_v21, %v1040_v49  ;;  %v1540_v44 = vld [vmem:[#allocation2 + $0x68] sm:$0xff] }
 0x168   : > { %v4885_v2 = vld [vmem:[#allocation2 + $0x1a9] sm:$0xff]  ;;  %v951_v18 = vmax.f32 %v887_v32, %v919_v15  ;;  %v983_v36 = vld [vmem:[#allocation2 + $0x1d1] sm:$0xff]  ;;  %v1081_v43 = vmax.f32 %v1017_v46, %v1049_v22  ;;  %v1572_v12 = vmax.f32 %v1508_v25, %v1540_v44  ;;  %v1201_v32 = vmax.f32 %v4827_v48, %v4872_v60 }
 0x169   : > { %v4892_v9 = vld [vmem:[#allocation2 + $0x1c9] sm:$0xff]  ;;  %1105 = vst.msk [vmem:[#allocation3 + $0xd0] sm:$0xff] %vm226_vm1, %v1072_v29  ;;  %v1605_v61 = vld [vmem:[#allocation2 + $0x71] sm:$0xff]  ;;  %v1012_v55 = vmax.f32 %v4720_v63, %v4885_v2 }
 0x16a   : > { %v1445_v3 = vld [vmem:[#allocation2 + $0x6e] sm:$0xff]  ;;  %v1015_v47 = vmax.f32 %v951_v18, %v983_v36  ;;  %1114 = vst.msk [vmem:[#allocation3 + $0x118] sm:$0xff] %vm226_vm1, %v1081_v43  ;;  %v1448_v58 = vld [vmem:[#allocation2 + $0xa6] sm:$0xff]  ;;  %v1014_v21 = vmax.f32 %v4851_v59, %v4892_v9 }
 0x16b   : > { %v1477_v8 = vld [vmem:[#allocation2 + $0x6f] sm:$0xff]  ;;  %v1480_v63 = vld [vmem:[#allocation2 + $0xa7] sm:$0xff] }
 0x16c   : > { %v1541_v57 = vld [vmem:[#allocation2 + $0x70] sm:$0xff]  ;;  %v1509_v31 = vmax.f32 %v1445_v3, %v1477_v8  ;;  %v1079_v1 = vmax.f32 %v1015_v47, %v1047_v20  ;;  %v1542_v26 = vld [vmem:[#allocation2 + $0x88] sm:$0xff]  ;;  %v1512_v25 = vmax.f32 %v1448_v58, %v1480_v63 }
 0x16d   : > { %v1042_v56 = vld [vmem:[#allocation2 + $0x18a] sm:$0xff]  ;;  %v1574_v15 = vmax.f32 %v1510_v41, %v1542_v26  ;;  %v1671_v3 = vld [vmem:[#allocation2 + $0x92] sm:$0xff] }
 0x16e   : > { %v1604_v33 = vld [vmem:[#allocation2 + $0x69] sm:$0xff]  ;;  %v1573_v24 = vmax.f32 %v1509_v31, %v1541_v57  ;;  %v1074_v28 = vmax.f32 %v1010_v11, %v1042_v56  ;;  %1112 = vst.msk [vmem:[#allocation3 + $0x108] sm:$0xff] %vm226_vm1, %v1079_v1  ;;  %v1607_v39 = vld [vmem:[#allocation2 + $0x91] sm:$0xff] }
 0x16f   : > { %v1668_v10 = vld [vmem:[#allocation2 + $0x6a] sm:$0xff]  ;;  %v1636_v13 = vmax.f32 %v1572_v12, %v1604_v33  ;;  %v4940_v12 = vld [vmem:[#allocation3 + $0xc0] sm:$0xff] }
 0x170   : > { %v1447_v4 = vld [vmem:[#allocation2 + $0x8e] sm:$0xff]  ;;  %v1637_v38 = vmax.f32 %v1573_v24, %v1605_v61  ;;  %1107 = vst.msk [vmem:[#allocation3 + $0xe0] sm:$0xff] %vm226_vm1, %v1074_v28 }
 0x171   : > { %v4914_v42 = vld [vmem:[#allocation2 + $0x1e9] sm:$0xff]  ;;  %v1700_v40 = vmax.f32 %v1636_v13, %v1668_v10  ;;  %v4951_v10 = vld [vmem:[#allocation3 + $0x20] sm:$0xff] }
 0x172   : > { %v1606_v19 = vld [vmem:[#allocation2 + $0x89] sm:$0xff]  ;;  %v1701_v53 = vmax.f32 %v1637_v38, %v1669_v23  ;;  %v1016_v37 = vmax.f32 %v4824_v54, %v4914_v42  ;;  %v1886_v30 = vmax.f32 %v4447_v34, %v4951_v10  ;;  %v4970_v23 = vld [vmem:[#allocation3 + $0x40] sm:$0xff] }
 0x173   : > { %v1479_v49 = vld [vmem:[#allocation2 + $0x8f] sm:$0xff]  ;;  %v1638_v11 = vmax.f32 %v1574_v15, %v1606_v19  ;;  %1732 = vst.msk [vmem:[#allocation3 + $0x50] sm:$0xff] %vm226_vm1, %v1700_v40  ;;  %v1482_v13 = vld [vmem:[#allocation2 + $0xc7] sm:$0xff] }
 0x174   : > { %v1044_v52 = vld [vmem:[#allocation2 + $0x1aa] sm:$0xff]  ;;  %v1511_v51 = vmax.f32 %v1447_v4, %v1479_v49  ;;  %1733 = vst.msk [vmem:[#allocation3 + $0x58] sm:$0xff] %vm226_vm1, %v1701_v53  ;;  %v1673_v4 = vld [vmem:[#allocation2 + $0xb2] sm:$0xff] }
 0x175   : > { %v1046_v62 = vld [vmem:[#allocation2 + $0x1ca] sm:$0xff]  ;;  %v1076_v43 = vmax.f32 %v1012_v55, %v1044_v52 }
 0x176   : > { %v4923_v6 = vld [vmem:[#allocation3 + $0xb0] sm:$0xff]  ;;  %v1544_v8 = vld [vmem:[#allocation2 + $0xa8] sm:$0xff]  ;;  %v1078_v47 = vmax.f32 %v1014_v21, %v1046_v62 }
 0x177   : > { %v1670_v46 = vld [vmem:[#allocation2 + $0x8a] sm:$0xff]  ;;  %v1388_v18 = vmax.f32 %v1323_v17, %v4923_v6  ;;  %v1325_v2 = vmax.f32 %v4908_v5, %v4923_v6  ;;  %v4931_v27 = vmax.f32 %v1198_v0, %v4923_v6  ;;  %v1200_v56 = vmax.f32 %v4898_v35, %v4923_v6  ;;  %1109 = vst.msk [vmem:[#allocation3 + $0xf0] sm:$0xff] %vm226_vm1, %v1076_v43 }
 0x178   : > { %v1543_v22 = vld [vmem:[#allocation2 + $0x90] sm:$0xff]  ;;  %v1702_v44 = vmax.f32 %v1638_v11, %v1670_v46  ;;  %v1576_v31 = vmax.f32 %v1512_v25, %v1544_v8  ;;  %v4942_v14 = vld [vmem:[#allocation3 + $0xc8] sm:$0xff]  ;;  %1111 = vst.msk [vmem:[#allocation3 + $0x100] sm:$0xff] %vm226_vm1, %v1078_v47  ;;  %v1202_v58 = vmax.f32 %v4923_v6, %v4940_v12 }
 0x179   : > { %v1575_v36 = vmax.f32 %v1511_v51, %v1543_v22  ;;  %v1449_v59 = vld [vmem:[#allocation2 + $0xae] sm:$0xff]  ;;  %1420 = vst.msk [vmem:[#allocation2 + $0xe8] sm:$0xff] %vm226_vm1, %v1388_v18  ;;  %2778 = vrot.lane.b32.xlu0 %v1388_v18, %s4216_s28  ;;  %v1390_v35 = vmax.f32 %v1325_v2, %v4940_v12  ;;  %v1391_v1 = vmax.f32 %v1326_v16, %v4942_v14  ;;  %v1450_v0 = vld [vmem:[#allocation2 + $0xc6] sm:$0xff]  ;;  %v4986_v2 = vld [vmem:[#allocation3 + $0x38] sm:$0xff] }
 0x17a   : > { %v1481_v9 = vld [vmem:[#allocation2 + $0xaf] sm:$0xff]  ;;  %v1327_v24 = vmax.f32 %v4931_v27, %v4940_v12  ;;  %1734 = vst.msk [vmem:[#allocation3 + $0x60] sm:$0xff] %vm226_vm1, %v1702_v44  ;;  %v1328_v16 = vmax.f32 %v4896_v7, %v4942_v14  ;;  %v1514_v19 = vmax.f32 %v1450_v0, %v1482_v13  ;;  %v4973_v15 = vmax.f32 %v1200_v56, %v4940_v12  ;;  %v5003_v44 = vld [vmem:[#allocation3 + $0xd8] sm:$0xff] }
 0x17b   : > { %v1608_v57 = vld [vmem:[#allocation2 + $0xa9] sm:$0xff]  ;;  %v1513_v29 = vmax.f32 %v1449_v59, %v1481_v9  ;;  %v1639_v33 = vmax.f32 %v1575_v36, %v1607_v39  ;;  %v1609_v5 = vld [vmem:[#allocation2 + $0xb1] sm:$0xff]  ;;  %1422 = vst.msk [vmem:[#allocation2 + $0x108] sm:$0xff] %vm226_vm1, %v1390_v35  ;;  %1423 = vst.msk [vmem:[#allocation2 + $0x110] sm:$0xff] %vm226_vm1, %v1391_v1  ;;  %2784 = vrot.lane.b32.xlu1 %v1391_v1, %s4216_s28  ;;  %v4979_v51 = vmax.f32 %v1201_v32, %v4942_v14 }
 0x17c   : > { %v1545_v20 = vld [vmem:[#allocation2 + $0xb0] sm:$0xff]  ;;  %v1640_v41 = vmax.f32 %v1576_v31, %v1608_v57  ;;  %v1546_v49 = vld [vmem:[#allocation2 + $0xc8] sm:$0xff]  ;;  %v4206_v36 = vld [vmem:[#allocation3 + $0x18] sm:$0xff] }
 0x17d   : > { %v1672_v45 = vld [vmem:[#allocation2 + $0xaa] sm:$0xff]  ;;  %v1577_v17 = vmax.f32 %v1513_v29, %v1545_v20  ;;  %v1703_v61 = vmax.f32 %v1639_v33, %v1671_v3  ;;  %2782 = vrot.lane.b32.xlu0 %v1390_v35, %s4216_s28  ;;  %v1578_v40 = vmax.f32 %v1514_v19, %v1546_v49  ;;  %v1675_v56 = vld [vmem:[#allocation2 + $0xd2] sm:$0xff]  ;;  %v5019_v19 = vld [vmem:[#allocation3 + $0xe0] sm:$0xff] }
 0x17e   : > { %v1610_v28 = vld [vmem:[#allocation2 + $0xc9] sm:$0xff]  ;;  %v1704_v34 = vmax.f32 %v1640_v41, %v1672_v45  ;;  %v1611_v8 = vld [vmem:[#allocation2 + $0xd1] sm:$0xff] }
 0x17f   : > { %v1641_v26 = vmax.f32 %v1577_v17, %v1609_v5  ;;  %v1451_v55 = vld [vmem:[#allocation2 + $0xce] sm:$0xff]  ;;  %1735 = vst.msk [vmem:[#allocation3 + $0x68] sm:$0xff] %vm226_vm1, %v1703_v61  ;;  %v1642_v59 = vmax.f32 %v1578_v40, %v1610_v28 }
 0x180   : > { %v4205_v52 = vld [vmem:[#allocation3 + $0x10] sm:$0xff]  ;;  %v4984_v63 = vld [vmem:[#allocation3 + $0x28] sm:$0xff]  ;;  %1736 = vst.msk [vmem:[#allocation3 + $0x70] sm:$0xff] %vm226_vm1, %v1704_v34  ;;  %v1330_v34 = vmax.f32 %v4979_v51, %v5003_v44 }
 0x181   : > { %v1824_v62 = vmax.f32 %v4205_v52, %v4951_v10  ;;  %v1483_v7 = vld [vmem:[#allocation2 + $0xcf] sm:$0xff]  ;;  %v1705_v21 = vmax.f32 %v1641_v26, %v1673_v4  ;;  %v1887_v48 = vmax.f32 %v4457_v50, %v4984_v63  ;;  %v1452_v27 = vld [vmem:[#allocation2 + $0xe6] sm:$0xff]  ;;  %v1825_v39 = vmax.f32 %v4206_v36, %v4984_v63 }
 0x182   : > { %v4968_v38 = vld [vmem:[#allocation3 + $0x30] sm:$0xff]  ;;  %v1515_v46 = vmax.f32 %v1451_v55, %v1483_v7  ;;  %v1484_v53 = vld [vmem:[#allocation2 + $0xe7] sm:$0xff] }
 0x183   : > { %v1547_v22 = vld [vmem:[#allocation2 + $0xd0] sm:$0xff]  ;;  %v1950_v18 = vmax.f32 %v1886_v30, %v4968_v38  ;;  %v1888_v11 = vmax.f32 %v1824_v62, %v4968_v38  ;;  %v1826_v25 = vmax.f32 %v4951_v10, %v4968_v38  ;;  %1737 = vst.msk [vmem:[#allocation3 + $0x78] sm:$0xff] %vm226_vm1, %v1705_v21  ;;  %v4999_v57 = vld [vmem:[#allocation3 + $0x48] sm:$0xff]  ;;  %v1951_v43 = vmax.f32 %v1887_v48, %v4986_v2  ;;  %v5015_v30 = vld [vmem:[#allocation3 + $0x58] sm:$0xff] }
 0x184   : > { %v4991_v32 = vld [vmem:[#allocation3 + $0xd0] sm:$0xff]  ;;  %v1579_v3 = vmax.f32 %v1515_v46, %v1547_v22  ;;  %v1516_v47 = vmax.f32 %v1452_v27, %v1484_v53  ;;  %v1889_v45 = vmax.f32 %v1825_v39, %v4986_v2  ;;  %v1548_v35 = vld [vmem:[#allocation2 + $0xe8] sm:$0xff]  ;;  %v1393_v10 = vmax.f32 %v1328_v16, %v5003_v44 }
 0x185   : > { %v1674_v9 = vld [vmem:[#allocation2 + $0xca] sm:$0xff]  ;;  %v2014_v50 = vmax.f32 %v1950_v18, %v4970_v23  ;;  %v1392_v29 = vmax.f32 %v1327_v24, %v4991_v32  ;;  %v1952_v20 = vmax.f32 %v1888_v11, %v4970_v23  ;;  %v2015_v41 = vmax.f32 %v1951_v43, %v4999_v57 }
 0x186   : > { %v1453_v33 = vld [vmem:[#allocation2 + $0xee] sm:$0xff]  ;;  %v1706_v17 = vmax.f32 %v1642_v59, %v1674_v9  ;;  %v1643_v5 = vmax.f32 %v1579_v3, %v1611_v8  ;;  %v1580_v4 = vmax.f32 %v1516_v47, %v1548_v35  ;;  %v1953_v13 = vmax.f32 %v1889_v45, %v4999_v57  ;;  %1425 = vst.msk [vmem:[#allocation2 + $0x130] sm:$0xff] %vm226_vm1, %v1393_v10  ;;  %v1454_v52 = vld [vmem:[#allocation2 + $0x106] sm:$0xff] }
 0x187   : > { %v1485_v31 = vld [vmem:[#allocation2 + $0xef] sm:$0xff]  ;;  %2911 = vrot.lane.b32.xlu0 %v2014_v50, %s4217_s29  ;;  %2046 = vst.msk [vmem:[#allocation2 + $0x8] sm:$0xff] %vm226_vm1, %v2014_v50  ;;  %1424 = vst.msk [vmem:[#allocation2 + $0x128] sm:$0xff] %vm226_vm1, %v1392_v29  ;;  %v1329_v26 = vmax.f32 %v4973_v15, %v4991_v32  ;;  %v1486_v62 = vld [vmem:[#allocation2 + $0x107] sm:$0xff]  ;;  %2913 = vrot.lane.b32.xlu1 %v2015_v41, %s4217_s29  ;;  %v1890_v36 = vmax.f32 %v1826_v25, %v4970_v23 }
 0x188   : > { %v1612_v1 = vld [vmem:[#allocation2 + $0xe9] sm:$0xff]  ;;  %v1517_v24 = vmax.f32 %v1453_v33, %v1485_v31  ;;  %1738 = vst.msk [vmem:[#allocation3 + $0x80] sm:$0xff] %vm226_vm1, %v1706_v17  ;;  %v1707_v49 = vmax.f32 %v1643_v5, %v1675_v56  ;;  %2047 = vst.msk [vmem:[#allocation2 + $0x10] sm:$0xff] %vm226_vm1, %v2015_v41  ;;  %v1613_v15 = vld [vmem:[#allocation2 + $0xf1] sm:$0xff]  ;;  %v5029_v21 = vmax.f32 %v1953_v13, %v5015_v30 }
 0x189   : > { %v1549_v61 = vld [vmem:[#allocation2 + $0xf0] sm:$0xff]  ;;  %v1644_v7 = vmax.f32 %v1580_v4, %v1612_v1  ;;  %v5032_v40 = vmax.f32 %v1329_v26, %v5019_v19  ;;  %v1518_v46 = vmax.f32 %v1454_v52, %v1486_v62  ;;  %v1550_v22 = vld [vmem:[#allocation2 + $0x108] sm:$0xff]  ;;  %v1827_v39 = vmax.f32 %v4984_v63, %v4986_v2  ;;  %v5049_v50 = vld [vmem:[#allocation3 + $0x60] sm:$0xff] }
 0x18a   : > { %v5012_v0 = vld [vmem:[#allocation3 + $0x50] sm:$0xff]  ;;  %v1581_v28 = vmax.f32 %v1517_v24, %v1549_v61  ;;  %v5034_v18 = vld [vmem:[#allocation3 + $0xe8] sm:$0xff]  ;;  %1739 = vst.msk [vmem:[#allocation3 + $0x88] sm:$0xff] %vm226_vm1, %v1707_v49  ;;  %2049 = vst.msk [vmem:[#allocation2 + $0x30] sm:$0xff] %vm226_vm1, %v5029_v21  ;;  %v1266_v25 = vmax.f32 %v1202_v58, %v4991_v32  ;;  %v1203_v31 = vmax.f32 %v4872_v60, %v4942_v14 }
 0x18b   : > { %v1676_v16 = vld [vmem:[#allocation2 + $0xea] sm:$0xff]  ;;  %v2016_v55 = vmax.f32 %v1952_v20, %v5012_v0  ;;  %2786 = vrot.lane.b32.xlu0 %v1392_v29, %s4216_s28  ;;  %v5040_v27 = vmax.f32 %v1330_v34, %v5034_v18  ;;  %v1677_v9 = vld [vmem:[#allocation2 + $0xf2] sm:$0xff]  ;;  %1426 = vst.msk [vmem:[#allocation2 + $0x148] sm:$0xff] %vm226_vm1, %v5032_v40  ;;  %v1582_v3 = vmax.f32 %v1518_v46, %v1550_v22 }
 0x18c   : > { %v1645_v51 = vmax.f32 %v1581_v28, %v1613_v15  ;;  %v1614_v48 = vld [vmem:[#allocation2 + $0x109] sm:$0xff]  ;;  %v1708_v59 = vmax.f32 %v1644_v7, %v1676_v16  ;;  %v1615_v43 = vld [vmem:[#allocation2 + $0x111] sm:$0xff]  ;;  %v1954_v47 = vmax.f32 %v1890_v36, %v5012_v0  ;;  %v1891_v33 = vmax.f32 %v1827_v39, %v4999_v57  ;;  %2788 = vrot.lane.b32.xlu1 %v1393_v10, %s4216_s28 }
 0x18d   : > { %2048 = vst.msk [vmem:[#allocation2 + $0x28] sm:$0xff] %vm226_vm1, %v2016_v55  ;;  %v1455_v53 = vld [vmem:[#allocation2 + $0x10e] sm:$0xff]  ;;  %1427 = vst.msk [vmem:[#allocation2 + $0x150] sm:$0xff] %vm226_vm1, %v5040_v27  ;;  %v1646_v6 = vmax.f32 %v1582_v3, %v1614_v48  ;;  %v1331_v5 = vmax.f32 %v1266_v25, %v5019_v19  ;;  %v1828_v35 = vmax.f32 %v4968_v38, %v4970_v23 }
 0x18e   : > { %v1487_v11 = vld [vmem:[#allocation2 + $0x10f] sm:$0xff]  ;;  %v1709_v29 = vmax.f32 %v1645_v51, %v1677_v9  ;;  %1740 = vst.msk [vmem:[#allocation3 + $0x90] sm:$0xff] %vm226_vm1, %v1708_v59  ;;  %v2078_v20 = vld [vmem:[#allocation2 + $0x6] sm:$0xff]  ;;  %v5071_v60 = vmax.f32 %v1954_v47, %v5049_v50  ;;  %v1955_v10 = vmax.f32 %v1891_v33, %v5015_v30  ;;  %v1267_v4 = vmax.f32 %v1203_v31, %v5003_v44 }
 0x18f   : > { %v1519_v8 = vmax.f32 %v1455_v53, %v1487_v11  ;;  %v1678_v56 = vld [vmem:[#allocation2 + $0x10a] sm:$0xff]  ;;  %2915 = vrot.lane.b32.xlu0 %v2016_v55, %s4217_s29  ;;  %v1679_v49 = vld [vmem:[#allocation2 + $0x112] sm:$0xff]  ;;  %v1892_v22 = vmax.f32 %v1828_v35, %v5012_v0  ;;  %v1829_v36 = vmax.f32 %v4986_v2, %v4999_v57  ;;  %v1204_v39 = vmax.f32 %v4940_v12, %v4991_v32 }
 0x190   : > { %v1551_v63 = vld [vmem:[#allocation2 + $0x110] sm:$0xff]  ;;  %v2110_v45 = vld [vmem:[#allocation2 + $0x7] sm:$0xff]  ;;  %1741 = vst.msk [vmem:[#allocation3 + $0x98] sm:$0xff] %vm226_vm1, %v1709_v29  ;;  %v1710_v13 = vmax.f32 %v1646_v6, %v1678_v56  ;;  %2050 = vst.msk [vmem:[#allocation2 + $0x48] sm:$0xff] %vm226_vm1, %v5071_v60  ;;  %v1332_v15 = vmax.f32 %v1267_v4, %v5034_v18  ;;  %2917 = vrot.lane.b32.xlu1 %v5029_v21, %s4217_s29  ;;  %v1205_v2 = vmax.f32 %v4942_v14, %v5003_v44 }
 0x191   : > { %v1583_v58 = vmax.f32 %v1519_v8, %v1551_v63  ;;  %v5063_v17 = vld [vmem:[#allocation3 + $0x68] sm:$0xff]  ;;  %v2142_v1 = vmax.f32 %v2078_v20, %v2110_v45  ;;  %v5074_v24 = vld [vmem:[#allocation3 + $0xf0] sm:$0xff]  ;;  %v5092_v11 = vld [vmem:[#allocation3 + $0xf8] sm:$0xff]  ;;  %v1956_v25 = vmax.f32 %v1892_v22, %v5049_v50  ;;  %v1893_v47 = vmax.f32 %v1829_v36, %v5015_v30 }
 0x192   : > { %v1456_v61 = vld [vmem:[#allocation2 + $0x126] sm:$0xff]  ;;  %v5078_v16 = vmax.f32 %v1331_v5, %v5074_v24  ;;  %v5083_v34 = vmax.f32 %v1955_v10, %v5063_v17  ;;  %v1457_v46 = vld [vmem:[#allocation2 + $0x12e] sm:$0xff]  ;;  %1742 = vst.msk [vmem:[#allocation3 + $0xa0] sm:$0xff] %vm226_vm1, %v1710_v13  ;;  %v5103_v3 = vmax.f32 %v1332_v15, %v5092_v11  ;;  %v1268_v20 = vmax.f32 %v1204_v39, %v5019_v19  ;;  %v5121_v4 = vld [vmem:[#allocation3 + $0x78] sm:$0xff] }
 0x193   : > { %v1488_v41 = vld [vmem:[#allocation2 + $0x127] sm:$0xff]  ;;  %v1647_v26 = vmax.f32 %v1583_v58, %v1615_v43  ;;  %2790 = vrot.lane.b32.xlu0 %v5032_v40, %s4216_s28  ;;  %v2111_v59 = vld [vmem:[#allocation2 + $0xf] sm:$0xff]  ;;  %v1269_v45 = vmax.f32 %v1205_v2, %v5034_v18 }
 0x194   : > { %v2174_v38 = vld [vmem:[#allocation2 + $0x8] sm:$0xff]  ;;  %v1520_v28 = vmax.f32 %v1456_v61, %v1488_v41  ;;  %1428 = vst.msk [vmem:[#allocation2 + $0x168] sm:$0xff] %vm226_vm1, %v5078_v16  ;;  %2051 = vst.msk [vmem:[#allocation2 + $0x50] sm:$0xff] %vm226_vm1, %v5083_v34  ;;  %v2175_v29 = vld [vmem:[#allocation2 + $0x10] sm:$0xff]  ;;  %2792 = vrot.lane.b32.xlu1 %v5040_v27, %s4216_s28  ;;  %v1957_v27 = vmax.f32 %v1893_v47, %v5063_v17 }
 0x195   : > { %v1552_v55 = vld [vmem:[#allocation2 + $0x128] sm:$0xff]  ;;  %v2206_v52 = vmax.f32 %v2142_v1, %v2174_v38  ;;  %v1711_v51 = vmax.f32 %v1647_v26, %v1679_v49  ;;  %v5109_v43 = vld [vmem:[#allocation3 + $0x70] sm:$0xff]  ;;  %1429 = vst.msk [vmem:[#allocation2 + $0x170] sm:$0xff] %vm226_vm1, %v5103_v3  ;;  %v5134_v22 = vld [vmem:[#allocation3 + $0x100] sm:$0xff] }
 0x196   : > { %v2238_v62 = vld [vmem:[#allocation2 + $0x9] sm:$0xff]  ;;  %v1584_v53 = vmax.f32 %v1520_v28, %v1552_v55  ;;  %v5115_v6 = vmax.f32 %v1956_v25, %v5109_v43  ;;  %v2239_v5 = vld [vmem:[#allocation2 + $0x11] sm:$0xff]  ;;  %v1333_v28 = vmax.f32 %v1268_v20, %v5074_v24  ;;  %v1334_v55 = vmax.f32 %v1269_v45, %v5092_v11 }
 0x197   : > { %v1616_v7 = vld [vmem:[#allocation2 + $0x129] sm:$0xff]  ;;  %v2270_v21 = vmax.f32 %v2206_v52, %v2238_v62  ;;  %1743 = vst.msk [vmem:[#allocation3 + $0xa8] sm:$0xff] %vm226_vm1, %v1711_v51  ;;  %v1617_v61 = vld [vmem:[#allocation2 + $0x131] sm:$0xff]  ;;  %2919 = vrot.lane.b32.xlu0 %v5071_v60, %s4217_s29  ;;  %v1830_v52 = vmax.f32 %v4970_v23, %v5012_v0  ;;  %v1831_v51 = vmax.f32 %v4999_v57, %v5015_v30 }
 0x198   : > { %v2079_v48 = vld [vmem:[#allocation2 + $0xe] sm:$0xff]  ;;  %v1648_v56 = vmax.f32 %v1584_v53, %v1616_v7  ;;  %v2080_v14 = vld [vmem:[#allocation2 + $0x26] sm:$0xff]  ;;  %2052 = vst.msk [vmem:[#allocation2 + $0x68] sm:$0xff] %vm226_vm1, %v5115_v6  ;;  %v5139_v36 = vmax.f32 %v1957_v27, %v5121_v4  ;;  %v5142_v23 = vmax.f32 %v1333_v28, %v5134_v22  ;;  %2921 = vrot.lane.b32.xlu1 %v5083_v34, %s4217_s29 }
 0x199   : > { %v1680_v9 = vld [vmem:[#allocation2 + $0x12a] sm:$0xff]  ;;  %v2143_v40 = vmax.f32 %v2079_v48, %v2111_v59  ;;  %v2303_v13 = vld [vmem:[#allocation2 + $0x12] sm:$0xff] }
 0x19a   : > { %v1489_v8 = vld [vmem:[#allocation2 + $0x12f] sm:$0xff]  ;;  %v2112_v58 = vld [vmem:[#allocation2 + $0x27] sm:$0xff]  ;;  %v1712_v1 = vmax.f32 %v1648_v56, %v1680_v9  ;;  %v1894_v9 = vmax.f32 %v1830_v52, %v5049_v50  ;;  %2053 = vst.msk [vmem:[#allocation2 + $0x70] sm:$0xff] %vm226_vm1, %v5139_v36  ;;  %1430 = vst.msk [vmem:[#allocation2 + $0x188] sm:$0xff] %vm226_vm1, %v5142_v23 }
 0x19b   : > { %v2302_v12 = vld [vmem:[#allocation2 + $0xa] sm:$0xff]  ;;  %v1521_v63 = vmax.f32 %v1457_v46, %v1489_v8  ;;  %v2207_v35 = vmax.f32 %v2143_v40, %v2175_v29  ;;  %v2144_v41 = vmax.f32 %v2080_v14, %v2112_v58  ;;  %v1681_v26 = vld [vmem:[#allocation2 + $0x132] sm:$0xff]  ;;  %2794 = vrot.lane.b32.xlu0 %v5078_v16, %s4216_s28  ;;  %v1895_v14 = vmax.f32 %v1831_v51, %v5063_v17 }
 0x19c   : > { %v2334_v33 = vmax.f32 %v2270_v21, %v2302_v12  ;;  %v1553_v31 = vld [vmem:[#allocation2 + $0x130] sm:$0xff]  ;;  %v2176_v49 = vld [vmem:[#allocation2 + $0x28] sm:$0xff]  ;;  %1744 = vst.msk [vmem:[#allocation3 + $0xb0] sm:$0xff] %vm226_vm1, %v1712_v1  ;;  %2796 = vrot.lane.b32.xlu1 %v5103_v3, %s4216_s28 }
 0x19d   : > { %v1585_v10 = vmax.f32 %v1521_v63, %v1553_v31  ;;  %v2240_v38 = vld [vmem:[#allocation2 + $0x29] sm:$0xff]  ;;  %v2271_v62 = vmax.f32 %v2207_v35, %v2239_v5  ;;  %v2208_v7 = vmax.f32 %v2144_v41, %v2176_v49  ;;  %v1958_v31 = vmax.f32 %v1894_v9, %v5109_v43  ;;  %v2241_v58 = vld [vmem:[#allocation2 + $0x31] sm:$0xff]  ;;  %v5162_v5 = vld [vmem:[#allocation3 + $0x80] sm:$0xff] }
 0x19e   : > { %2366 = vst.msk [vmem:[#allocation3 + $0x20] sm:$0xff] %vm226_vm1, %v2334_v33  ;;  %v2081_v15 = vld [vmem:[#allocation2 + $0x2e] sm:$0xff]  ;;  %v1458_v21 = vld [vmem:[#allocation2 + $0x146] sm:$0xff]  ;;  %v1206_v49 = vmax.f32 %v4991_v32, %v5019_v19 }
 0x19f   : > { %v1649_v60 = vmax.f32 %v1585_v10, %v1617_v61  ;;  %v2113_v46 = vld [vmem:[#allocation2 + $0x2f] sm:$0xff]  ;;  %v1490_v59 = vld [vmem:[#allocation2 + $0x147] sm:$0xff]  ;;  %v2335_v8 = vmax.f32 %v2271_v62, %v2303_v13  ;;  %v2272_v2 = vmax.f32 %v2208_v7, %v2240_v38  ;;  %v5170_v61 = vmax.f32 %v1958_v31, %v5162_v5  ;;  %2923 = vrot.lane.b32.xlu0 %v5115_v6, %s4217_s29 }
 0x1a0   : > { %v1048_v48 = vld [vmem:[#allocation2 + $0x1ea] sm:$0xff]  ;;  %v2145_v39 = vmax.f32 %v2081_v15, %v2113_v46  ;;  %v1522_v12 = vmax.f32 %v1458_v21, %v1490_v59  ;;  %v2305_v54 = vld [vmem:[#allocation2 + $0x32] sm:$0xff]  ;;  %v1270_v7 = vmax.f32 %v1206_v49, %v5074_v24  ;;  %v1832_v15 = vmax.f32 %v5012_v0, %v5049_v50  ;;  %2925 = vrot.lane.b32.xlu1 %v5139_v36, %s4217_s29 }
 0x1a1   : > { %v2304_v53 = vld [vmem:[#allocation2 + $0x2a] sm:$0xff]  ;;  %v1713_v25 = vmax.f32 %v1649_v60, %v1681_v26  ;;  %2367 = vst.msk [vmem:[#allocation3 + $0x28] sm:$0xff] %vm226_vm1, %v2335_v8  ;;  %v1080_v35 = vmax.f32 %v1016_v37, %v1048_v48  ;;  %v1959_v26 = vmax.f32 %v1895_v14, %v5121_v4  ;;  %2054 = vst.msk [vmem:[#allocation2 + $0x88] sm:$0xff] %vm226_vm1, %v5170_v61  ;;  %v1683_v21 = vld [vmem:[#allocation2 + $0x152] sm:$0xff] }
 0x1a2   : > { %v2177_v57 = vld [vmem:[#allocation2 + $0x30] sm:$0xff]  ;;  %v1554_v29 = vld [vmem:[#allocation2 + $0x148] sm:$0xff]  ;;  %v2336_v16 = vmax.f32 %v2272_v2, %v2304_v53  ;;  %v1335_v8 = vmax.f32 %v1270_v7, %v5134_v22  ;;  %v1896_v0 = vmax.f32 %v1832_v15, %v5109_v43  ;;  %v1833_v2 = vmax.f32 %v5015_v30, %v5063_v17  ;;  %v5231_v15 = vld [vmem:[#allocation3 + $0x98] sm:$0xff] }
 0x1a3   : > { %v5147_v40 = vld [vmem:[#allocation3 + $0x108] sm:$0xff]  ;;  %v2209_v56 = vmax.f32 %v2145_v39, %v2177_v57  ;;  %1745 = vst.msk [vmem:[#allocation3 + $0xb8] sm:$0xff] %vm226_vm1, %v1713_v25  ;;  %v1586_v20 = vmax.f32 %v1522_v12, %v1554_v29  ;;  %v1555_v10 = vld [vmem:[#allocation2 + $0x150] sm:$0xff]  ;;  %1113 = vst.msk [vmem:[#allocation3 + $0x110] sm:$0xff] %vm226_vm1, %v1080_v35  ;;  %2798 = vrot.lane.b32.xlu0 %v5142_v23, %s4216_s28 }
 0x1a4   : > { %v1618_v63 = vld [vmem:[#allocation2 + $0x149] sm:$0xff]  ;;  %v5156_v34 = vmax.f32 %v1334_v55, %v5147_v40  ;;  %2368 = vst.msk [vmem:[#allocation3 + $0x30] sm:$0xff] %vm226_vm1, %v2336_v16  ;;  %v1207_v55 = vmax.f32 %v5003_v44, %v5034_v18  ;;  %v1619_v52 = vld [vmem:[#allocation2 + $0x151] sm:$0xff]  ;;  %v1960_v36 = vmax.f32 %v1896_v0, %v5162_v5  ;;  %v1210_v0 = vmax.f32 %v5074_v24, %v5134_v22 }
 0x1a5   : > { %v1459_v47 = vld [vmem:[#allocation2 + $0x14e] sm:$0xff]  ;;  %v2273_v1 = vmax.f32 %v2209_v56, %v2241_v58  ;;  %v2082_v41 = vld [vmem:[#allocation2 + $0x46] sm:$0xff]  ;;  %v1650_v42 = vmax.f32 %v1586_v20, %v1618_v63  ;;  %v5207_v16 = vld [vmem:[#allocation3 + $0x118] sm:$0xff]  ;;  %v1897_v58 = vmax.f32 %v1833_v2, %v5121_v4  ;;  %v1208_v20 = vmax.f32 %v5019_v19, %v5074_v24 }
 0x1a6   : > { %v1491_v33 = vld [vmem:[#allocation2 + $0x14f] sm:$0xff]  ;;  %1431 = vst.msk [vmem:[#allocation2 + $0x190] sm:$0xff] %vm226_vm1, %v5156_v34  ;;  %v2114_v13 = vld [vmem:[#allocation2 + $0x47] sm:$0xff]  ;;  %v1271_v39 = vmax.f32 %v1207_v55, %v5092_v11  ;;  %2800 = vrot.lane.b32.xlu1 %v5156_v34, %s4216_s28 }
 0x1a7   : > { %v1523_v45 = vmax.f32 %v1459_v47, %v1491_v33  ;;  %v1682_v37 = vld [vmem:[#allocation2 + $0x14a] sm:$0xff]  ;;  %v2146_v27 = vmax.f32 %v2082_v41, %v2114_v13  ;;  %v2337_v32 = vmax.f32 %v2273_v1, %v2305_v54  ;;  %v2307_v55 = vld [vmem:[#allocation2 + $0x52] sm:$0xff]  ;;  %2927 = vrot.lane.b32.xlu0 %v5170_v61, %s4217_s29 }
 0x1a8   : > { %v5178_v28 = vld [vmem:[#allocation3 + $0x88] sm:$0xff]  ;;  %v1714_v46 = vmax.f32 %v1650_v42, %v1682_v37  ;;  %v2179_v29 = vld [vmem:[#allocation2 + $0x50] sm:$0xff]  ;;  %v1336_v47 = vmax.f32 %v1271_v39, %v5147_v40 }
 0x1a9   : > { %v1587_v38 = vmax.f32 %v1523_v45, %v1555_v10  ;;  %v2178_v3 = vld [vmem:[#allocation2 + $0x48] sm:$0xff]  ;;  %v5188_v60 = vmax.f32 %v1959_v26, %v5178_v28  ;;  %2369 = vst.msk [vmem:[#allocation3 + $0x38] sm:$0xff] %vm226_vm1, %v2337_v32  ;;  %v2243_v35 = vld [vmem:[#allocation2 + $0x51] sm:$0xff]  ;;  %v5219_v26 = vld [vmem:[#allocation3 + $0x120] sm:$0xff] }
 0x1aa   : > { %v2242_v62 = vld [vmem:[#allocation2 + $0x49] sm:$0xff]  ;;  %v2210_v51 = vmax.f32 %v2146_v27, %v2178_v3  ;;  %1746 = vst.msk [vmem:[#allocation3 + $0xc0] sm:$0xff] %vm226_vm1, %v1714_v46  ;;  %v5215_v10 = vmax.f32 %v1336_v47, %v5207_v16  ;;  %v1272_v27 = vmax.f32 %v1208_v20, %v5134_v22  ;;  %v1685_v2 = vld [vmem:[#allocation2 + $0x172] sm:$0xff]  ;;  %v1211_v47 = vmax.f32 %v5092_v11, %v5147_v40 }
 0x1ab   : > { %v1651_v44 = vmax.f32 %v1587_v38, %v1619_v52  ;;  %v2083_v48 = vld [vmem:[#allocation2 + $0x4e] sm:$0xff]  ;;  %v1460_v53 = vld [vmem:[#allocation2 + $0x166] sm:$0xff]  ;;  %2055 = vst.msk [vmem:[#allocation2 + $0x90] sm:$0xff] %vm226_vm1, %v5188_v60  ;;  %v1961_v38 = vmax.f32 %v1897_v58, %v5178_v28  ;;  %2929 = vrot.lane.b32.xlu1 %v5188_v60, %s4217_s29  ;;  %v1373_v58 = vld [vmem:[#allocation3 + $0x138] sm:$0xff] }
 0x1ac   : > { %v2115_v6 = vld [vmem:[#allocation2 + $0x4f] sm:$0xff]  ;;  %v1492_v25 = vld [vmem:[#allocation2 + $0x167] sm:$0xff]  ;;  %v2274_v12 = vmax.f32 %v2210_v51, %v2242_v62  ;;  %1433 = vst.msk [vmem:[#allocation2 + $0x1b0] sm:$0xff] %vm226_vm1, %v5215_v10 }
 0x1ad   : > { %v2306_v59 = vld [vmem:[#allocation2 + $0x4a] sm:$0xff]  ;;  %v2147_v9 = vmax.f32 %v2083_v48, %v2115_v6  ;;  %v1715_v57 = vmax.f32 %v1651_v44, %v1683_v21  ;;  %v1524_v56 = vmax.f32 %v1460_v53, %v1492_v25  ;;  %v5238_v48 = vmax.f32 %v1961_v38, %v5231_v15 }
 0x1ae   : > { %v1556_v63 = vld [vmem:[#allocation2 + $0x168] sm:$0xff]  ;;  %v2338_v45 = vmax.f32 %v2274_v12, %v2306_v59  ;;  %v5217_v41 = vld [vmem:[#allocation3 + $0x90] sm:$0xff]  ;;  %v1209_v53 = vmax.f32 %v5034_v18, %v5092_v11 }
 0x1af   : > { %v1461_v33 = vld [vmem:[#allocation2 + $0x16e] sm:$0xff]  ;;  %v2211_v31 = vmax.f32 %v2147_v9, %v2179_v29  ;;  %1747 = vst.msk [vmem:[#allocation3 + $0xc8] sm:$0xff] %vm226_vm1, %v1715_v57  ;;  %v1588_v1 = vmax.f32 %v1524_v56, %v1556_v63  ;;  %v2084_v13 = vld [vmem:[#allocation2 + $0x66] sm:$0xff]  ;;  %v5222_v37 = vmax.f32 %v1960_v36, %v5217_v41  ;;  %2057 = vst.msk [vmem:[#allocation2 + $0xb0] sm:$0xff] %vm226_vm1, %v5238_v48  ;;  %2804 = vrot.lane.b32.xlu1 %v5215_v10, %s4216_s28 }
 0x1b0   : > { %v1620_v14 = vld [vmem:[#allocation2 + $0x169] sm:$0xff]  ;;  %2370 = vst.msk [vmem:[#allocation3 + $0x40] sm:$0xff] %vm226_vm1, %v2338_v45  ;;  %v1621_v44 = vld [vmem:[#allocation2 + $0x171] sm:$0xff]  ;;  %v1273_v56 = vmax.f32 %v1209_v53, %v5147_v40 }
 0x1b1   : > { %v1493_v30 = vld [vmem:[#allocation2 + $0x16f] sm:$0xff]  ;;  %v2275_v49 = vmax.f32 %v2211_v31, %v2243_v35  ;;  %v2116_v19 = vld [vmem:[#allocation2 + $0x67] sm:$0xff]  ;;  %v1652_v52 = vmax.f32 %v1588_v1, %v1620_v14  ;;  %2056 = vst.msk [vmem:[#allocation2 + $0xa8] sm:$0xff] %vm226_vm1, %v5222_v37  ;;  %v1275_v1 = vmax.f32 %v1211_v47, %v5207_v16  ;;  %v1836_v47 = vmax.f32 %v5109_v43, %v5162_v5 }
 0x1b2   : > { %v1525_v23 = vmax.f32 %v1461_v33, %v1493_v30  ;;  %v1368_v54 = vld [vmem:[#allocation3 + $0x110] sm:$0xff]  ;;  %v2148_v7 = vmax.f32 %v2084_v13, %v2116_v19  ;;  %v2180_v51 = vld [vmem:[#allocation2 + $0x68] sm:$0xff]  ;;  %v1338_v60 = vmax.f32 %v1273_v56, %v5207_v16 }
 0x1b3   : > { %v1557_v42 = vld [vmem:[#allocation2 + $0x170] sm:$0xff]  ;;  %v1400_v32 = vmax.f32 %v1335_v8, %v1368_v54  ;;  %v2339_v46 = vmax.f32 %v2275_v49, %v2307_v55  ;;  %v1337_v6 = vmax.f32 %v1272_v27, %v1368_v54  ;;  %v1462_v8 = vld [vmem:[#allocation2 + $0x186] sm:$0xff]  ;;  %v1274_v36 = vmax.f32 %v1210_v0, %v1368_v54  ;;  %2933 = vrot.lane.b32.xlu1 %v5238_v48, %s4217_s29 }
 0x1b4   : > { %v1684_v3 = vld [vmem:[#allocation2 + $0x16a] sm:$0xff]  ;;  %v1589_v62 = vmax.f32 %v1525_v23, %v1557_v42  ;;  %v2212_v59 = vmax.f32 %v2148_v7, %v2180_v51  ;;  %v1834_v42 = vmax.f32 %v5049_v50, %v5109_v43  ;;  %v2309_v27 = vld [vmem:[#allocation2 + $0x72] sm:$0xff] }
 0x1b5   : > { %v2244_v34 = vld [vmem:[#allocation2 + $0x69] sm:$0xff]  ;;  %1432 = vst.msk [vmem:[#allocation2 + $0x1a8] sm:$0xff] %vm226_vm1, %v1400_v32  ;;  %v1716_v39 = vmax.f32 %v1652_v52, %v1684_v3  ;;  %2371 = vst.msk [vmem:[#allocation3 + $0x48] sm:$0xff] %vm226_vm1, %v2339_v46  ;;  %v5249_v18 = vmax.f32 %v1337_v6, %v5219_v26  ;;  %2802 = vrot.lane.b32.xlu0 %v1400_v32, %s4216_s28  ;;  %v2245_v20 = vld [vmem:[#allocation2 + $0x71] sm:$0xff]  ;;  %v1339_v54 = vmax.f32 %v1274_v36, %v5219_v26 }
 0x1b6   : > { %v1653_v21 = vmax.f32 %v1589_v62, %v1621_v44  ;;  %v2085_v61 = vld [vmem:[#allocation2 + $0x6e] sm:$0xff]  ;;  %v2276_v22 = vmax.f32 %v2212_v59, %v2244_v34  ;;  %v2086_v19 = vld [vmem:[#allocation2 + $0x86] sm:$0xff]  ;;  %v1898_v50 = vmax.f32 %v1834_v42, %v5162_v5  ;;  %v1835_v59 = vmax.f32 %v5063_v17, %v5121_v4 }
 0x1b7   : > { %v2117_v9 = vld [vmem:[#allocation2 + $0x6f] sm:$0xff]  ;;  %v1494_v29 = vld [vmem:[#allocation2 + $0x187] sm:$0xff]  ;;  %1748 = vst.msk [vmem:[#allocation3 + $0xd0] sm:$0xff] %vm226_vm1, %v1716_v39  ;;  %1434 = vst.msk [vmem:[#allocation2 + $0x1c8] sm:$0xff] %vm226_vm1, %v5249_v18 }
 0x1b8   : > { %v1371_v25 = vld [vmem:[#allocation3 + $0x128] sm:$0xff]  ;;  %v2149_v12 = vmax.f32 %v2085_v61, %v2117_v9  ;;  %v1372_v63 = vld [vmem:[#allocation3 + $0x130] sm:$0xff]  ;;  %v1717_v24 = vmax.f32 %v1653_v21, %v1685_v2  ;;  %v1526_v31 = vmax.f32 %v1462_v8, %v1494_v29  ;;  %v5274_v46 = vld [vmem:[#allocation3 + $0xa0] sm:$0xff]  ;;  %v1962_v0 = vmax.f32 %v1898_v50, %v5217_v41 }
 0x1b9   : > { %v2308_v57 = vld [vmem:[#allocation2 + $0x6a] sm:$0xff]  ;;  %v5266_v52 = vmax.f32 %v1338_v60, %v1371_v25  ;;  %v1340_v62 = vmax.f32 %v1275_v1, %v1371_v25  ;;  %v5271_v26 = vmax.f32 %v1339_v54, %v1372_v63  ;;  %2931 = vrot.lane.b32.xlu0 %v5222_v37, %s4217_s29  ;;  %v1687_v9 = vld [vmem:[#allocation2 + $0x192] sm:$0xff]  ;;  %v1899_v56 = vmax.f32 %v1835_v59, %v5178_v28 }
 0x1ba   : > { %v2181_v33 = vld [vmem:[#allocation2 + $0x70] sm:$0xff]  ;;  %v1558_v11 = vld [vmem:[#allocation2 + $0x188] sm:$0xff]  ;;  %1749 = vst.msk [vmem:[#allocation3 + $0xd8] sm:$0xff] %vm226_vm1, %v1717_v24  ;;  %v2340_v23 = vmax.f32 %v2276_v22, %v2308_v57  ;;  %v1837_v24 = vmax.f32 %v5121_v4, %v5178_v28 }
 0x1bb   : > { %v1463_v14 = vld [vmem:[#allocation2 + $0x18e] sm:$0xff]  ;;  %v2213_v45 = vmax.f32 %v2149_v12, %v2181_v33  ;;  %v1590_v13 = vmax.f32 %v1526_v31, %v1558_v11  ;;  %1435 = vst.msk [vmem:[#allocation2 + $0x1d0] sm:$0xff] %vm226_vm1, %v5266_v52  ;;  %v5280_v39 = vmax.f32 %v1340_v62, %v1373_v58  ;;  %1436 = vst.msk [vmem:[#allocation2 + $0x1e8] sm:$0xff] %vm226_vm1, %v5271_v26  ;;  %v5321_v62 = vld [vmem:[#allocation3] sm:$0xff]  ;;  %2808 = vrot.lane.b32.xlu1 %v5266_v52, %s4216_s28 }
 0x1bc   : > { %v1495_v30 = vld [vmem:[#allocation2 + $0x18f] sm:$0xff]  ;;  %v2118_v38 = vld [vmem:[#allocation2 + $0x87] sm:$0xff]  ;;  %2372 = vst.msk [vmem:[#allocation3 + $0x50] sm:$0xff] %vm226_vm1, %v2340_v23  ;;  %v1900_v11 = vmax.f32 %v1836_v47, %v5217_v41 }
 0x1bd   : > { %v1622_v40 = vld [vmem:[#allocation2 + $0x189] sm:$0xff]  ;;  %v1527_v35 = vmax.f32 %v1463_v14, %v1495_v30  ;;  %v2277_v55 = vmax.f32 %v2213_v45, %v2245_v20  ;;  %v1623_v7 = vld [vmem:[#allocation2 + $0x191] sm:$0xff]  ;;  %v2150_v44 = vmax.f32 %v2086_v19, %v2118_v38  ;;  %1437 = vst.msk [vmem:[#allocation2 + $0x1f0] sm:$0xff] %vm226_vm1, %v5280_v39  ;;  %v5299_v30 = vmax.f32 %v1962_v0, %v5274_v46 }
 0x1be   : > { %v1559_v49 = vld [vmem:[#allocation2 + $0x190] sm:$0xff]  ;;  %v1654_v16 = vmax.f32 %v1590_v13, %v1622_v40  ;;  %v2182_v51 = vld [vmem:[#allocation2 + $0x88] sm:$0xff]  ;;  %2806 = vrot.lane.b32.xlu0 %v5249_v18, %s4216_s28  ;;  %v1963_v20 = vmax.f32 %v1899_v56, %v5231_v15  ;;  %v5309_v40 = vmax.f32 %v1837_v24, %v5231_v15 }
 0x1bf   : > { %v1686_v32 = vld [vmem:[#allocation2 + $0x18a] sm:$0xff]  ;;  %v1591_v3 = vmax.f32 %v1527_v35, %v1559_v49  ;;  %v2341_v34 = vmax.f32 %v2277_v55, %v2309_v27  ;;  %v2214_v2 = vmax.f32 %v2150_v44, %v2182_v51  ;;  %2058 = vst.msk [vmem:[#allocation2 + $0xc8] sm:$0xff] %vm226_vm1, %v5299_v30  ;;  %v1689_v19 = vld [vmem:[#allocation2 + $0x1b2] sm:$0xff]  ;;  %v1964_v55 = vmax.f32 %v1900_v11, %v5274_v46 }
 0x1c0   : > { %v1464_v6 = vld [vmem:[#allocation2 + $0x1a6] sm:$0xff]  ;;  %v1718_v61 = vmax.f32 %v1654_v16, %v1686_v32  ;;  %v1465_v25 = vld [vmem:[#allocation2 + $0x1ae] sm:$0xff]  ;;  %2812 = vrot.lane.b32.xlu1 %v5280_v39, %s4216_s28 }
 0x1c1   : > { %v1655_v10 = vmax.f32 %v1591_v3, %v1623_v7  ;;  %v1496_v53 = vld [vmem:[#allocation2 + $0x1a7] sm:$0xff]  ;;  %2373 = vst.msk [vmem:[#allocation3 + $0x58] sm:$0xff] %vm226_vm1, %v2341_v34  ;;  %v1497_v29 = vld [vmem:[#allocation2 + $0x1af] sm:$0xff] }
 0x1c2   : > { %v2246_v21 = vld [vmem:[#allocation2 + $0x89] sm:$0xff]  ;;  %v1528_v8 = vmax.f32 %v1464_v6, %v1496_v53  ;;  %1750 = vst.msk [vmem:[#allocation3 + $0xe0] sm:$0xff] %vm226_vm1, %v1718_v61  ;;  %v1529_v14 = vmax.f32 %v1465_v25, %v1497_v29  ;;  %v1625_v4 = vld [vmem:[#allocation2 + $0x1b1] sm:$0xff]  ;;  %2810 = vrot.lane.b32.xlu0 %v5271_v26, %s4216_s28 }
 0x1c3   : > { %v1560_v37 = vld [vmem:[#allocation2 + $0x1a8] sm:$0xff]  ;;  %v1719_v57 = vmax.f32 %v1655_v10, %v1687_v9  ;;  %v1561_v17 = vld [vmem:[#allocation2 + $0x1b0] sm:$0xff]  ;;  %v2278_v36 = vmax.f32 %v2214_v2, %v2246_v21  ;;  %v1838_v9 = vmax.f32 %v5162_v5, %v5217_v41  ;;  %v5341_v25 = vld [vmem:[#allocation3 + $0x18] sm:$0xff] }
 0x1c4   : > { %v1624_v12 = vld [vmem:[#allocation2 + $0x1a9] sm:$0xff]  ;;  %v1592_v31 = vmax.f32 %v1528_v8, %v1560_v37  ;;  %v1593_v1 = vmax.f32 %v1529_v14, %v1561_v17  ;;  %v2247_v10 = vld [vmem:[#allocation2 + $0x91] sm:$0xff]  ;;  %v1839_v8 = vmax.f32 %v5178_v28, %v5231_v15 }
 0x1c5   : > { %v2087_v63 = vld [vmem:[#allocation2 + $0x8e] sm:$0xff]  ;;  %v1466_v22 = vld [vmem:[#allocation2 + $0x1c6] sm:$0xff]  ;;  %1751 = vst.msk [vmem:[#allocation3 + $0xe8] sm:$0xff] %vm226_vm1, %v1719_v57  ;;  %v1902_v28 = vmax.f32 %v1838_v9, %v5274_v46 }
 0x1c6   : > { %v1498_v33 = vld [vmem:[#allocation2 + $0x1c7] sm:$0xff]  ;;  %v2119_v45 = vld [vmem:[#allocation2 + $0x8f] sm:$0xff]  ;;  %v1656_v35 = vmax.f32 %v1592_v31, %v1624_v12  ;;  %v1657_v51 = vmax.f32 %v1593_v1, %v1625_v4  ;;  %2935 = vrot.lane.b32.xlu0 %v5299_v30, %s4217_s29 }
 0x1c7   : > { %v5301_v58 = vld [vmem:[#allocation3 + $0xa8] sm:$0xff]  ;;  %v1530_v43 = vmax.f32 %v1466_v22, %v1498_v33  ;;  %v2151_v18 = vmax.f32 %v2087_v63, %v2119_v45  ;;  %v5313_v13 = vld [vmem:[#allocation3 + $0xb0] sm:$0xff] }
 0x1c8   : > { %v2310_v48 = vld [vmem:[#allocation2 + $0x8a] sm:$0xff]  ;;  %v5316_v38 = vmax.f32 %v1963_v20, %v5301_v58  ;;  %v1965_v3 = vmax.f32 %v5309_v40, %v5301_v58  ;;  %v5333_v59 = vmax.f32 %v1964_v55, %v5313_v13  ;;  %v1721_v12 = vmax.f32 %v1657_v51, %v1689_v19  ;;  %v2311_v24 = vld [vmem:[#allocation2 + $0x92] sm:$0xff] }
 0x1c9   : > { %v1562_v60 = vld [vmem:[#allocation2 + $0x1c8] sm:$0xff]  ;;  %v2342_v23 = vmax.f32 %v2278_v36, %v2310_v48  ;;  %v2183_v27 = vld [vmem:[#allocation2 + $0x90] sm:$0xff]  ;;  %v1903_v22 = vmax.f32 %v1839_v8, %v5301_v58  ;;  %v1966_v39 = vmax.f32 %v1902_v28, %v5313_v13 }
 0x1ca   : > { %v2088_v49 = vld [vmem:[#allocation2 + $0xa6] sm:$0xff]  ;;  %v1594_v54 = vmax.f32 %v1530_v43, %v1562_v60  ;;  %v5323_v16 = vld [vmem:[#allocation3 + $0x10] sm:$0xff]  ;;  %v2215_v34 = vmax.f32 %v2151_v18, %v2183_v27  ;;  %2059 = vst.msk [vmem:[#allocation2 + $0xd0] sm:$0xff] %vm226_vm1, %v5316_v38  ;;  %2060 = vst.msk [vmem:[#allocation2 + $0xe8] sm:$0xff] %vm226_vm1, %v5333_v59  ;;  %2937 = vrot.lane.b32.xlu1 %v5316_v38, %s4217_s29  ;;  %2939 = vrot.lane.b32.xlu0 %v5333_v59, %s4217_s29 }
 0x1cb   : > { %v1688_v42 = vld [vmem:[#allocation2 + $0x1aa] sm:$0xff]  ;;  %2374 = vst.msk [vmem:[#allocation3 + $0x60] sm:$0xff] %vm226_vm1, %v2342_v23  ;;  %1753 = vst.msk [vmem:[#allocation3 + $0xf8] sm:$0xff] %vm226_vm1, %v1721_v12  ;;  %v5351_v43 = vld [vmem:[#allocation3 + $0xb8] sm:$0xff]  ;;  %v2462_v48 = vmax.f32 %v5321_v62, %v5323_v16  ;;  %v1840_v62 = vmax.f32 %v5217_v41, %v5274_v46 }
 0x1cc   : > { %v2120_v32 = vld [vmem:[#allocation2 + $0xa7] sm:$0xff]  ;;  %v1720_v50 = vmax.f32 %v1656_v35, %v1688_v42  ;;  %v1499_v21 = vld [vmem:[#allocation2 + $0x1cf] sm:$0xff]  ;;  %v2279_v29 = vmax.f32 %v2215_v34, %v2247_v10  ;;  %v2029_v40 = vmax.f32 %v1965_v3, %v5351_v43  ;;  %v1967_v35 = vmax.f32 %v1903_v22, %v5351_v43 }
 0x1cd   : > { %v1626_v7 = vld [vmem:[#allocation2 + $0x1c9] sm:$0xff]  ;;  %v2152_v6 = vmax.f32 %v2088_v49, %v2120_v32  ;;  %v1627_v5 = vld [vmem:[#allocation2 + $0x1d1] sm:$0xff]  ;;  %v5398_v22 = vld [vmem:[#allocation3 + $0x40] sm:$0xff] }
 0x1ce   : > { %v1467_v44 = vld [vmem:[#allocation2 + $0x1ce] sm:$0xff]  ;;  %v1658_v53 = vmax.f32 %v1594_v54, %v1626_v7  ;;  %1752 = vst.msk [vmem:[#allocation3 + $0xf0] sm:$0xff] %vm226_vm1, %v1720_v50  ;;  %v2343_v14 = vmax.f32 %v2279_v29, %v2311_v24  ;;  %v5362_v54 = vld [vmem:[#allocation3 + $0xc0] sm:$0xff]  ;;  %2061 = vst.msk [vmem:[#allocation2 + $0xf0] sm:$0xff] %vm226_vm1, %v2029_v40  ;;  %v1841_v7 = vmax.f32 %v5231_v15, %v5301_v58  ;;  %2941 = vrot.lane.b32.xlu1 %v2029_v40, %s4217_s29 }
 0x1cf   : > { %v2184_v52 = vld [vmem:[#allocation2 + $0xa8] sm:$0xff]  ;;  %v1531_v57 = vmax.f32 %v1467_v44, %v1499_v21  ;;  %v1563_v47 = vld [vmem:[#allocation2 + $0x1d0] sm:$0xff]  ;;  %v2030_v55 = vmax.f32 %v1966_v39, %v5362_v54 }
 0x1d0   : > { %v2248_v61 = vld [vmem:[#allocation2 + $0xa9] sm:$0xff]  ;;  %v2216_v17 = vmax.f32 %v2152_v6, %v2184_v52  ;;  %v1629_v45 = vld [vmem:[#allocation2 + $0x1f1] sm:$0xff]  ;;  %2375 = vst.msk [vmem:[#allocation3 + $0x68] sm:$0xff] %vm226_vm1, %v2343_v14  ;;  %v1905_v38 = vmax.f32 %v1841_v7, %v5351_v43 }
 0x1d1   : > { %v5339_v37 = vld [vmem:[#allocation3 + $0x8] sm:$0xff]  ;;  %v1565_v33 = vld [vmem:[#allocation2 + $0x1f0] sm:$0xff]  ;;  %v1595_v31 = vmax.f32 %v1531_v57, %v1563_v47  ;;  %2062 = vst.msk [vmem:[#allocation2 + $0x108] sm:$0xff] %vm226_vm1, %v2030_v55  ;;  %2943 = vrot.lane.b32.xlu0 %v2030_v55, %s4217_s29 }
 0x1d2   : > { %v1690_v26 = vld [vmem:[#allocation2 + $0x1ca] sm:$0xff]  ;;  %v2280_v36 = vmax.f32 %v2216_v17, %v2248_v61  ;;  %v1691_v23 = vld [vmem:[#allocation2 + $0x1d2] sm:$0xff]  ;;  %v2463_v30 = vmax.f32 %v5339_v37, %v5341_v25  ;;  %v1904_v61 = vmax.f32 %v1840_v62, %v5313_v13 }
 0x1d3   : > { %v1469_v0 = vld [vmem:[#allocation2 + $0x1ee] sm:$0xff]  ;;  %v1722_v56 = vmax.f32 %v1658_v53, %v1690_v26  ;;  %v1659_v1 = vmax.f32 %v1595_v31, %v1627_v5  ;;  %v2090_v42 = vld [vmem:[#allocation2 + $0xc6] sm:$0xff] }
 0x1d4   : > { %v1501_v2 = vld [vmem:[#allocation2 + $0x1ef] sm:$0xff]  ;;  %v2122_v32 = vld [vmem:[#allocation2 + $0xc7] sm:$0xff] }
 0x1d5   : > { %v1533_v63 = vmax.f32 %v1469_v0, %v1501_v2  ;;  %v2089_v4 = vld [vmem:[#allocation2 + $0xae] sm:$0xff]  ;;  %1754 = vst.msk [vmem:[#allocation3 + $0x100] sm:$0xff] %vm226_vm1, %v1722_v56  ;;  %v1723_v44 = vmax.f32 %v1659_v1, %v1691_v23  ;;  %v2154_v10 = vmax.f32 %v2090_v42, %v2122_v32  ;;  %v5385_v0 = vld [vmem:[#allocation3 + $0x20] sm:$0xff]  ;;  %v1968_v56 = vmax.f32 %v1904_v61, %v5362_v54 }
 0x1d6   : > { %v2312_v11 = vld [vmem:[#allocation2 + $0xaa] sm:$0xff]  ;;  %v1693_v50 = vld [vmem:[#allocation2 + $0x1f2] sm:$0xff]  ;;  %v2526_v29 = vmax.f32 %v2462_v48, %v5385_v0  ;;  %v2464_v47 = vmax.f32 %v5323_v16, %v5385_v0  ;;  %v1842_v23 = vmax.f32 %v5274_v46, %v5313_v13 }
 0x1d7   : > { %v1597_v20 = vmax.f32 %v1533_v63, %v1565_v33  ;;  %v2121_v60 = vld [vmem:[#allocation2 + $0xaf] sm:$0xff]  ;;  %v2344_v18 = vmax.f32 %v2280_v36, %v2312_v11  ;;  %1755 = vst.msk [vmem:[#allocation3 + $0x108] sm:$0xff] %vm226_vm1, %v1723_v44  ;;  %v2092_v14 = vld [vmem:[#allocation2 + $0xe6] sm:$0xff] }
 0x1d8   : > { %v2153_v49 = vmax.f32 %v2089_v4, %v2121_v60  ;;  %v2185_v27 = vld [vmem:[#allocation2 + $0xb0] sm:$0xff]  ;;  %v5368_v3 = vld [vmem:[#allocation3 + $0xc8] sm:$0xff]  ;;  %v5405_v4 = vld [vmem:[#allocation3 + $0x38] sm:$0xff] }
 0x1d9   : > { %v1661_v19 = vmax.f32 %v1597_v20, %v1629_v45  ;;  %2376 = vst.msk [vmem:[#allocation3 + $0x70] sm:$0xff] %vm226_vm1, %v2344_v18  ;;  %v2249_v34 = vld [vmem:[#allocation2 + $0xb1] sm:$0xff]  ;;  %v2031_v6 = vmax.f32 %v1967_v35, %v5368_v3  ;;  %v2186_v41 = vld [vmem:[#allocation2 + $0xc8] sm:$0xff]  ;;  %v1969_v63 = vmax.f32 %v1905_v38, %v5368_v3 }
 0x1da   : > { %v2217_v51 = vmax.f32 %v2153_v49, %v2185_v27  ;;  %v2091_v53 = vld [vmem:[#allocation2 + $0xce] sm:$0xff]  ;;  %v2218_v37 = vmax.f32 %v2154_v10, %v2186_v41  ;;  %v5408_v20 = vld [vmem:[#allocation3 + $0xd8] sm:$0xff]  ;;  %v1843_v27 = vmax.f32 %v5301_v58, %v5351_v43  ;;  %v2094_v10 = vld [vmem:[#allocation2 + $0x106] sm:$0xff] }
 0x1db   : > { %v1725_v21 = vmax.f32 %v1661_v19, %v1693_v50  ;;  %v2250_v52 = vld [vmem:[#allocation2 + $0xc9] sm:$0xff]  ;;  %v2313_v8 = vld [vmem:[#allocation2 + $0xb2] sm:$0xff]  ;;  %2063 = vst.msk [vmem:[#allocation2 + $0x110] sm:$0xff] %vm226_vm1, %v2031_v6  ;;  %2945 = vrot.lane.b32.xlu1 %v2031_v6, %s4217_s29 }
 0x1dc   : > { %v2123_v15 = vld [vmem:[#allocation2 + $0xcf] sm:$0xff]  ;;  %v2281_v9 = vmax.f32 %v2217_v51, %v2249_v34  ;;  %v2282_v24 = vmax.f32 %v2218_v37, %v2250_v52  ;;  %v2124_v48 = vld [vmem:[#allocation2 + $0xe7] sm:$0xff]  ;;  %v1906_v34 = vmax.f32 %v1842_v23, %v5362_v54 }
 0x1dd   : > { %v2155_v26 = vmax.f32 %v2091_v53, %v2123_v15  ;;  %v5387_v59 = vld [vmem:[#allocation3 + $0x30] sm:$0xff]  ;;  %1757 = vst.msk [vmem:[#allocation3 + $0x118] sm:$0xff] %vm226_vm1, %v1725_v21  ;;  %v5391_v17 = vld [vmem:[#allocation3 + $0x28] sm:$0xff]  ;;  %v2156_v35 = vmax.f32 %v2092_v14, %v2124_v48  ;;  %v1907_v53 = vmax.f32 %v1843_v27, %v5368_v3  ;;  %v5439_v15 = vld [vmem:[#allocation3 + $0xe0] sm:$0xff] }
 0x1de   : > { %v2314_v2 = vld [vmem:[#allocation2 + $0xca] sm:$0xff]  ;;  %v2345_v5 = vmax.f32 %v2281_v9, %v2313_v8  ;;  %v2527_v33 = vmax.f32 %v2463_v30, %v5391_v17  ;;  %v2590_v36 = vmax.f32 %v2526_v29, %v5387_v59  ;;  %v2465_v45 = vmax.f32 %v5341_v25, %v5391_v17  ;;  %v2315_v60 = vld [vmem:[#allocation2 + $0xd2] sm:$0xff] }
 0x1df   : > { %v2187_v57 = vld [vmem:[#allocation2 + $0xd0] sm:$0xff]  ;;  %v2346_v11 = vmax.f32 %v2282_v24, %v2314_v2  ;;  %v5413_v39 = vld [vmem:[#allocation3 + $0x48] sm:$0xff]  ;;  %v5420_v25 = vmax.f32 %v1969_v63, %v5408_v20  ;;  %v2528_v19 = vmax.f32 %v2464_v47, %v5387_v59  ;;  %v2466_v29 = vmax.f32 %v5385_v0, %v5387_v59  ;;  %v2751_v24 = vpop.permute.xlu0 %2750 }
 0x1e0   : > { %v2251_v12 = vld [vmem:[#allocation2 + $0xd1] sm:$0xff]  ;;  %v2219_v28 = vmax.f32 %v2155_v26, %v2187_v57  ;;  %2377 = vst.msk [vmem:[#allocation3 + $0x78] sm:$0xff] %vm226_vm1, %v2345_v5  ;;  %v2654_v18 = vmax.f32 %v2590_v36, %v5398_v22  ;;  %v2188_v49 = vld [vmem:[#allocation2 + $0xe8] sm:$0xff]  ;;  %v2591_v46 = vmax.f32 %v2527_v33, %v5405_v4  ;;  %v5433_v51 = vmax.f32 %v2465_v45, %v5405_v4 }
 0x1e1   : > { %v5401_v31 = vld [vmem:[#allocation3 + $0xd0] sm:$0xff]  ;;  %2378 = vst.msk [vmem:[#allocation3 + $0x80] sm:$0xff] %vm226_vm1, %v2346_v11  ;;  %v2220_v32 = vmax.f32 %v2156_v35, %v2188_v49  ;;  %2065 = vst.msk [vmem:[#allocation2 + $0x130] sm:$0xff] %vm226_vm1, %v5420_v25  ;;  %v2592_v58 = vmax.f32 %v2528_v19, %v5398_v22  ;;  %v2126_v6 = vld [vmem:[#allocation2 + $0x107] sm:$0xff]  ;;  %v1971_v26 = vmax.f32 %v1907_v53, %v5408_v20 }
 0x1e2   : > { %v2032_v16 = vmax.f32 %v1968_v56, %v5401_v31  ;;  %v2283_v40 = vmax.f32 %v2219_v28, %v2251_v12  ;;  %v2093_v1 = vld [vmem:[#allocation2 + $0xee] sm:$0xff]  ;;  %3072 = vrot.lane.b32.xlu0 %v2654_v18, %s4218_s30  ;;  %v2655_v21 = vmax.f32 %v2591_v46, %v5413_v39  ;;  %v2158_v61 = vmax.f32 %v2094_v10, %v2126_v6  ;;  %v5492_v53 = vld [vmem:[#allocation3 + $0x60] sm:$0xff] }
 0x1e3   : > { %v2252_v42 = vld [vmem:[#allocation2 + $0xe9] sm:$0xff]  ;;  %v2253_v44 = vld [vmem:[#allocation2 + $0xf1] sm:$0xff]  ;;  %v2593_v8 = vmax.f32 %v5433_v51, %v5413_v39  ;;  %v1970_v37 = vmax.f32 %v1906_v34, %v5401_v31  ;;  %2847 = vst.msk [vmem:[#allocation4] sm:$0xff] %vm2846_vm3, %v2751_v24  ;;  %v5461_v48 = vmax.f32 %v2466_v29, %v5398_v22  ;;  %v2467_v45 = vmax.f32 %v5391_v17, %v5405_v4 }
 0x1e4   : > { %2064 = vst.msk [vmem:[#allocation2 + $0x128] sm:$0xff] %vm226_vm1, %v2032_v16  ;;  %v2125_v30 = vld [vmem:[#allocation2 + $0xef] sm:$0xff]  ;;  %v2347_v55 = vmax.f32 %v2283_v40, %v2315_v60  ;;  %v2284_v41 = vmax.f32 %v2220_v32, %v2252_v42  ;;  %3074 = vrot.lane.b32.xlu1 %v2655_v21, %s4218_s30  ;;  %v2755_v60 = vpop.permute.xlu1 %2754  ;;  %v1845_v19 = vmax.f32 %v5351_v43, %v5368_v3 }
 0x1e5   : > { %v2157_v62 = vmax.f32 %v2093_v1, %v2125_v30  ;;  %v2189_v7 = vld [vmem:[#allocation2 + $0xf0] sm:$0xff]  ;;  %v2190_v38 = vld [vmem:[#allocation2 + $0x108] sm:$0xff]  ;;  %v5454_v14 = vmax.f32 %v1970_v37, %v5439_v15  ;;  %v1844_v1 = vmax.f32 %v5313_v13, %v5362_v54  ;;  %2849 = vst.msk [vmem:[#allocation4 + $0x10] sm:$0xff] %vm2846_vm3, %v2755_v60  ;;  %v2531_v46 = vmax.f32 %v2467_v45, %v5413_v39 }
 0x1e6   : > { %v2316_v50 = vld [vmem:[#allocation2 + $0xea] sm:$0xff]  ;;  %2379 = vst.msk [vmem:[#allocation3 + $0x88] sm:$0xff] %vm226_vm1, %v2347_v55  ;;  %v2222_v5 = vmax.f32 %v2158_v61, %v2190_v38  ;;  %2947 = vrot.lane.b32.xlu0 %v2032_v16, %s4217_s29  ;;  %v2317_v33 = vld [vmem:[#allocation2 + $0xf2] sm:$0xff]  ;;  %v2753_v55 = vpop.permute.xlu0 %2752  ;;  %v1909_v51 = vmax.f32 %v1845_v19, %v5408_v20  ;;  %v2468_v37 = vmax.f32 %v5387_v59, %v5398_v22 }
 0x1e7   : > { %v2221_v52 = vmax.f32 %v2157_v62, %v2189_v7  ;;  %v2254_v9 = vld [vmem:[#allocation2 + $0x109] sm:$0xff]  ;;  %v2348_v56 = vmax.f32 %v2284_v41, %v2316_v50  ;;  %v5466_v16 = vld [vmem:[#allocation3 + $0x58] sm:$0xff]  ;;  %2066 = vst.msk [vmem:[#allocation2 + $0x148] sm:$0xff] %vm226_vm1, %v5454_v14  ;;  %v1908_v32 = vmax.f32 %v1844_v1, %v5401_v31  ;;  %v1847_v59 = vmax.f32 %v5368_v3, %v5408_v20 }
 0x1e8   : > { %v5445_v2 = vld [vmem:[#allocation3 + $0xe8] sm:$0xff]  ;;  %v5450_v47 = vld [vmem:[#allocation3 + $0x50] sm:$0xff]  ;;  %v2286_v40 = vmax.f32 %v2222_v5, %v2254_v9  ;;  %2949 = vrot.lane.b32.xlu1 %v5420_v25, %s4217_s29  ;;  %2848 = vst.msk [vmem:[#allocation4 + $0x8] sm:$0xff] %vm2846_vm3, %v2753_v55  ;;  %v2757_v21 = vpop.permute.xlu1 %2756  ;;  %v2595_v29 = vmax.f32 %v2531_v46, %v5466_v16 }
 0x1e9   : > { %v2095_v57 = vld [vmem:[#allocation2 + $0x10e] sm:$0xff]  ;;  %v2285_v63 = vmax.f32 %v2221_v52, %v2253_v44  ;;  %v5458_v36 = vmax.f32 %v1971_v26, %v5445_v2  ;;  %2380 = vst.msk [vmem:[#allocation3 + $0x90] sm:$0xff] %vm226_vm1, %v2348_v56  ;;  %v2656_v49 = vmax.f32 %v2592_v58, %v5450_v47  ;;  %v2657_v44 = vmax.f32 %v2593_v8, %v5466_v16  ;;  %v5495_v52 = vld [vmem:[#allocation3 + $0xf8] sm:$0xff] }
 0x1ea   : > { %v2127_v12 = vld [vmem:[#allocation2 + $0x10f] sm:$0xff]  ;;  %v2594_v6 = vmax.f32 %v5461_v48, %v5450_v47  ;;  %v1972_v41 = vmax.f32 %v1908_v32, %v5439_v15  ;;  %2850 = vst.msk [vmem:[#allocation4 + $0x18] sm:$0xff] %vm2846_vm3, %v2757_v21  ;;  %v1973_v9 = vmax.f32 %v1909_v51, %v5445_v2  ;;  %v1846_v26 = vmax.f32 %v5362_v54, %v5401_v31  ;;  %v2759_v24 = vpop.permute.xlu0 %2758 }
 0x1eb   : > { %v2159_v28 = vmax.f32 %v2095_v57, %v2127_v12  ;;  %v2191_v0 = vld [vmem:[#allocation2 + $0x110] sm:$0xff]  ;;  %v2349_v11 = vmax.f32 %v2285_v63, %v2317_v33  ;;  %v2096_v23 = vld [vmem:[#allocation2 + $0x126] sm:$0xff]  ;;  %2067 = vst.msk [vmem:[#allocation2 + $0x150] sm:$0xff] %vm226_vm1, %v5458_v36  ;;  %3076 = vrot.lane.b32.xlu0 %v2656_v49, %s4218_s30 }
 0x1ec   : > { %v2128_v18 = vld [vmem:[#allocation2 + $0x127] sm:$0xff]  ;;  %v2255_v17 = vld [vmem:[#allocation2 + $0x111] sm:$0xff]  ;;  %3078 = vrot.lane.b32.xlu1 %v2657_v44, %s4218_s30  ;;  %v2658_v54 = vmax.f32 %v2594_v6, %v5492_v53  ;;  %2851 = vst.msk [vmem:[#allocation4 + $0x20] sm:$0xff] %vm2846_vm3, %v2759_v24  ;;  %v2761_v60 = vpop.permute.xlu1 %2760  ;;  %v1849_v44 = vmax.f32 %v5408_v20, %v5445_v2 }
 0x1ed   : > { %v2223_v35 = vmax.f32 %v2159_v28, %v2191_v0  ;;  %v2318_v42 = vld [vmem:[#allocation2 + $0x10a] sm:$0xff]  ;;  %v2160_v30 = vmax.f32 %v2096_v23, %v2128_v18  ;;  %2381 = vst.msk [vmem:[#allocation3 + $0x98] sm:$0xff] %vm226_vm1, %v2349_v11  ;;  %v2319_v43 = vld [vmem:[#allocation2 + $0x112] sm:$0xff]  ;;  %v5518_v0 = vmax.f32 %v1973_v9, %v5495_v52  ;;  %v1910_v11 = vmax.f32 %v1846_v26, %v5439_v15  ;;  %v3948_v26 = vld [vmem:[%s6070_s3] sm:$0xff]  }
 0x1ee   : > { %v2350_v13 = vmax.f32 %v2286_v40, %v2318_v42  ;;  %v2192_v62 = vld [vmem:[#allocation2 + $0x128] sm:$0xff]  ;;  %v5486_v58 = vld [vmem:[#allocation3 + $0xf0] sm:$0xff]  ;;  %v5521_v40 = vld [vmem:[#allocation3 + $0x100] sm:$0xff]  ;;  %v1911_v23 = vmax.f32 %v1847_v59, %v5445_v2  ;;  %2852 = vst.msk [vmem:[#allocation4 + $0x28] sm:$0xff] %vm2846_vm3, %v2761_v60  ;;  %3885 = vmatprep.subr.bf16.mxu1 %v3948_v26 }
 0x1ef   : > { %v2287_v27 = vmax.f32 %v2223_v35, %v2255_v17  ;;  %v2256_v7 = vld [vmem:[#allocation2 + $0x129] sm:$0xff]  ;;  %v2224_v25 = vmax.f32 %v2160_v30, %v2192_v62  ;;  %v5509_v63 = vmax.f32 %v1972_v41, %v5486_v58  ;;  %2951 = vrot.lane.b32.xlu0 %v5454_v14, %s4217_s29  ;;  %v2257_v48 = vld [vmem:[#allocation2 + $0x131] sm:$0xff]  ;;  %v2469_v14 = vmax.f32 %v5405_v4, %v5413_v39 }
 0x1f0   : > { %v2097_v50 = vld [vmem:[#allocation2 + $0x12e] sm:$0xff]  ;;  %2382 = vst.msk [vmem:[#allocation3 + $0xa0] sm:$0xff] %vm226_vm1, %v2350_v13  ;;  %v1468_v57 = vld [vmem:[#allocation2 + $0x1e6] sm:$0xff]  ;;  %2069 = vst.msk [vmem:[#allocation2 + $0x170] sm:$0xff] %vm226_vm1, %v5518_v0  ;;  %v5535_v17 = vmax.f32 %v2468_v37, %v5450_v47  ;;  %v1974_v4 = vmax.f32 %v1910_v11, %v5486_v58  ;;  %2953 = vrot.lane.b32.xlu1 %v5458_v36, %s4217_s29  ;;  %v1975_v62 = vmax.f32 %v1911_v23, %v5495_v52 }
 0x1f1   : > { %v2129_v34 = vld [vmem:[#allocation2 + $0x12f] sm:$0xff]  ;;  %v2351_v10 = vmax.f32 %v2287_v27, %v2319_v43  ;;  %v2288_v38 = vmax.f32 %v2224_v25, %v2256_v7  ;;  %v1500_v12 = vld [vmem:[#allocation2 + $0x1e7] sm:$0xff]  ;;  %2068 = vst.msk [vmem:[#allocation2 + $0x168] sm:$0xff] %vm226_vm1, %v5509_v63  ;;  %v1848_v36 = vmax.f32 %v5401_v31, %v5439_v15  ;;  %v1913_v41 = vmax.f32 %v1849_v44, %v5495_v52  ;;  %v5575_v59 = vld [vmem:[#allocation3 + $0x78] sm:$0xff] }
 0x1f2   : > { %v2161_v61 = vmax.f32 %v2097_v50, %v2129_v34  ;;  %v2193_v8 = vld [vmem:[#allocation2 + $0x130] sm:$0xff]  ;;  %v5506_v56 = vld [vmem:[#allocation3 + $0x68] sm:$0xff]  ;;  %v1532_v49 = vmax.f32 %v1468_v57, %v1500_v12  ;;  %v5546_v43 = vmax.f32 %v1974_v4, %v5521_v40  ;;  %v2533_v34 = vmax.f32 %v2469_v14, %v5466_v16  ;;  %3886 = vmatpush3.bf16.msra.mxu1 %v3948_v26 }
 0x1f3   : > { %2383 = vst.msk [vmem:[#allocation3 + $0xa8] sm:$0xff] %vm226_vm1, %v2351_v10  ;;  %v2320_v5 = vld [vmem:[#allocation2 + $0x12a] sm:$0xff]  ;;  %v2321_v45 = vld [vmem:[#allocation2 + $0x132] sm:$0xff]  ;;  %v2659_v42 = vmax.f32 %v2595_v29, %v5506_v56  ;;  %3080 = vrot.lane.b32.xlu0 %v2658_v54, %s4218_s30  ;;  %v2765_v10 = vpop.permute.xlu1 %2764  ;;  %v1851_v37 = vmax.f32 %v5445_v2, %v5495_v52  ;;  %v2763_v2 = vpop.permute.xlu0 %2762  ;;  %v1850_v23 = vmax.f32 %v5439_v15, %v5486_v58 }
 0x1f4   : > { %v2225_v28 = vmax.f32 %v2161_v61, %v2193_v8  ;;  %v2352_v33 = vmax.f32 %v2288_v38, %v2320_v5  ;;  %v2098_v35 = vld [vmem:[#allocation2 + $0x146] sm:$0xff]  ;;  %v2099_v19 = vld [vmem:[#allocation2 + $0x14e] sm:$0xff]  ;;  %v2596_v61 = vmax.f32 %v5535_v17, %v5492_v53  ;;  %2070 = vst.msk [vmem:[#allocation2 + $0x188] sm:$0xff] %vm226_vm1, %v5546_v43  ;;  %v2009_v8 = vld [vmem:[#allocation3 + $0x118] sm:$0xff]  ;;  %v2597_v12 = vmax.f32 %v2533_v34, %v5506_v56 }
 0x1f5   : > { %v2130_v1 = vld [vmem:[#allocation2 + $0x147] sm:$0xff]  ;;  %v2131_v7 = vld [vmem:[#allocation2 + $0x14f] sm:$0xff]  ;;  %2854 = vst.msk [vmem:[#allocation4 + $0x38] sm:$0xff] %vm2846_vm3, %v2765_v10  ;;  %3082 = vrot.lane.b32.xlu1 %v2659_v42, %s4218_s30  ;;  %2853 = vst.msk [vmem:[#allocation4 + $0x30] sm:$0xff] %vm2846_vm3, %v2763_v2  ;;  %v1914_v44 = vmax.f32 %v1850_v23, %v5521_v40  ;;  %v1852_v34 = vmax.f32 %v5486_v58, %v5521_v40 }
 0x1f6   : > { %v2289_v3 = vmax.f32 %v2225_v28, %v2257_v48  ;;  %v5528_v18 = vld [vmem:[#allocation3 + $0x108] sm:$0xff]  ;;  %2384 = vst.msk [vmem:[#allocation3 + $0xb0] sm:$0xff] %vm226_vm1, %v2352_v33  ;;  %v2162_v30 = vmax.f32 %v2098_v35, %v2130_v1  ;;  %v2163_v51 = vmax.f32 %v2099_v19, %v2131_v7  ;;  %v2195_v21 = vld [vmem:[#allocation2 + $0x150] sm:$0xff]  ;;  %v5578_v48 = vmax.f32 %v1848_v36, %v5486_v58  ;;  %v5610_v10 = vld [vmem:[#allocation3 + $0x138] sm:$0xff] }
 0x1f7   : > { %v1564_v13 = vld [vmem:[#allocation2 + $0x1e8] sm:$0xff]  ;;  %v5553_v6 = vmax.f32 %v1975_v62, %v5528_v18  ;;  %v5567_v57 = vld [vmem:[#allocation3 + $0x70] sm:$0xff]  ;;  %v1977_v28 = vmax.f32 %v1913_v41, %v5528_v18  ;;  %2955 = vrot.lane.b32.xlu0 %v5509_v63, %s4217_s29  ;;  %v2769_v35 = vpop.permute.xlu1 %2768 }
 0x1f8   : > { %v1628_v27 = vld [vmem:[#allocation2 + $0x1e9] sm:$0xff]  ;;  %v2353_v55 = vmax.f32 %v2289_v3, %v2321_v45  ;;  %v1596_v50 = vmax.f32 %v1532_v49, %v1564_v13  ;;  %v2227_v31 = vmax.f32 %v2163_v51, %v2195_v21  ;;  %v2259_v5 = vld [vmem:[#allocation2 + $0x151] sm:$0xff]  ;;  %v1915_v3 = vmax.f32 %v1851_v37, %v5528_v18  ;;  %2856 = vst.msk [vmem:[#allocation4 + $0x48] sm:$0xff] %vm2846_vm3, %v2769_v35 }
 0x1f9   : > { %v2194_v46 = vld [vmem:[#allocation2 + $0x148] sm:$0xff]  ;;  %2071 = vst.msk [vmem:[#allocation2 + $0x190] sm:$0xff] %vm226_vm1, %v5553_v6  ;;  %v2323_v60 = vld [vmem:[#allocation2 + $0x152] sm:$0xff]  ;;  %v5583_v63 = vmax.f32 %v1977_v28, %v2009_v8  ;;  %v2660_v42 = vmax.f32 %v2596_v61, %v5567_v57  ;;  %2957 = vrot.lane.b32.xlu1 %v5518_v0, %s4217_s29  ;;  %v1976_v62 = vmax.f32 %v5578_v48, %v5521_v40 }
 0x1fa   : > { %v2258_v32 = vld [vmem:[#allocation2 + $0x149] sm:$0xff]  ;;  %v2226_v25 = vmax.f32 %v2162_v30, %v2194_v46  ;;  %2385 = vst.msk [vmem:[#allocation3 + $0xb8] sm:$0xff] %vm226_vm1, %v2353_v55  ;;  %v1660_v20 = vmax.f32 %v1596_v50, %v1628_v27  ;;  %v2291_v33 = vmax.f32 %v2227_v31, %v2259_v5  ;;  %v1979_v13 = vmax.f32 %v1915_v3, %v2009_v8 }
 0x1fb   : > { %v1692_v9 = vld [vmem:[#allocation2 + $0x1ea] sm:$0xff]  ;;  %v1853_v27 = vmax.f32 %v5495_v52, %v5528_v18  ;;  %2073 = vst.msk [vmem:[#allocation2 + $0x1b0] sm:$0xff] %vm226_vm1, %v5583_v63  ;;  %3084 = vrot.lane.b32.xlu0 %v2660_v42, %s4218_s30  ;;  %v2661_v46 = vmax.f32 %v2597_v12, %v5575_v59  ;;  %v2773_v36 = vpop.permute.xlu1 %2772  ;;  %v2325_v12 = vld [vmem:[#allocation2 + $0x172] sm:$0xff] }
 0x1fc   : > { %v2290_v38 = vmax.f32 %v2226_v25, %v2258_v32  ;;  %v2322_v29 = vld [vmem:[#allocation2 + $0x14a] sm:$0xff]  ;;  %v1724_v24 = vmax.f32 %v1660_v20, %v1692_v9  ;;  %v2355_v17 = vmax.f32 %v2291_v33, %v2323_v60  ;;  %v2767_v32 = vpop.permute.xlu0 %2766  ;;  %2858 = vst.msk [vmem:[#allocation4 + $0x58] sm:$0xff] %vm2846_vm3, %v2773_v36  ;;  %v2470_v60 = vmax.f32 %v5398_v22, %v5450_v47 }
 0x1fd   : > { %v2100_v45 = vld [vmem:[#allocation2 + $0x166] sm:$0xff]  ;;  %v2101_v1 = vld [vmem:[#allocation2 + $0x16e] sm:$0xff]  ;;  %v1917_v0 = vmax.f32 %v1853_v27, %v2009_v8  ;;  %2855 = vst.msk [vmem:[#allocation4 + $0x40] sm:$0xff] %vm2846_vm3, %v2767_v32  ;;  %3086 = vrot.lane.b32.xlu1 %v2661_v46, %s4218_s30  ;;  %v2472_v32 = vmax.f32 %v5450_v47, %v5492_v53 }
 0x1fe   : > { %v2354_v54 = vmax.f32 %v2290_v38, %v2322_v29  ;;  %v2132_v11 = vld [vmem:[#allocation2 + $0x167] sm:$0xff]  ;;  %1756 = vst.msk [vmem:[#allocation3 + $0x110] sm:$0xff] %vm226_vm1, %v1724_v24  ;;  %v2133_v19 = vld [vmem:[#allocation2 + $0x16f] sm:$0xff]  ;;  %2387 = vst.msk [vmem:[#allocation3 + $0xc8] sm:$0xff] %vm226_vm1, %v2355_v17 }
 0x1ff   : > { %v2164_v14 = vmax.f32 %v2100_v45, %v2132_v11  ;;  %v5587_v49 = vld [vmem:[#allocation3 + $0x128] sm:$0xff]  ;;  %v2165_v55 = vmax.f32 %v2101_v1, %v2133_v19  ;;  %v2197_v52 = vld [vmem:[#allocation2 + $0x170] sm:$0xff]  ;;  %2959 = vrot.lane.b32.xlu0 %v5546_v43, %s4217_s29  ;;  %v5619_v29 = vld [vmem:[#allocation3 + $0x120] sm:$0xff]  ;;  %v2777_v45 = vpop.permute.xlu1 %2776 }
 0x200   : > { %2386 = vst.msk [vmem:[#allocation3 + $0xc0] sm:$0xff] %vm226_vm1, %v2354_v54  ;;  %v2196_v4 = vld [vmem:[#allocation2 + $0x168] sm:$0xff]  ;;  %v5604_v18 = vmax.f32 %v1979_v13, %v5587_v49  ;;  %v2261_v20 = vld [vmem:[#allocation2 + $0x171] sm:$0xff]  ;;  %v1981_v38 = vmax.f32 %v1917_v0, %v5587_v49  ;;  %v2771_v26 = vpop.permute.xlu0 %2770 }
 0x201   : > { %v2260_v30 = vld [vmem:[#allocation2 + $0x169] sm:$0xff]  ;;  %v2228_v15 = vmax.f32 %v2164_v14, %v2196_v4  ;;  %v2229_v50 = vmax.f32 %v2165_v55, %v2197_v52  ;;  %2857 = vst.msk [vmem:[#allocation4 + $0x50] sm:$0xff] %vm2846_vm3, %v2771_v26  ;;  %2860 = vst.msk [vmem:[#allocation4 + $0x68] sm:$0xff] %vm2846_vm3, %v2777_v45  ;;  %2961 = vrot.lane.b32.xlu1 %v5553_v6, %s4217_s29  ;;  %v2263_v23 = vld [vmem:[#allocation2 + $0x191] sm:$0xff]  ;;  %v2534_v4 = vmax.f32 %v2470_v60, %v5492_v53 }
 0x202   : > { %v2102_v25 = vld [vmem:[#allocation2 + $0x186] sm:$0xff]  ;;  %v2103_v61 = vld [vmem:[#allocation2 + $0x18e] sm:$0xff]  ;;  %2075 = vst.msk [vmem:[#allocation2 + $0x1d0] sm:$0xff] %vm226_vm1, %v5604_v18  ;;  %v5622_v28 = vmax.f32 %v1981_v38, %v5610_v10  ;;  %v2471_v6 = vmax.f32 %v5413_v39, %v5466_v16 }
 0x203   : > { %v2292_v7 = vmax.f32 %v2228_v15, %v2260_v30  ;;  %v2134_v51 = vld [vmem:[#allocation2 + $0x187] sm:$0xff]  ;;  %v2293_v9 = vmax.f32 %v2229_v50, %v2261_v20  ;;  %v2135_v58 = vld [vmem:[#allocation2 + $0x18f] sm:$0xff]  ;;  %v2781_v13 = vpop.permute.xlu1 %2780  ;;  %v2598_v46 = vmax.f32 %v2534_v4, %v5567_v57  ;;  %v2536_v20 = vmax.f32 %v2472_v32, %v5567_v57 }
 0x204   : > { %v2324_v21 = vld [vmem:[#allocation2 + $0x16a] sm:$0xff]  ;;  %v2166_v41 = vmax.f32 %v2102_v25, %v2134_v51  ;;  %v2167_v24 = vmax.f32 %v2103_v61, %v2135_v58  ;;  %2077 = vst.msk [vmem:[#allocation2 + $0x1f0] sm:$0xff] %vm226_vm1, %v5622_v28  ;;  %v2327_v30 = vld [vmem:[#allocation2 + $0x192] sm:$0xff]  ;;  %v5649_v15 = vld [vmem:[#allocation3 + $0x80] sm:$0xff]  ;;  %v2535_v55 = vmax.f32 %v2471_v6, %v5506_v56  ;;  %v2775_v39 = vpop.permute.xlu0 %2774 }
 0x205   : > { %v2356_v31 = vmax.f32 %v2292_v7, %v2324_v21  ;;  %v2198_v8 = vld [vmem:[#allocation2 + $0x188] sm:$0xff]  ;;  %v2008_v40 = vld [vmem:[#allocation3 + $0x110] sm:$0xff]  ;;  %v2357_v54 = vmax.f32 %v2293_v9, %v2325_v12  ;;  %2862 = vst.msk [vmem:[#allocation4 + $0x78] sm:$0xff] %vm2846_vm3, %v2781_v13  ;;  %2965 = vrot.lane.b32.xlu1 %v5583_v63, %s4217_s29  ;;  %2859 = vst.msk [vmem:[#allocation4 + $0x60] sm:$0xff] %vm2846_vm3, %v2775_v39  ;;  %v2662_v63 = vmax.f32 %v2598_v46, %v5649_v15 }
 0x206   : > { %v2262_v37 = vld [vmem:[#allocation2 + $0x189] sm:$0xff]  ;;  %v2230_v5 = vmax.f32 %v2166_v41, %v2198_v8  ;;  %v2040_v2 = vmax.f32 %v1976_v62, %v2008_v40  ;;  %v1978_v33 = vmax.f32 %v1914_v44, %v2008_v40  ;;  %v1916_v43 = vmax.f32 %v1852_v34, %v2008_v40 }
 0x207   : > { %2388 = vst.msk [vmem:[#allocation3 + $0xd0] sm:$0xff] %vm226_vm1, %v2356_v31  ;;  %v2199_v48 = vld [vmem:[#allocation2 + $0x190] sm:$0xff]  ;;  %2389 = vst.msk [vmem:[#allocation3 + $0xd8] sm:$0xff] %vm226_vm1, %v2357_v54  ;;  %v5660_v62 = vld [vmem:[#allocation3 + $0x88] sm:$0xff]  ;;  %v2473_v7 = vmax.f32 %v5466_v16, %v5506_v56  ;;  %v2599_v50 = vmax.f32 %v2535_v55, %v5575_v59  ;;  %v2474_v41 = vmax.f32 %v5492_v53, %v5567_v57  ;;  %v2785_v60 = vpop.permute.xlu1 %2784 }
 0x208   : > { %v2294_v11 = vmax.f32 %v2230_v5, %v2262_v37  ;;  %v2231_v3 = vmax.f32 %v2167_v24, %v2199_v48  ;;  %v5629_v14 = vld [vmem:[#allocation3 + $0x130] sm:$0xff]  ;;  %2072 = vst.msk [vmem:[#allocation2 + $0x1a8] sm:$0xff] %vm226_vm1, %v2040_v2  ;;  %v2042_v35 = vmax.f32 %v1978_v33, %v5619_v29  ;;  %v1980_v22 = vmax.f32 %v1916_v43, %v5619_v29  ;;  %v2779_v47 = vpop.permute.xlu0 %2778 }
 0x209   : > { %v2326_v1 = vld [vmem:[#allocation2 + $0x18a] sm:$0xff]  ;;  %2963 = vrot.lane.b32.xlu0 %v2040_v2, %s4217_s29  ;;  %2969 = vrot.lane.b32.xlu1 %v5604_v18, %s4217_s29  ;;  %2861 = vst.msk [vmem:[#allocation4 + $0x70] sm:$0xff] %vm2846_vm3, %v2779_v47  ;;  %v2663_v16 = vmax.f32 %v2599_v50, %v5660_v62  ;;  %v2600_v40 = vmax.f32 %v2536_v20, %v5649_v15  ;;  %2864 = vst.msk [vmem:[#allocation4 + $0x88] sm:$0xff] %vm2846_vm3, %v2785_v60 }
 0x20a   : > { %v2358_v42 = vmax.f32 %v2294_v11, %v2326_v1  ;;  %v2295_v17 = vmax.f32 %v2231_v3, %v2263_v23  ;;  %2074 = vst.msk [vmem:[#allocation2 + $0x1c8] sm:$0xff] %vm226_vm1, %v2042_v35  ;;  %v2044_v19 = vmax.f32 %v1980_v22, %v5629_v14  ;;  %v2537_v26 = vmax.f32 %v2473_v7, %v5575_v59  ;;  %v5677_v33 = vld [vmem:[#allocation3 + $0x90] sm:$0xff]  ;;  %v5681_v1 = vld [vmem:[#allocation3 + $0x98] sm:$0xff]  ;;  %v5694_v7 = vld [vmem:[#allocation3 + $0xa0] sm:$0xff] }
 0x20b   : > { %v2538_v12 = vmax.f32 %v2474_v41, %v5649_v15  ;;  %v2201_v11 = vld [vmem:[#allocation2 + $0x1b0] sm:$0xff]  ;;  %v2475_v23 = vmax.f32 %v5506_v56, %v5575_v59  ;;  %v2476_v22 = vmax.f32 %v5567_v57, %v5649_v15  ;;  %v2664_v39 = vmax.f32 %v2600_v40, %v5677_v33 }
 0x20c   : > { %2390 = vst.msk [vmem:[#allocation3 + $0xe0] sm:$0xff] %vm226_vm1, %v2358_v42  ;;  %v2359_v27 = vmax.f32 %v2295_v17, %v2327_v30  ;;  %2076 = vst.msk [vmem:[#allocation2 + $0x1e8] sm:$0xff] %vm226_vm1, %v2044_v19  ;;  %v2783_v45 = vpop.permute.xlu0 %2782  ;;  %v2203_v3 = vld [vmem:[#allocation2 + $0x1d0] sm:$0xff]  ;;  %v2477_v50 = vmax.f32 %v5575_v59, %v5660_v62 }
 0x20d   : > { %2967 = vrot.lane.b32.xlu0 %v2042_v35, %s4217_s29  ;;  %3090 = vrot.lane.b32.xlu1 %v2663_v16, %s4218_s30  ;;  %v2601_v35 = vmax.f32 %v2537_v26, %v5660_v62  ;;  %2863 = vst.msk [vmem:[#allocation4 + $0x80] sm:$0xff] %vm2846_vm3, %v2783_v45  ;;  %v2205_v4 = vld [vmem:[#allocation2 + $0x1f0] sm:$0xff]  ;;  %v2539_v56 = vmax.f32 %v2475_v23, %v5660_v62 }
 0x20e   : > { %2391 = vst.msk [vmem:[#allocation3 + $0xe8] sm:$0xff] %vm226_vm1, %v2359_v27  ;;  %v2267_v13 = vld [vmem:[#allocation2 + $0x1d1] sm:$0xff]  ;;  %v2602_v47 = vmax.f32 %v2538_v12, %v5677_v33  ;;  %v2541_v40 = vmax.f32 %v2477_v50, %v5681_v1  ;;  %v2480_v12 = vmax.f32 %v5677_v33, %v5694_v7 }
 0x20f   : > { %v2104_v52 = vld [vmem:[#allocation2 + $0x1a6] sm:$0xff]  ;;  %v2105_v21 = vld [vmem:[#allocation2 + $0x1ae] sm:$0xff]  ;;  %v2665_v20 = vmax.f32 %v2601_v35, %v5681_v1  ;;  %v2641_v50 = vld [vmem:[#allocation3 + $0xd8] sm:$0xff] }
 0x210   : > { %v2136_v0 = vld [vmem:[#allocation2 + $0x1a7] sm:$0xff]  ;;  %v2137_v37 = vld [vmem:[#allocation2 + $0x1af] sm:$0xff]  ;;  %v2912_v59 = vpop.permute.xlu0 %2911 }
 0x211   : > { %v2168_v44 = vmax.f32 %v2104_v52, %v2136_v0  ;;  %v2200_v25 = vld [vmem:[#allocation2 + $0x1a8] sm:$0xff]  ;;  %3088 = vrot.lane.b32.xlu0 %v2662_v63, %s4218_s30  ;;  %v2169_v2 = vmax.f32 %v2105_v21, %v2137_v37  ;;  %v2269_v63 = vld [vmem:[#allocation2 + $0x1f1] sm:$0xff]  ;;  %2973 = vrot.lane.b32.xlu1 %v5622_v28, %s4217_s29  ;;  %3008 = vst.msk [vmem:[#allocation4] sm:$0xff] %vm3007_vm4, %v2912_v59 }
 0x212   : > { %v2264_v51 = vld [vmem:[#allocation2 + $0x1a9] sm:$0xff]  ;;  %v2603_v37 = vmax.f32 %v2539_v56, %v5681_v1 }
 0x213   : > { %v2106_v36 = vld [vmem:[#allocation2 + $0x1c6] sm:$0xff]  ;;  %v2232_v38 = vmax.f32 %v2168_v44, %v2200_v25  ;;  %v2107_v9 = vld [vmem:[#allocation2 + $0x1ce] sm:$0xff]  ;;  %v2233_v30 = vmax.f32 %v2169_v2, %v2201_v11  ;;  %v2479_v2 = vmax.f32 %v5660_v62, %v5681_v1 }
 0x214   : > { %v2138_v34 = vld [vmem:[#allocation2 + $0x1c7] sm:$0xff]  ;;  %v2139_v58 = vld [vmem:[#allocation2 + $0x1cf] sm:$0xff] }
 0x215   : > { %v2170_v18 = vmax.f32 %v2106_v36, %v2138_v34  ;;  %v2202_v61 = vld [vmem:[#allocation2 + $0x1c8] sm:$0xff]  ;;  %v2296_v5 = vmax.f32 %v2232_v38, %v2264_v51  ;;  %v2171_v54 = vmax.f32 %v2107_v9, %v2139_v58  ;;  %2971 = vrot.lane.b32.xlu0 %v2044_v19, %s4217_s29  ;;  %v2265_v19 = vld [vmem:[#allocation2 + $0x1b1] sm:$0xff]  ;;  %v2540_v36 = vmax.f32 %v2476_v22, %v5677_v33 }
 0x216   : > { %v2266_v31 = vld [vmem:[#allocation2 + $0x1c9] sm:$0xff]  ;;  %v2297_v52 = vmax.f32 %v2233_v30, %v2265_v19  ;;  %v2329_v25 = vld [vmem:[#allocation2 + $0x1b2] sm:$0xff]  ;;  %3094 = vrot.lane.b32.xlu1 %v2665_v20, %s4218_s30 }
 0x217   : > { %v2109_v8 = vld [vmem:[#allocation2 + $0x1ee] sm:$0xff]  ;;  %v2234_v53 = vmax.f32 %v2170_v18, %v2202_v61  ;;  %v2235_v6 = vmax.f32 %v2171_v54, %v2203_v3  ;;  %v2108_v46 = vld [vmem:[#allocation2 + $0x1e6] sm:$0xff]  ;;  %v2666_v18 = vmax.f32 %v2602_v47, %v5694_v7  ;;  %v2604_v38 = vmax.f32 %v2540_v36, %v5694_v7 }
 0x218   : > { %v2141_v24 = vld [vmem:[#allocation2 + $0x1ef] sm:$0xff]  ;;  %v2140_v32 = vld [vmem:[#allocation2 + $0x1e7] sm:$0xff]  ;;  %v2361_v21 = vmax.f32 %v2297_v52, %v2329_v25 }
 0x219   : > { %v2328_v48 = vld [vmem:[#allocation2 + $0x1aa] sm:$0xff]  ;;  %v2173_v43 = vmax.f32 %v2109_v8, %v2141_v24  ;;  %v2298_v42 = vmax.f32 %v2234_v53, %v2266_v31  ;;  %v2299_v0 = vmax.f32 %v2235_v6, %v2267_v13  ;;  %v2331_v51 = vld [vmem:[#allocation2 + $0x1d2] sm:$0xff]  ;;  %3092 = vrot.lane.b32.xlu0 %v2664_v39, %s4218_s30  ;;  %v2172_v41 = vmax.f32 %v2108_v46, %v2140_v32  ;;  %v2914_v53 = vpop.permute.xlu1 %2913  ;;  %v2638_v3 = vld [vmem:[#allocation3 + $0xc0] sm:$0xff] }
 0x21a   : > { %v2360_v17 = vmax.f32 %v2296_v5, %v2328_v48  ;;  %v2330_v27 = vld [vmem:[#allocation2 + $0x1ca] sm:$0xff]  ;;  %v2333_v34 = vld [vmem:[#allocation2 + $0x1f2] sm:$0xff]  ;;  %v2478_v31 = vmax.f32 %v5649_v15, %v5677_v33  ;;  %2393 = vst.msk [vmem:[#allocation3 + $0xf8] sm:$0xff] %vm226_vm1, %v2361_v21  ;;  %v2787_v48 = vpop.permute.xlu0 %2786  ;;  %v2642_v47 = vld [vmem:[#allocation3 + $0xe0] sm:$0xff] }
 0x21b   : > { %v2237_v55 = vmax.f32 %v2173_v43, %v2205_v4  ;;  %v2362_v57 = vmax.f32 %v2298_v42, %v2330_v27  ;;  %v2363_v28 = vmax.f32 %v2299_v0, %v2331_v51  ;;  %v2635_v61 = vld [vmem:[#allocation3 + $0xa8] sm:$0xff]  ;;  %v2636_v58 = vld [vmem:[#allocation3 + $0xb0] sm:$0xff]  ;;  %3009 = vst.msk [vmem:[#allocation4 + $0x8] sm:$0xff] %vm3007_vm4, %v2914_v53  ;;  %v2637_v43 = vld [vmem:[#allocation3 + $0xb8] sm:$0xff] }
 0x21c   : > { %2392 = vst.msk [vmem:[#allocation3 + $0xf0] sm:$0xff] %vm226_vm1, %v2360_v17  ;;  %v2204_v9 = vld [vmem:[#allocation2 + $0x1e8] sm:$0xff]  ;;  %v2542_v15 = vmax.f32 %v2478_v31, %v5694_v7  ;;  %v2667_v5 = vmax.f32 %v2603_v37, %v2635_v61  ;;  %v2605_v24 = vmax.f32 %v2541_v40, %v2635_v61  ;;  %v2668_v45 = vmax.f32 %v2604_v38, %v2636_v58 }
 0x21d   : > { %v2301_v44 = vmax.f32 %v2237_v55, %v2269_v63  ;;  %2394 = vst.msk [vmem:[#allocation3 + $0x100] sm:$0xff] %vm226_vm1, %v2362_v57  ;;  %v2268_v8 = vld [vmem:[#allocation2 + $0x1e9] sm:$0xff]  ;;  %2395 = vst.msk [vmem:[#allocation3 + $0x108] sm:$0xff] %vm226_vm1, %v2363_v28  ;;  %v2236_v26 = vmax.f32 %v2172_v41, %v2204_v9  ;;  %3096 = vrot.lane.b32.xlu0 %v2666_v18, %s4218_s30  ;;  %v2543_v60 = vmax.f32 %v2479_v2, %v2635_v61  ;;  %v2789_v42 = vpop.permute.xlu1 %2788 }
 0x21e   : > { %v2332_v11 = vld [vmem:[#allocation2 + $0x1ea] sm:$0xff]  ;;  %2865 = vst.msk [vmem:[#allocation4 + $0x90] sm:$0xff] %vm2846_vm3, %v2787_v48  ;;  %3098 = vrot.lane.b32.xlu1 %v2667_v5, %s4218_s30  ;;  %v2481_v33 = vmax.f32 %v5681_v1, %v2635_v61  ;;  %v2606_v23 = vmax.f32 %v2542_v15, %v2636_v58  ;;  %v2544_v62 = vmax.f32 %v2480_v12, %v2636_v58  ;;  %2866 = vst.msk [vmem:[#allocation4 + $0x98] sm:$0xff] %vm2846_vm3, %v2789_v42  ;;  %v2916_v4 = vpop.permute.xlu0 %2915 }
 0x21f   : > { %v2365_v16 = vmax.f32 %v2301_v44, %v2333_v34  ;;  %v2300_v54 = vmax.f32 %v2236_v26, %v2268_v8  ;;  %v2482_v22 = vmax.f32 %v5694_v7, %v2636_v58  ;;  %v2669_v17 = vmax.f32 %v2605_v24, %v2637_v43  ;;  %v2639_v6 = vld [vmem:[#allocation3 + $0xc8] sm:$0xff]  ;;  %3010 = vst.msk [vmem:[#allocation4 + $0x10] sm:$0xff] %vm3007_vm4, %v2916_v4  ;;  %v2640_v55 = vld [vmem:[#allocation3 + $0xd0] sm:$0xff] }
 0x220   : > { %v2670_v30 = vmax.f32 %v2606_v23, %v2638_v3  ;;  %v2608_v19 = vmax.f32 %v2544_v62, %v2638_v3  ;;  %v2484_v27 = vmax.f32 %v2636_v58, %v2638_v3  ;;  %v2607_v1 = vmax.f32 %v2543_v60, %v2637_v43  ;;  %v2643_v59 = vld [vmem:[#allocation3 + $0xe8] sm:$0xff] }
 0x221   : > { %2397 = vst.msk [vmem:[#allocation3 + $0x118] sm:$0xff] %vm226_vm1, %v2365_v16  ;;  %v2364_v35 = vmax.f32 %v2300_v54, %v2332_v11  ;;  %3100 = vrot.lane.b32.xlu0 %v2668_v45, %s4218_s30  ;;  %v2546_v13 = vmax.f32 %v2482_v22, %v2638_v3  ;;  %v2545_v39 = vmax.f32 %v2481_v33, %v2637_v43  ;;  %v2918_v46 = vpop.permute.xlu1 %2917  ;;  %v2645_v12 = vld [vmem:[#allocation3 + $0xf8] sm:$0xff] }
 0x222   : > { %3102 = vrot.lane.b32.xlu1 %v2669_v17, %s4218_s30  ;;  %v2483_v56 = vmax.f32 %v2635_v61, %v2637_v43  ;;  %v2671_v32 = vmax.f32 %v2607_v1, %v2639_v6  ;;  %v2485_v52 = vmax.f32 %v2637_v43, %v2639_v6  ;;  %3011 = vst.msk [vmem:[#allocation4 + $0x18] sm:$0xff] %vm3007_vm4, %v2918_v46  ;;  %v2791_v0 = vpop.permute.xlu0 %2790 }
 0x223   : > { %2396 = vst.msk [vmem:[#allocation3 + $0x110] sm:$0xff] %vm226_vm1, %v2364_v35  ;;  %v2609_v57 = vmax.f32 %v2545_v39, %v2639_v6  ;;  %v2672_v7 = vmax.f32 %v2608_v19, %v2640_v55  ;;  %v2610_v44 = vmax.f32 %v2546_v13, %v2640_v55  ;;  %v2548_v25 = vmax.f32 %v2484_v27, %v2640_v55  ;;  %v2644_v31 = vld [vmem:[#allocation3 + $0xf0] sm:$0xff] }
 0x224   : > { %v2547_v63 = vmax.f32 %v2483_v56, %v2639_v6  ;;  %v2486_v51 = vmax.f32 %v2638_v3, %v2640_v55  ;;  %2867 = vst.msk [vmem:[#allocation4 + $0xa0] sm:$0xff] %vm2846_vm3, %v2791_v0  ;;  %v2549_v28 = vmax.f32 %v2485_v52, %v2641_v50  ;;  %v2487_v20 = vmax.f32 %v2639_v6, %v2641_v50  ;;  %v2646_v2 = vld [vmem:[#allocation3 + $0x100] sm:$0xff]  ;;  %v2647_v33 = vld [vmem:[#allocation3 + $0x108] sm:$0xff] }
 0x225   : > { %3104 = vrot.lane.b32.xlu0 %v2670_v30, %s4218_s30  ;;  %v2793_v36 = vpop.permute.xlu1 %2792  ;;  %v2673_v34 = vmax.f32 %v2609_v57, %v2641_v50  ;;  %v2674_v16 = vmax.f32 %v2610_v44, %v2642_v47  ;;  %v2612_v18 = vmax.f32 %v2548_v25, %v2642_v47  ;;  %v2488_v38 = vmax.f32 %v2640_v55, %v2642_v47 }
 0x226   : > { %3106 = vrot.lane.b32.xlu1 %v2671_v32, %s4218_s30  ;;  %v2611_v21 = vmax.f32 %v2547_v63, %v2641_v50  ;;  %2868 = vst.msk [vmem:[#allocation4 + $0xa8] sm:$0xff] %vm2846_vm3, %v2793_v36  ;;  %v2920_v41 = vpop.permute.xlu0 %2919  ;;  %v2550_v61 = vmax.f32 %v2486_v51, %v2642_v47  ;;  %v2613_v37 = vmax.f32 %v2549_v28, %v2643_v59 }
 0x227   : > { %3012 = vst.msk [vmem:[#allocation4 + $0x20] sm:$0xff] %vm3007_vm4, %v2920_v41  ;;  %v2551_v58 = vmax.f32 %v2487_v20, %v2643_v59  ;;  %v2489_v40 = vmax.f32 %v2641_v50, %v2643_v59  ;;  %v2676_v15 = vmax.f32 %v2612_v18, %v2644_v31  ;;  %v2552_v5 = vmax.f32 %v2488_v38, %v2644_v31 }
 0x228   : > { %v2675_v8 = vmax.f32 %v2611_v21, %v2643_v59  ;;  %v2614_v53 = vmax.f32 %v2550_v61, %v2644_v31  ;;  %v2490_v24 = vmax.f32 %v2642_v47, %v2644_v31  ;;  %v2677_v48 = vmax.f32 %v2613_v37, %v2645_v12  ;;  %v2649_v27 = vld [vmem:[#allocation3 + $0x118] sm:$0xff] }
 0x229   : > { %3108 = vrot.lane.b32.xlu0 %v2672_v7, %s4218_s30  ;;  %v2922_v9 = vpop.permute.xlu1 %2921  ;;  %v2615_v45 = vmax.f32 %v2551_v58, %v2645_v12  ;;  %v2553_v43 = vmax.f32 %v2489_v40, %v2645_v12  ;;  %v2491_v11 = vmax.f32 %v2643_v59, %v2645_v12  ;;  %v2616_v35 = vmax.f32 %v2552_v5, %v2646_v2 }
 0x22a   : > { %3110 = vrot.lane.b32.xlu1 %v2673_v34, %s4218_s30  ;;  %3013 = vst.msk [vmem:[#allocation4 + $0x28] sm:$0xff] %vm3007_vm4, %v2922_v9  ;;  %v2795_v26 = vpop.permute.xlu0 %2794  ;;  %v2678_v60 = vmax.f32 %v2614_v53, %v2646_v2  ;;  %v2554_v23 = vmax.f32 %v2490_v24, %v2646_v2  ;;  %v2492_v62 = vmax.f32 %v2644_v31, %v2646_v2  ;;  %v2648_v22 = vld [vmem:[#allocation3 + $0x110] sm:$0xff] }
 0x22b   : > { %2869 = vst.msk [vmem:[#allocation4 + $0xb0] sm:$0xff] %vm2846_vm3, %v2795_v26  ;;  %v2679_v17 = vmax.f32 %v2615_v45, %v2647_v33  ;;  %v2617_v4 = vmax.f32 %v2553_v43, %v2647_v33  ;;  %v2555_v30 = vmax.f32 %v2491_v11, %v2647_v33  ;;  %v2493_v6 = vmax.f32 %v2645_v12, %v2647_v33 }
 0x22c   : > { %v2680_v13 = vmax.f32 %v2616_v35, %v2648_v22  ;;  %v2618_v1 = vmax.f32 %v2554_v23, %v2648_v22  ;;  %v2556_v55 = vmax.f32 %v2492_v62, %v2648_v22 }
 0x22d   : > { %3112 = vrot.lane.b32.xlu0 %v2674_v16, %s4218_s30  ;;  %v2797_v54 = vpop.permute.xlu1 %2796  ;;  %v2681_v56 = vmax.f32 %v2617_v4, %v2649_v27  ;;  %v2619_v46 = vmax.f32 %v2555_v30, %v2649_v27  ;;  %v2557_v32 = vmax.f32 %v2493_v6, %v2649_v27 }
 0x22e   : > { %3114 = vrot.lane.b32.xlu1 %v2675_v8, %s4218_s30  ;;  %2870 = vst.msk [vmem:[#allocation4 + $0xb8] sm:$0xff] %vm2846_vm3, %v2797_v54  ;;  %v2924_v3 = vpop.permute.xlu0 %2923  ;;  %v2682_v63 = vmax.f32 %v2618_v1, %v5619_v29  ;;  %v2620_v52 = vmax.f32 %v2556_v55, %v5619_v29 }
 0x22f   : > { %3014 = vst.msk [vmem:[#allocation4 + $0x30] sm:$0xff] %vm3007_vm4, %v2924_v3  ;;  %v2683_v7 = vmax.f32 %v2619_v46, %v5587_v49  ;;  %v2621_v50 = vmax.f32 %v2557_v32, %v5587_v49 }
 0x230   : > { %v2684_v25 = vmax.f32 %v2620_v52, %v5629_v14 }
 0x231   : > { %3116 = vrot.lane.b32.xlu0 %v2676_v15, %s4218_s30  ;;  %v2926_v42 = vpop.permute.xlu1 %2925  ;;  %v2685_v51 = vmax.f32 %v2621_v50, %v5610_v10 }
 0x232   : > { %3118 = vrot.lane.b32.xlu1 %v2677_v48, %s4218_s30  ;;  %3015 = vst.msk [vmem:[#allocation4 + $0x38] sm:$0xff] %vm3007_vm4, %v2926_v42  ;;  %v2799_v19 = vpop.permute.xlu0 %2798 }
 0x233   : > { %2871 = vst.msk [vmem:[#allocation4 + $0xc0] sm:$0xff] %vm2846_vm3, %v2799_v19 }
 0x235   : > { %3120 = vrot.lane.b32.xlu0 %v2678_v60, %s4218_s30  ;;  %v2801_v39 = vpop.permute.xlu1 %2800 }
 0x236   : > { %3122 = vrot.lane.b32.xlu1 %v2679_v17, %s4218_s30  ;;  %2872 = vst.msk [vmem:[#allocation4 + $0xc8] sm:$0xff] %vm2846_vm3, %v2801_v39  ;;  %v2928_v57 = vpop.permute.xlu0 %2927 }
 0x237   : > { %3016 = vst.msk [vmem:[#allocation4 + $0x40] sm:$0xff] %vm3007_vm4, %v2928_v57 }
 0x239   : > { %3124 = vrot.lane.b32.xlu0 %v2680_v13, %s4218_s30  ;;  %v2930_v0 = vpop.permute.xlu1 %2929 }
 0x23a   : > { %3126 = vrot.lane.b32.xlu1 %v2681_v56, %s4218_s30  ;;  %3017 = vst.msk [vmem:[#allocation4 + $0x48] sm:$0xff] %vm3007_vm4, %v2930_v0  ;;  %v2803_v44 = vpop.permute.xlu0 %2802 }
 0x23b   : > { %2873 = vst.msk [vmem:[#allocation4 + $0xd0] sm:$0xff] %vm2846_vm3, %v2803_v44 }
 0x23d   : > { %3128 = vrot.lane.b32.xlu0 %v2682_v63, %s4218_s30  ;;  %v2805_v29 = vpop.permute.xlu1 %2804 }
 0x23e   : > { %3130 = vrot.lane.b32.xlu1 %v2683_v7, %s4218_s30  ;;  %2874 = vst.msk [vmem:[#allocation4 + $0xd8] sm:$0xff] %vm2846_vm3, %v2805_v29  ;;  %v2932_v47 = vpop.permute.xlu0 %2931 }
 0x23f   : > { %3018 = vst.msk [vmem:[#allocation4 + $0x50] sm:$0xff] %vm3007_vm4, %v2932_v47 }
 0x241   : > { %3132 = vrot.lane.b32.xlu0 %v2684_v25, %s4218_s30  ;;  %v2934_v49 = vpop.permute.xlu1 %2933 }
 0x242   : > { %3134 = vrot.lane.b32.xlu1 %v2685_v51, %s4218_s30  ;;  %3019 = vst.msk [vmem:[#allocation4 + $0x58] sm:$0xff] %vm3007_vm4, %v2934_v49  ;;  %v2807_v14 = vpop.permute.xlu0 %2806 }
 0x243   : > { %2875 = vst.msk [vmem:[#allocation4 + $0xe0] sm:$0xff] %vm2846_vm3, %v2807_v14 }
 0x245   : > { %v2809_v36 = vpop.permute.xlu1 %2808 }
 0x246   : > { %2876 = vst.msk [vmem:[#allocation4 + $0xe8] sm:$0xff] %vm2846_vm3, %v2809_v36  ;;  %v2811_v34 = vpop.permute.xlu0 %2810 }
 0x247   : > { %2877 = vst.msk [vmem:[#allocation4 + $0xf0] sm:$0xff] %vm2846_vm3, %v2811_v34 }
 0x249   : > { %v2813_v10 = vpop.permute.xlu1 %2812 }
 0x24a   : > { %2878 = vst.msk [vmem:[#allocation4 + $0xf8] sm:$0xff] %vm2846_vm3, %v2813_v10  ;;  %v2936_v21 = vpop.permute.xlu0 %2935 }
 0x24b   : > { %3020 = vst.msk [vmem:[#allocation4 + $0x60] sm:$0xff] %vm3007_vm4, %v2936_v21 }
 0x24d   : > { %v2938_v28 = vpop.permute.xlu1 %2937 }
 0x24e   : > { %3021 = vst.msk [vmem:[#allocation4 + $0x68] sm:$0xff] %vm3007_vm4, %v2938_v28  ;;  %v2940_v20 = vpop.permute.xlu0 %2939 }
 0x24f   : > { %3022 = vst.msk [vmem:[#allocation4 + $0x70] sm:$0xff] %vm3007_vm4, %v2940_v20 }
 0x251   : > { %v2942_v41 = vpop.permute.xlu1 %2941 }
 0x252   : > { %3023 = vst.msk [vmem:[#allocation4 + $0x78] sm:$0xff] %vm3007_vm4, %v2942_v41  ;;  %v2944_v16 = vpop.permute.xlu0 %2943 }
 0x253   : > { %3024 = vst.msk [vmem:[#allocation4 + $0x80] sm:$0xff] %vm3007_vm4, %v2944_v16 }
 0x255   : > { %v2946_v59 = vpop.permute.xlu1 %2945 }
 0x256   : > { %3025 = vst.msk [vmem:[#allocation4 + $0x88] sm:$0xff] %vm3007_vm4, %v2946_v59  ;;  %v3073_v18 = vpop.permute.xlu0 %3072 }
 0x257   : > { %3169 = vst.msk [vmem:[#allocation4] sm:$0xff] %vm3168_vm5, %v3073_v18 }
 0x259   : > { %v3075_v61 = vpop.permute.xlu1 %3074 }
 0x25a   : > { %3170 = vst.msk [vmem:[#allocation4 + $0x8] sm:$0xff] %vm3168_vm5, %v3075_v61  ;;  %v2948_v38 = vpop.permute.xlu0 %2947 }
 0x25b   : > { %3026 = vst.msk [vmem:[#allocation4 + $0x90] sm:$0xff] %vm3007_vm4, %v2948_v38 }
 0x25d   : > { %v2950_v31 = vpop.permute.xlu1 %2949 }
 0x25e   : > { %3027 = vst.msk [vmem:[#allocation4 + $0x98] sm:$0xff] %vm3007_vm4, %v2950_v31  ;;  %v3077_v9 = vpop.permute.xlu0 %3076  ;;  %v3201_v37 = vld [vmem:[#allocation4] sm:$0xff] }
 0x25f   : > { %3171 = vst.msk [vmem:[#allocation4 + $0x10] sm:$0xff] %vm3168_vm5, %v3077_v9 }
 0x261   : > { %v3079_v8 = vpop.permute.xlu1 %3078  ;;  %v3202_v58 = vld [vmem:[#allocation4 + $0x8] sm:$0xff] }
 0x262   : > { %3172 = vst.msk [vmem:[#allocation4 + $0x18] sm:$0xff] %vm3168_vm5, %v3079_v8  ;;  %v2952_v40 = vpop.permute.xlu0 %2951  ;;  %v3233_v26 = vpack.c.bf16 %v3202_v58, %v3201_v37 }
 0x263   : > { %3028 = vst.msk [vmem:[#allocation4 + $0xa0] sm:$0xff] %vm3007_vm4, %v2952_v40 }
 0x264   : > { %3887 = vmatprep.mubr.msk.bf16.mxu1 %vm3264_vm6, %v3233_v26 }
 0x265   : > { %v2954_v15 = vpop.permute.xlu1 %2953 }
 0x266   : > { %3029 = vst.msk [vmem:[#allocation4 + $0xa8] sm:$0xff] %vm3007_vm4, %v2954_v15  ;;  %v3081_v12 = vpop.permute.xlu0 %3080  ;;  %v3203_v5 = vld [vmem:[#allocation4 + $0x10] sm:$0xff] }
 0x267   : > { %3173 = vst.msk [vmem:[#allocation4 + $0x20] sm:$0xff] %vm3168_vm5, %v3081_v12 }
 0x269   : > { %v3083_v53 = vpop.permute.xlu1 %3082  ;;  %v3204_v24 = vld [vmem:[#allocation4 + $0x18] sm:$0xff] }
 0x26a   : > { %3174 = vst.msk [vmem:[#allocation4 + $0x28] sm:$0xff] %vm3168_vm5, %v3083_v53  ;;  %v2956_v2 = vpop.permute.xlu0 %2955  ;;  %v3234_v54 = vpack.c.bf16 %v3204_v24, %v3203_v5 }
 0x26b   : > { %3030 = vst.msk [vmem:[#allocation4 + $0xb0] sm:$0xff] %vm3007_vm4, %v2956_v2 }
 0x26c   : > { %3888 = vmatmul.mubr.msk.bf16.vlgmr.msra.gmra.mxu1 %vm3264_vm6, %v3234_v54 }
 0x26d   : > { %v2958_v48 = vpop.permute.xlu1 %2957 }
 0x26e   : > { %3031 = vst.msk [vmem:[#allocation4 + $0xb8] sm:$0xff] %vm3007_vm4, %v2958_v48  ;;  %v3085_v45 = vpop.permute.xlu0 %3084  ;;  %v3205_v11 = vld [vmem:[#allocation4 + $0x20] sm:$0xff] }
 0x26f   : > { %3175 = vst.msk [vmem:[#allocation4 + $0x30] sm:$0xff] %vm3168_vm5, %v3085_v45 }
 0x271   : > { %v3087_v43 = vpop.permute.xlu1 %3086  ;;  %v3206_v3 = vld [vmem:[#allocation4 + $0x28] sm:$0xff] }
 0x272   : > { %3176 = vst.msk [vmem:[#allocation4 + $0x38] sm:$0xff] %vm3168_vm5, %v3087_v43  ;;  %v2960_v60 = vpop.permute.xlu0 %2959  ;;  %v3235_v33 = vpack.c.bf16 %v3206_v3, %v3205_v11 }
 0x273   : > { %3032 = vst.msk [vmem:[#allocation4 + $0xc0] sm:$0xff] %vm3007_vm4, %v2960_v60 }
 0x274   : > { %3891 = vmatprep.mubr.msk.bf16.mxu1 %vm3264_vm6, %v3235_v33 }
 0x275   : > { %v2962_v35 = vpop.permute.xlu1 %2961 }
 0x276   : > { %3033 = vst.msk [vmem:[#allocation4 + $0xc8] sm:$0xff] %vm3007_vm4, %v2962_v35  ;;  %v3207_v22 = vld [vmem:[#allocation4 + $0x30] sm:$0xff] }
 0x279   : > { %v2966_v62 = vpop.permute.xlu1 %2965  ;;  %v3208_v42 = vld [vmem:[#allocation4 + $0x38] sm:$0xff] }
 0x27a   : > { %3035 = vst.msk [vmem:[#allocation4 + $0xd8] sm:$0xff] %vm3007_vm4, %v2966_v62  ;;  %v3236_v4 = vpack.c.bf16 %v3208_v42, %v3207_v22 }
 0x27b   : > { %v2964_v23 = vpop.permute.xlu0 %2963 }
 0x27c   : > { %3034 = vst.msk [vmem:[#allocation4 + $0xd0] sm:$0xff] %vm3007_vm4, %v2964_v23  ;;  %3892 = vmatmul.mubr.msk.bf16.gmra.mxu1 %vm3264_vm6, %v3236_v4  ;;  %v5844_v4 = vld [vmem:[%s6071_s4] ss:$0 sm:$0xff] }
 0x27d   : > { %v2970_v30 = vpop.permute.xlu1 %2969 }
 0x27e   : > { %3037 = vst.msk [vmem:[#allocation4 + $0xe8] sm:$0xff] %vm3007_vm4, %v2970_v30 }
 0x27f   : > { %v2968_v17 = vpop.permute.xlu0 %2967 }
 0x280   : > { %3036 = vst.msk [vmem:[#allocation4 + $0xe0] sm:$0xff] %vm3007_vm4, %v2968_v17 }
 0x281   : > { %v3091_v19 = vpop.permute.xlu1 %3090 }
 0x282   : > { %3178 = vst.msk [vmem:[#allocation4 + $0x48] sm:$0xff] %vm3168_vm5, %v3091_v19 }
 0x283   : > { %v3089_v6 = vpop.permute.xlu0 %3088 }
 0x284   : > { %3177 = vst.msk [vmem:[#allocation4 + $0x40] sm:$0xff] %vm3168_vm5, %v3089_v6 }
 0x285   : > { %v2974_v27 = vpop.permute.xlu1 %2973 }
 0x286   : > { %3039 = vst.msk [vmem:[#allocation4 + $0xf8] sm:$0xff] %vm3007_vm4, %v2974_v27 }
 0x287   : > { %v2972_v13 = vpop.permute.xlu0 %2971 }
 0x288   : > { %3038 = vst.msk [vmem:[#allocation4 + $0xf0] sm:$0xff] %vm3007_vm4, %v2972_v13 }
 0x289   : > { %v3095_v55 = vpop.permute.xlu1 %3094  ;;  %v3210_v56 = vld [vmem:[#allocation4 + $0x48] sm:$0xff] }
 0x28a   : > { %3180 = vst.msk [vmem:[#allocation4 + $0x58] sm:$0xff] %vm3168_vm5, %v3095_v55 }
 0x28b   : > { %v3093_v1 = vpop.permute.xlu0 %3092  ;;  %v3209_v39 = vld [vmem:[#allocation4 + $0x40] sm:$0xff] }
 0x28c   : > { %3179 = vst.msk [vmem:[#allocation4 + $0x50] sm:$0xff] %vm3168_vm5, %v3093_v1  ;;  %v3237_v32 = vpack.c.bf16 %v3210_v56, %v3209_v39 }
 0x28e   : > { %3895 = vmatprep.mubr.msk.bf16.mxu1 %vm3264_vm6, %v3237_v32 }
 0x28f   : > { %v3097_v46 = vpop.permute.xlu0 %3096 }
 0x290   : > { %3181 = vst.msk [vmem:[#allocation4 + $0x60] sm:$0xff] %vm3168_vm5, %v3097_v46  ;;  %v3099_v57 = vpop.permute.xlu1 %3098 }
 0x291   : > { %3182 = vst.msk [vmem:[#allocation4 + $0x68] sm:$0xff] %vm3168_vm5, %v3099_v57  ;;  %v3212_v7 = vld [vmem:[#allocation4 + $0x58] sm:$0xff] }
 0x293   : > { %v3101_v63 = vpop.permute.xlu0 %3100  ;;  %v3211_v0 = vld [vmem:[#allocation4 + $0x50] sm:$0xff] }
 0x294   : > { %3183 = vst.msk [vmem:[#allocation4 + $0x70] sm:$0xff] %vm3168_vm5, %v3101_v63  ;;  %v3103_v52 = vpop.permute.xlu1 %3102  ;;  %v3238_v44 = vpack.c.bf16 %v3212_v7, %v3211_v0 }
 0x295   : > { %3184 = vst.msk [vmem:[#allocation4 + $0x78] sm:$0xff] %vm3168_vm5, %v3103_v52 }
 0x296   : > { %3896 = vmatmul.mubr.msk.bf16.gmra.mxu1 %vm3264_vm6, %v3238_v44 }
 0x297   : > { %v3105_v50 = vpop.permute.xlu0 %3104  ;;  %v3213_v29 = vld [vmem:[#allocation4 + $0x60] sm:$0xff] }
 0x298   : > { %3185 = vst.msk [vmem:[#allocation4 + $0x80] sm:$0xff] %vm3168_vm5, %v3105_v50  ;;  %v3107_v25 = vpop.permute.xlu1 %3106  ;;  %v3214_v51 = vld [vmem:[#allocation4 + $0x68] sm:$0xff] }
 0x299   : > { %3186 = vst.msk [vmem:[#allocation4 + $0x88] sm:$0xff] %vm3168_vm5, %v3107_v25  ;;  %v3239_v49 = vpack.c.bf16 %v3214_v51, %v3213_v29 }
 0x29b   : > { %v3109_v47 = vpop.permute.xlu0 %3108  ;;  %3899 = vmatprep.mubr.msk.bf16.mxu1 %vm3264_vm6, %v3239_v49  ;;  %v3215_v36 = vld [vmem:[#allocation4 + $0x70] sm:$0xff] }
 0x29c   : > { %3187 = vst.msk [vmem:[#allocation4 + $0x90] sm:$0xff] %vm3168_vm5, %v3109_v47  ;;  %v3111_v14 = vpop.permute.xlu1 %3110  ;;  %v3216_v34 = vld [vmem:[#allocation4 + $0x78] sm:$0xff] }
 0x29d   : > { %3188 = vst.msk [vmem:[#allocation4 + $0x98] sm:$0xff] %vm3168_vm5, %v3111_v14  ;;  %v3240_v21 = vpack.c.bf16 %v3216_v34, %v3215_v36 }
 0x29f   : > { %v3113_v10 = vpop.permute.xlu0 %3112  ;;  %3900 = vmatmul.mubr.msk.bf16.gmra.mxu1 %vm3264_vm6, %v3240_v21  ;;  %v3217_v20 = vld [vmem:[#allocation4 + $0x80] sm:$0xff] }
 0x2a0   : > { %3189 = vst.msk [vmem:[#allocation4 + $0xa0] sm:$0xff] %vm3168_vm5, %v3113_v10  ;;  %v3115_v28 = vpop.permute.xlu1 %3114  ;;  %v3218_v41 = vld [vmem:[#allocation4 + $0x88] sm:$0xff] }
 0x2a1   : > { %3190 = vst.msk [vmem:[#allocation4 + $0xa8] sm:$0xff] %vm3168_vm5, %v3115_v28  ;;  %v3241_v59 = vpack.c.bf16 %v3218_v41, %v3217_v20 }
 0x2a3   : > { %v3117_v16 = vpop.permute.xlu0 %3116  ;;  %3903 = vmatprep.mubr.msk.bf16.mxu1 %vm3264_vm6, %v3241_v59  ;;  %v3219_v61 = vld [vmem:[#allocation4 + $0x90] sm:$0xff] }
 0x2a4   : > { %3191 = vst.msk [vmem:[#allocation4 + $0xb0] sm:$0xff] %vm3168_vm5, %v3117_v16  ;;  %v3119_v18 = vpop.permute.xlu1 %3118  ;;  %v3220_v38 = vld [vmem:[#allocation4 + $0x98] sm:$0xff] }
 0x2a5   : > { %3192 = vst.msk [vmem:[#allocation4 + $0xb8] sm:$0xff] %vm3168_vm5, %v3119_v18  ;;  %v3242_v9 = vpack.c.bf16 %v3220_v38, %v3219_v61 }
 0x2a7   : > { %v3121_v31 = vpop.permute.xlu0 %3120  ;;  %3904 = vmatmul.mubr.msk.bf16.gmra.mxu1 %vm3264_vm6, %v3242_v9  ;;  %v3221_v37 = vld [vmem:[#allocation4 + $0xa0] sm:$0xff] }
 0x2a8   : > { %3193 = vst.msk [vmem:[#allocation4 + $0xc0] sm:$0xff] %vm3168_vm5, %v3121_v31  ;;  %v3123_v8 = vpop.permute.xlu1 %3122  ;;  %v3222_v58 = vld [vmem:[#allocation4 + $0xa8] sm:$0xff] }
 0x2a9   : > { %3194 = vst.msk [vmem:[#allocation4 + $0xc8] sm:$0xff] %vm3168_vm5, %v3123_v8  ;;  %v3243_v26 = vpack.c.bf16 %v3222_v58, %v3221_v37 }
 0x2ab   : > { %v3125_v40 = vpop.permute.xlu0 %3124  ;;  %3907 = vmatprep.mubr.msk.bf16.mxu1 %vm3264_vm6, %v3243_v26  ;;  %v3223_v12 = vld [vmem:[#allocation4 + $0xb0] sm:$0xff] }
 0x2ac   : > { %3195 = vst.msk [vmem:[#allocation4 + $0xd0] sm:$0xff] %vm3168_vm5, %v3125_v40  ;;  %v3127_v15 = vpop.permute.xlu1 %3126  ;;  %v3224_v53 = vld [vmem:[#allocation4 + $0xb8] sm:$0xff] }
 0x2ad   : > { %3196 = vst.msk [vmem:[#allocation4 + $0xd8] sm:$0xff] %vm3168_vm5, %v3127_v15  ;;  %v3244_v24 = vpack.c.bf16 %v3224_v53, %v3223_v12 }
 0x2af   : > { %v3129_v5 = vpop.permute.xlu0 %3128  ;;  %3908 = vmatmul.mubr.msk.bf16.gmra.mxu1 %vm3264_vm6, %v3244_v24  ;;  %v3225_v54 = vld [vmem:[#allocation4 + $0xc0] sm:$0xff] }
 0x2b0   : > { %3197 = vst.msk [vmem:[#allocation4 + $0xe0] sm:$0xff] %vm3168_vm5, %v3129_v5  ;;  %v3131_v2 = vpop.permute.xlu1 %3130  ;;  %v3226_v48 = vld [vmem:[#allocation4 + $0xc8] sm:$0xff] }
 0x2b1   : > { %3198 = vst.msk [vmem:[#allocation4 + $0xe8] sm:$0xff] %vm3168_vm5, %v3131_v2  ;;  %v3245_v43 = vpack.c.bf16 %v3226_v48, %v3225_v54 }
 0x2b3   : > { %v3133_v45 = vpop.permute.xlu0 %3132  ;;  %3911 = vmatprep.mubr.msk.bf16.mxu1 %vm3264_vm6, %v3245_v43  ;;  %v3227_v3 = vld [vmem:[#allocation4 + $0xd0] sm:$0xff] }
 0x2b4   : > { %3199 = vst.msk [vmem:[#allocation4 + $0xf0] sm:$0xff] %vm3168_vm5, %v3133_v45  ;;  %v3135_v11 = vpop.permute.xlu1 %3134  ;;  %v3228_v60 = vld [vmem:[#allocation4 + $0xd8] sm:$0xff] }
 0x2b5   : > { %3200 = vst.msk [vmem:[#allocation4 + $0xf8] sm:$0xff] %vm3168_vm5, %v3135_v11  ;;  %v3246_v33 = vpack.c.bf16 %v3228_v60, %v3227_v3 }
 0x2b7   : > { %3912 = vmatmul.mubr.msk.bf16.gmra.mxu1 %vm3264_vm6, %v3246_v33  ;;  %v3229_v35 = vld [vmem:[#allocation4 + $0xe0] sm:$0xff] }
 0x2b8   : > { %v3230_v23 = vld [vmem:[#allocation4 + $0xe8] sm:$0xff] }
 0x2b9   : > { %v3247_v62 = vpack.c.bf16 %v3230_v23, %v3229_v35 }
 0x2bb   : > { %3915 = vmatprep.mubr.msk.bf16.mxu1 %vm3264_vm6, %v3247_v62  ;;  %v3231_v22 = vld [vmem:[#allocation4 + $0xf0] sm:$0xff] }
 0x2bc   : > { %v3232_v42 = vld [vmem:[#allocation4 + $0xf8] sm:$0xff] }
 0x2bd   : > { %v3248_v17 = vpack.c.bf16 %v3232_v42, %v3231_v22 }
 0x2bf   : > { %3916 = vmatmul.mubr.msk.bf16.gmra.mxu1 %vm3264_vm6, %v3248_v17 }
 0x32c   : > { %v3889_v30 = vpop.f32.mrf.mxu1 }
 0x32d   : > { %v3356_v6 = vadd.f32 %v3889_v30, %v5844_v4 }
 0x32e   : > { %v3347_v19 = vpop.f32.mrf.mxu1 }
 0x32f   : > { %v3476_v13 = vsub.f32 0.0, %v3356_v6  ;;  %v3348_v27 = vadd.f32 %v5844_v4, %v3347_v19 }
 0x330   : > { %v3890_v1 = vpop.f32.mrf.mxu1 }
 0x331   : > { %v3510_v55 = vmul.f32 1.442695, %v3476_v13  ;;  %v3474_v39 = vsub.f32 0.0, %v3348_v27  ;;  %v3359_v56 = vadd.f32 %v3890_v1, %v5844_v4 }
 0x332   : > { %v3350_v46 = vpop.f32.mrf.mxu1 }
 0x333   : > { %4077 = vpow2.f32 %v3510_v55  ;;  %v3506_v32 = vmul.f32 1.442695, %v3474_v39  ;;  %v3477_v57 = vsub.f32 0.0, %v3359_v56  ;;  %v5850_v63 = vadd.f32 %v5844_v4, %v3350_v46 }
 0x335   : > { %4079 = vpow2.f32 %v3506_v32  ;;  %v3512_v52 = vmul.f32 1.442695, %v3477_v57  ;;  %v3475_v0 = vsub.f32 0.0, %v5850_v63 }
 0x337   : > { %4081 = vpow2.f32 %v3512_v52  ;;  %v3508_v7 = vmul.f32 1.442695, %v3475_v0 }
 0x339   : > { %4083 = vpow2.f32 %v3508_v7 }
 0x33c   : > { %v3893_v50 = vpop.f32.mrf.mxu1 }
 0x33d   : > { %v5854_v44 = vadd.f32 %v3893_v50, %v5844_v4 }
 0x33e   : > { %v3363_v25 = vpop.f32.mrf.mxu1 }
 0x33f   : > { %v3480_v29 = vsub.f32 0.0, %v5854_v44  ;;  %v5858_v51 = vadd.f32 %v5844_v4, %v3363_v25 }
 0x340   : > { %v4078_v47 = vpop.eup %4077  ;;  %v3894_v49 = vpop.f32.mrf.mxu1 }
 0x341   : > { %v3572_v14 = vadd.f32 1.0, %v4078_v47  ;;  %v3518_v36 = vmul.f32 1.442695, %v3480_v29  ;;  %v3478_v34 = vsub.f32 0.0, %v5858_v51  ;;  %v5862_v10 = vadd.f32 %v3894_v49, %v5844_v4 }
 0x342   : > { %v4080_v21 = vpop.eup %4079  ;;  %v3366_v28 = vpop.f32.mrf.mxu1 }
 0x343   : > { %4085 = vrcp.f32 %v3572_v14  ;;  %v3570_v20 = vadd.f32 1.0, %v4080_v21  ;;  %v3514_v41 = vmul.f32 1.442695, %v3478_v34  ;;  %v3481_v16 = vsub.f32 0.0, %v5862_v10 }
 0x344   : > { %v4082_v59 = vpop.eup %4081  ;;  %4087 = vpow2.f32 %v3518_v36  ;;  %v5866_v18 = vadd.f32 %v5844_v4, %v3366_v28 }
 0x345   : > { %4089 = vrcp.f32 %v3570_v20  ;;  %v3573_v61 = vadd.f32 1.0, %v4082_v59  ;;  %v3520_v38 = vmul.f32 1.442695, %v3481_v16 }
 0x346   : > { %v4084_v31 = vpop.eup %4083  ;;  %4091 = vpow2.f32 %v3514_v41  ;;  %v3479_v9 = vsub.f32 0.0, %v5866_v18 }
 0x347   : > { %4093 = vrcp.f32 %v3573_v61  ;;  %v3571_v8 = vadd.f32 1.0, %v4084_v31 }
 0x348   : > { %4095 = vpow2.f32 %v3520_v38  ;;  %v3516_v37 = vmul.f32 1.442695, %v3479_v9 }
 0x349   : > { %4097 = vrcp.f32 %v3571_v8 }
 0x34a   : > { %4099 = vpow2.f32 %v3516_v37 }
 0x350   : > { %v4086_v58 = vpop.eup %4085 }
 0x351   : > { %v4088_v40 = vpop.eup %4087  ;;  %v3636_v26 = vmul.f32 %v4086_v58, %v3356_v6 }
 0x352   : > { %v4090_v15 = vpop.eup %4089  ;;  %v3576_v12 = vadd.f32 1.0, %v4088_v40 }
 0x353   : > { %v4092_v53 = vpop.eup %4091  ;;  %3668 = vst.msk [vmem:[%s5873_s13 + $0x10] sm:$0xff] %vm356_vm2, %v3636_v26  ;;  %v3634_v5 = vmul.f32 %v4090_v15, %v3348_v27 }
 0x354   : > { %v4094_v24 = vpop.eup %4093  ;;  %4101 = vrcp.f32 %v3576_v12  ;;  %v3574_v2 = vadd.f32 1.0, %v4092_v53 }
 0x355   : > { %v4096_v48 = vpop.eup %4095  ;;  %3666 = vst.msk [vmem:[%s5873_s13] sm:$0xff] %vm356_vm2, %v3634_v5  ;;  %v3637_v45 = vmul.f32 %v4094_v24, %v3359_v56 }
 0x356   : > { %v3897_v54 = vpop.f32.mrf.mxu1  ;;  %v4098_v11 = vpop.eup %4097  ;;  %4103 = vrcp.f32 %v3574_v2  ;;  %v3577_v3 = vadd.f32 1.0, %v4096_v48 }
 0x357   : > { %v5880_v43 = vadd.f32 %v3897_v54, %v5844_v4  ;;  %v4100_v33 = vpop.eup %4099  ;;  %3669 = vst.msk [vmem:[%s5873_s13 + $0x18] sm:$0xff] %vm356_vm2, %v3637_v45  ;;  %v3635_v35 = vmul.f32 %v4098_v11, %v5850_v63 }
 0x358   : > { %v3379_v60 = vpop.f32.mrf.mxu1  ;;  %4105 = vrcp.f32 %v3577_v3  ;;  %v3575_v22 = vadd.f32 1.0, %v4100_v33 }
 0x359   : > { %v3484_v23 = vsub.f32 0.0, %v5880_v43  ;;  %v5887_v62 = vadd.f32 %v5844_v4, %v3379_v60  ;;  %3667 = vst.msk [vmem:[%s5873_s13 + $0x8] sm:$0xff] %vm356_vm2, %v3635_v35 }
 0x35a   : > { %v3898_v42 = vpop.f32.mrf.mxu1  ;;  %4107 = vrcp.f32 %v3575_v22 }
 0x35b   : > { %v3526_v17 = vmul.f32 1.442695, %v3484_v23  ;;  %v3482_v30 = vsub.f32 0.0, %v5887_v62  ;;  %v5893_v6 = vadd.f32 %v3898_v42, %v5844_v4 }
 0x35c   : > { %v3382_v19 = vpop.f32.mrf.mxu1 }
 0x35d   : > { %4109 = vpow2.f32 %v3526_v17  ;;  %v3522_v13 = vmul.f32 1.442695, %v3482_v30  ;;  %v3485_v27 = vsub.f32 0.0, %v5893_v6  ;;  %v5897_v1 = vadd.f32 %v5844_v4, %v3382_v19 }
 0x35f   : > { %v3901_v55 = vpop.f32.mrf.mxu1  ;;  %4111 = vpow2.f32 %v3522_v13  ;;  %v3528_v39 = vmul.f32 1.442695, %v3485_v27  ;;  %v3483_v56 = vsub.f32 0.0, %v5897_v1 }
 0x360   : > { %v5901_v46 = vadd.f32 %v3901_v55, %v5844_v4 }
 0x361   : > { %v3395_v32 = vpop.f32.mrf.mxu1  ;;  %4113 = vpow2.f32 %v3528_v39  ;;  %v3524_v57 = vmul.f32 1.442695, %v3483_v56  ;;  %v4102_v7 = vpop.eup %4101 }
 0x362   : > { %v3488_v63 = vsub.f32 0.0, %v5901_v46  ;;  %v5905_v52 = vadd.f32 %v5844_v4, %v3395_v32  ;;  %v3640_v47 = vmul.f32 %v4102_v7, %v5854_v44 }
 0x363   : > { %v3902_v0 = vpop.f32.mrf.mxu1  ;;  %4115 = vpow2.f32 %v3524_v57  ;;  %v4104_v14 = vpop.eup %4103 }
 0x364   : > { %v3534_v50 = vmul.f32 1.442695, %v3488_v63  ;;  %v3486_v25 = vsub.f32 0.0, %v5905_v52  ;;  %v5909_v29 = vadd.f32 %v3902_v0, %v5844_v4  ;;  %3672 = vst.msk [vmem:[%s5873_s13 + $0x30] sm:$0xff] %vm356_vm2, %v3640_v47  ;;  %v3638_v28 = vmul.f32 %v4104_v14, %v5858_v51 }
 0x365   : > { %v3398_v49 = vpop.f32.mrf.mxu1  ;;  %v4106_v41 = vpop.eup %4105 }
 0x366   : > { %4117 = vpow2.f32 %v3534_v50  ;;  %v3530_v36 = vmul.f32 1.442695, %v3486_v25  ;;  %v3489_v34 = vsub.f32 0.0, %v5909_v29  ;;  %v5914_v21 = vadd.f32 %v5844_v4, %v3398_v49  ;;  %3670 = vst.msk [vmem:[%s5873_s13 + $0x20] sm:$0xff] %vm356_vm2, %v3638_v28 }
 0x367   : > { %v3905_v20 = vpop.f32.mrf.mxu1  ;;  %v3641_v61 = vmul.f32 %v4106_v41, %v5862_v10  ;;  %v4108_v31 = vpop.eup %4107 }
 0x368   : > { %4119 = vpow2.f32 %v3530_v36  ;;  %v3536_v16 = vmul.f32 1.442695, %v3489_v34  ;;  %v3487_v44 = vsub.f32 0.0, %v5914_v21  ;;  %v5921_v59 = vadd.f32 %v3905_v20, %v5844_v4 }
 0x369   : > { %v3411_v38 = vpop.f32.mrf.mxu1  ;;  %3673 = vst.msk [vmem:[%s5873_s13 + $0x38] sm:$0xff] %vm356_vm2, %v3641_v61  ;;  %v3639_v58 = vmul.f32 %v4108_v31, %v5866_v18 }
 0x36a   : > { %4121 = vpow2.f32 %v3536_v16  ;;  %v3532_v9 = vmul.f32 1.442695, %v3487_v44  ;;  %v3492_v51 = vsub.f32 0.0, %v5921_v59  ;;  %v5928_v8 = vadd.f32 %v5844_v4, %v3411_v38  ;;  %v4110_v37 = vpop.eup %4109 }
 0x36b   : > { %v3906_v40 = vpop.f32.mrf.mxu1  ;;  %v3580_v26 = vadd.f32 1.0, %v4110_v37  ;;  %3671 = vst.msk [vmem:[%s5873_s13 + $0x28] sm:$0xff] %vm356_vm2, %v3639_v58 }
 0x36c   : > { %4123 = vpow2.f32 %v3532_v9  ;;  %v3542_v15 = vmul.f32 1.442695, %v3492_v51  ;;  %v3490_v10 = vsub.f32 0.0, %v5928_v8  ;;  %v4112_v12 = vpop.eup %4111  ;;  %v5937_v53 = vadd.f32 %v3906_v40, %v5844_v4 }
 0x36d   : > { %v3414_v5 = vpop.f32.mrf.mxu1  ;;  %4125 = vrcp.f32 %v3580_v26  ;;  %v3578_v24 = vadd.f32 1.0, %v4112_v12 }
 0x36e   : > { %v3538_v2 = vmul.f32 1.442695, %v3490_v10  ;;  %v5940_v54 = vadd.f32 %v5844_v4, %v3414_v5  ;;  %v4114_v18 = vpop.eup %4113  ;;  %4127 = vpow2.f32 %v3542_v15  ;;  %v3493_v48 = vsub.f32 0.0, %v5937_v53 }
 0x36f   : > { %v3909_v45 = vpop.f32.mrf.mxu1  ;;  %4129 = vrcp.f32 %v3578_v24  ;;  %v3581_v11 = vadd.f32 1.0, %v4114_v18 }
 0x370   : > { %v3491_v3 = vsub.f32 0.0, %v5940_v54  ;;  %v5945_v60 = vadd.f32 %v3909_v45, %v5844_v4  ;;  %v4116_v33 = vpop.eup %4115  ;;  %4131 = vpow2.f32 %v3538_v2  ;;  %v3544_v35 = vmul.f32 1.442695, %v3493_v48 }
 0x371   : > { %v3427_v23 = vpop.f32.mrf.mxu1  ;;  %4133 = vrcp.f32 %v3581_v11  ;;  %v3579_v22 = vadd.f32 1.0, %v4116_v33 }
 0x372   : > { %v3540_v42 = vmul.f32 1.442695, %v3491_v3  ;;  %v3496_v17 = vsub.f32 0.0, %v5945_v60  ;;  %4135 = vpow2.f32 %v3544_v35  ;;  %v5949_v19 = vadd.f32 %v5844_v4, %v3427_v23 }
 0x373   : > { %v4118_v30 = vpop.eup %4117  ;;  %v3910_v13 = vpop.f32.mrf.mxu1  ;;  %4137 = vrcp.f32 %v3579_v22 }
 0x374   : > { %v3584_v27 = vadd.f32 1.0, %v4118_v30  ;;  %v3550_v55 = vmul.f32 1.442695, %v3496_v17  ;;  %v5952_v39 = vadd.f32 %v3910_v13, %v5844_v4  ;;  %4139 = vpow2.f32 %v3540_v42 }
 0x375   : > { %v4120_v56 = vpop.eup %4119  ;;  %v3494_v32 = vsub.f32 0.0, %v5949_v19  ;;  %v3430_v57 = vpop.f32.mrf.mxu1 }
 0x376   : > { %4141 = vrcp.f32 %v3584_v27  ;;  %v3582_v63 = vadd.f32 1.0, %v4120_v56  ;;  %v3497_v0 = vsub.f32 0.0, %v5952_v39  ;;  %v5957_v7 = vadd.f32 %v5844_v4, %v3430_v57 }
 0x377   : > { %v4122_v50 = vpop.eup %4121  ;;  %4143 = vpow2.f32 %v3550_v55  ;;  %v3546_v25 = vmul.f32 1.442695, %v3494_v32  ;;  %v3913_v47 = vpop.f32.mrf.mxu1 }
 0x378   : > { %4145 = vrcp.f32 %v3582_v63  ;;  %v3585_v49 = vadd.f32 1.0, %v4122_v50  ;;  %v3552_v14 = vmul.f32 1.442695, %v3497_v0  ;;  %v3495_v36 = vsub.f32 0.0, %v5957_v7 }
 0x379   : > { %v4124_v34 = vpop.eup %4123  ;;  %4147 = vpow2.f32 %v3546_v25  ;;  %v5961_v28 = vadd.f32 %v3913_v47, %v5844_v4  ;;  %v3443_v20 = vpop.f32.mrf.mxu1 }
 0x37a   : > { %4149 = vrcp.f32 %v3585_v49  ;;  %v3583_v41 = vadd.f32 1.0, %v4124_v34  ;;  %v3548_v16 = vmul.f32 1.442695, %v3495_v36  ;;  %v5964_v44 = vadd.f32 %v5844_v4, %v3443_v20  ;;  %v4126_v61 = vpop.eup %4125 }
 0x37b   : > { %4151 = vpow2.f32 %v3552_v14  ;;  %v3500_v38 = vsub.f32 0.0, %v5961_v28  ;;  %v3914_v31 = vpop.f32.mrf.mxu1  ;;  %v4128_v9 = vpop.eup %4127  ;;  %v3644_v51 = vmul.f32 %v4126_v61, %v5880_v43 }
 0x37c   : > { %4153 = vrcp.f32 %v3583_v41  ;;  %v3498_v37 = vsub.f32 0.0, %v5964_v44  ;;  %v5970_v58 = vadd.f32 %v3914_v31, %v5844_v4  ;;  %v4130_v40 = vpop.eup %4129  ;;  %v3588_v26 = vadd.f32 1.0, %v4128_v9 }
 0x37d   : > { %4155 = vpow2.f32 %v3548_v16  ;;  %v3558_v15 = vmul.f32 1.442695, %v3500_v38  ;;  %v3446_v10 = vpop.f32.mrf.mxu1  ;;  %v4132_v12 = vpop.eup %4131  ;;  %3676 = vst.msk [vmem:[%s5873_s13 + $0x50] sm:$0xff] %vm356_vm2, %v3644_v51  ;;  %v3642_v5 = vmul.f32 %v4130_v40, %v5887_v62 }
 0x37e   : > { %v3554_v24 = vmul.f32 1.442695, %v3498_v37  ;;  %v3501_v43 = vsub.f32 0.0, %v5970_v58  ;;  %v5977_v2 = vadd.f32 %v5844_v4, %v3446_v10  ;;  %v4134_v18 = vpop.eup %4133  ;;  %4157 = vrcp.f32 %v3588_v26 }
 0x37f   : > { %v3586_v48 = vadd.f32 1.0, %v4132_v12  ;;  %v3917_v45 = vpop.f32.mrf.mxu1  ;;  %v4136_v11 = vpop.eup %4135  ;;  %3674 = vst.msk [vmem:[%s5873_s13 + $0x40] sm:$0xff] %vm356_vm2, %v3642_v5  ;;  %v3645_v3 = vmul.f32 %v4134_v18, %v5893_v6  ;;  %4159 = vpow2.f32 %v3558_v15 }
 0x380   : > { %v3560_v33 = vmul.f32 1.442695, %v3501_v43  ;;  %v3499_v62 = vsub.f32 0.0, %v5977_v2  ;;  %v4138_v35 = vpop.eup %4137  ;;  %v3589_v23 = vadd.f32 1.0, %v4136_v11  ;;  %v5984_v22 = vadd.f32 %v3917_v45, %v5844_v4 }
 0x381   : > { %4161 = vrcp.f32 %v3586_v48  ;;  %v3459_v42 = vpop.f32.mrf.mxu1  ;;  %v4140_v17 = vpop.eup %4139  ;;  %3677 = vst.msk [vmem:[%s5873_s13 + $0x58] sm:$0xff] %vm356_vm2, %v3645_v3  ;;  %v3643_v30 = vmul.f32 %v4138_v35, %v5897_v1 }
 0x382   : > { %4163 = vpow2.f32 %v3554_v24  ;;  %v3556_v13 = vmul.f32 1.442695, %v3499_v62  ;;  %v5990_v6 = vadd.f32 %v5844_v4, %v3459_v42  ;;  %v3587_v55 = vadd.f32 1.0, %v4140_v17 }
 0x383   : > { %v4142_v27 = vpop.eup %4141  ;;  %4165 = vrcp.f32 %v3589_v23  ;;  %v3504_v56 = vsub.f32 0.0, %v5984_v22  ;;  %v3918_v32 = vpop.f32.mrf.mxu1  ;;  %3675 = vst.msk [vmem:[%s5873_s13 + $0x48] sm:$0xff] %vm356_vm2, %v3643_v30 }
 0x384   : > { %v4144_v57 = vpop.eup %4143  ;;  %v3648_v63 = vmul.f32 %v4142_v27, %v5901_v46  ;;  %4167 = vpow2.f32 %v3560_v33  ;;  %v3502_v1 = vsub.f32 0.0, %v5990_v6  ;;  %v5998_v0 = vadd.f32 %v3918_v32, %v5844_v4 }
 0x385   : > { %v4146_v50 = vpop.eup %4145  ;;  %4169 = vrcp.f32 %v3587_v55  ;;  %v3592_v25 = vadd.f32 1.0, %v4144_v57  ;;  %v3566_v47 = vmul.f32 1.442695, %v3504_v56  ;;  %v3462_v49 = vpop.f32.mrf.mxu1 }
 0x386   : > { %v4148_v14 = vpop.eup %4147  ;;  %3680 = vst.msk [vmem:[%s5873_s13 + $0x70] sm:$0xff] %vm356_vm2, %v3648_v63  ;;  %v3646_v36 = vmul.f32 %v4146_v50, %v5905_v52  ;;  %4171 = vpow2.f32 %v3556_v13  ;;  %v3562_v34 = vmul.f32 1.442695, %v3502_v1  ;;  %v3505_v46 = vsub.f32 0.0, %v5998_v0 }
 0x387   : > { %v4150_v20 = vpop.eup %4149  ;;  %4173 = vrcp.f32 %v3592_v25  ;;  %v3590_v41 = vadd.f32 1.0, %v4148_v14  ;;  %v6005_v16 = vadd.f32 %v5844_v4, %v3462_v49 }
 0x388   : > { %v4152_v61 = vpop.eup %4151  ;;  %3678 = vst.msk [vmem:[%s5873_s13 + $0x60] sm:$0xff] %vm356_vm2, %v3646_v36  ;;  %v3649_v38 = vmul.f32 %v4150_v20, %v5909_v29  ;;  %4175 = vpow2.f32 %v3566_v47  ;;  %v3568_v31 = vmul.f32 1.442695, %v3505_v46 }
 0x389   : > { %v4154_v52 = vpop.eup %4153  ;;  %4177 = vrcp.f32 %v3590_v41  ;;  %v3593_v9 = vadd.f32 1.0, %v4152_v61  ;;  %v3503_v51 = vsub.f32 0.0, %v6005_v16 }
 0x38a   : > { %v4156_v37 = vpop.eup %4155  ;;  %3681 = vst.msk [vmem:[%s5873_s13 + $0x78] sm:$0xff] %vm356_vm2, %v3649_v38  ;;  %v3647_v4 = vmul.f32 %v4154_v52, %v5914_v21  ;;  %4179 = vpow2.f32 %v3562_v34 }
 0x38b   : > { %4181 = vrcp.f32 %v3593_v9  ;;  %v3591_v40 = vadd.f32 1.0, %v4156_v37  ;;  %v3564_v26 = vmul.f32 1.442695, %v3503_v51  ;;  %v4158_v15 = vpop.eup %4157 }
 0x38c   : > { %3679 = vst.msk [vmem:[%s5873_s13 + $0x68] sm:$0xff] %vm356_vm2, %v3647_v4  ;;  %4183 = vpow2.f32 %v3568_v31  ;;  %v4160_v29 = vpop.eup %4159  ;;  %v3652_v10 = vmul.f32 %v4158_v15, %v5921_v59 }
 0x38d   : > { %4185 = vrcp.f32 %v3591_v40  ;;  %v3596_v5 = vadd.f32 1.0, %v4160_v29 }
 0x38e   : > { %v4162_v12 = vpop.eup %4161  ;;  %4187 = vpow2.f32 %v3564_v26  ;;  %3684 = vst.msk [vmem:[%s5873_s13 + $0x90] sm:$0xff] %vm356_vm2, %v3652_v10 }
 0x38f   : > { %v4164_v24 = vpop.eup %4163  ;;  %v3650_v21 = vmul.f32 %v4162_v12, %v5928_v8  ;;  %4189 = vrcp.f32 %v3596_v5 }
 0x390   : > { %v4166_v43 = vpop.eup %4165  ;;  %v3594_v18 = vadd.f32 1.0, %v4164_v24 }
 0x391   : > { %v4168_v48 = vpop.eup %4167  ;;  %3682 = vst.msk [vmem:[%s5873_s13 + $0x80] sm:$0xff] %vm356_vm2, %v3650_v21  ;;  %v3653_v45 = vmul.f32 %v4166_v43, %v5937_v53 }
 0x392   : > { %v4170_v59 = vpop.eup %4169  ;;  %4191 = vrcp.f32 %v3594_v18  ;;  %v3597_v11 = vadd.f32 1.0, %v4168_v48 }
 0x393   : > { %v4172_v3 = vpop.eup %4171  ;;  %3685 = vst.msk [vmem:[%s5873_s13 + $0x98] sm:$0xff] %vm356_vm2, %v3653_v45  ;;  %v3651_v33 = vmul.f32 %v4170_v59, %v5940_v54 }
 0x394   : > { %v4174_v62 = vpop.eup %4173  ;;  %4193 = vrcp.f32 %v3597_v11  ;;  %v3595_v8 = vadd.f32 1.0, %v4172_v3 }
 0x395   : > { %v4176_v35 = vpop.eup %4175  ;;  %3683 = vst.msk [vmem:[%s5873_s13 + $0x88] sm:$0xff] %vm356_vm2, %v3651_v33  ;;  %v3656_v23 = vmul.f32 %v4174_v62, %v5945_v60 }
 0x396   : > { %v4178_v42 = vpop.eup %4177  ;;  %4195 = vrcp.f32 %v3595_v8  ;;  %v3600_v53 = vadd.f32 1.0, %v4176_v35 }
 0x397   : > { %v4180_v17 = vpop.eup %4179  ;;  %3688 = vst.msk [vmem:[%s5873_s13 + $0xb0] sm:$0xff] %vm356_vm2, %v3656_v23  ;;  %v3654_v30 = vmul.f32 %v4178_v42, %v5949_v19 }
 0x398   : > { %v4182_v54 = vpop.eup %4181  ;;  %4197 = vrcp.f32 %v3600_v53  ;;  %v3598_v13 = vadd.f32 1.0, %v4180_v17 }
 0x399   : > { %v4184_v27 = vpop.eup %4183  ;;  %3686 = vst.msk [vmem:[%s5873_s13 + $0xa0] sm:$0xff] %vm356_vm2, %v3654_v30  ;;  %v3657_v55 = vmul.f32 %v4182_v54, %v5952_v39 }
 0x39a   : > { %v4186_v60 = vpop.eup %4185  ;;  %4199 = vrcp.f32 %v3598_v13  ;;  %v3601_v56 = vadd.f32 1.0, %v4184_v27 }
 0x39b   : > { %v4188_v32 = vpop.eup %4187  ;;  %3689 = vst.msk [vmem:[%s5873_s13 + $0xb8] sm:$0xff] %vm356_vm2, %v3657_v55  ;;  %v3655_v19 = vmul.f32 %v4186_v60, %v5957_v7 }
 0x39c   : > { %4201 = vrcp.f32 %v3601_v56  ;;  %v3599_v57 = vadd.f32 1.0, %v4188_v32  ;;  %v4190_v63 = vpop.eup %4189 }
 0x39d   : > { %3687 = vst.msk [vmem:[%s5873_s13 + $0xa8] sm:$0xff] %vm356_vm2, %v3655_v19  ;;  %v3660_v1 = vmul.f32 %v4190_v63, %v5961_v28 }
 0x39e   : > { %4203 = vrcp.f32 %v3599_v57 }
 0x39f   : > { %v4192_v39 = vpop.eup %4191  ;;  %3692 = vst.msk [vmem:[%s5873_s13 + $0xd0] sm:$0xff] %vm356_vm2, %v3660_v1 }
 0x3a0   : > { %v3658_v50 = vmul.f32 %v4192_v39, %v5964_v44 }
 0x3a1   : > { %v4194_v25 = vpop.eup %4193 }
 0x3a2   : > { %3690 = vst.msk [vmem:[%s5873_s13 + $0xc0] sm:$0xff] %vm356_vm2, %v3658_v50  ;;  %v3661_v7 = vmul.f32 %v4194_v25, %v5970_v58 }
 0x3a3   : > { %v4196_v47 = vpop.eup %4195 }
 0x3a4   : > { %3693 = vst.msk [vmem:[%s5873_s13 + $0xd8] sm:$0xff] %vm356_vm2, %v3661_v7  ;;  %v3659_v49 = vmul.f32 %v4196_v47, %v5977_v2 }
 0x3a5   : > { %v4198_v28 = vpop.eup %4197 }
 0x3a6   : > { %3691 = vst.msk [vmem:[%s5873_s13 + $0xc8] sm:$0xff] %vm356_vm2, %v3659_v49  ;;  %v3664_v14 = vmul.f32 %v4198_v28, %v5984_v22 }
 0x3a7   : > { %v4200_v36 = vpop.eup %4199 }
 0x3a8   : > { %3696 = vst.msk [vmem:[%s5873_s13 + $0xf0] sm:$0xff] %vm356_vm2, %v3664_v14  ;;  %v3662_v44 = vmul.f32 %v4200_v36, %v5990_v6 }
 0x3a9   : > { %v4202_v34 = vpop.eup %4201 }
 0x3aa   : > { %3694 = vst.msk [vmem:[%s5873_s13 + $0xe0] sm:$0xff] %vm356_vm2, %v3662_v44  ;;  %v3665_v58 = vmul.f32 %v4202_v34, %v5998_v0 }
 0x3ab   : > { %v4204_v46 = vpop.eup %4203 }
 0x3ac   : > { %3697 = vst.msk [vmem:[%s5873_s13 + $0xf8] sm:$0xff] %vm356_vm2, %v3665_v58  ;;  %v3663_v2 = vmul.f32 %v4204_v46, %v6005_v16 }
 0x3ae   : > { %3695 = vst.msk [vmem:[%s5873_s13 + $0xe8] sm:$0xff] %vm356_vm2, %v3663_v2 }
 0x3af PF: > { %s15_s18 = sadd.s32 1, %s4213_s18  }
 0x3b0   : > { %p12_p4 = scmp.ge.s32.totalorder %s15_s18, 4  }
 0x3b2   :  { %14 = sbr.rel (!%p12_p4) target bundleno = 1 (0x1), region = 75 }

</bundles_post_ra>
